<compile_context>
chip_gen: v7x
topology: tpu7x:2x2x1
jax: 0.10.0
libtpu: 0.0.40
codegen_flags: <defaults>
</compile_context>

<pallas_src>
import jax
import jax.numpy as jnp
from jax import lax
from jax.experimental import pallas as pl
from jax.experimental.pallas import tpu as pltpu

EPS = 1e-5
CHUNK = 8   # WKV recurrence processed in sublane-sized time chunks

BLOCK_PARAM_NAMES = (
    "ln1_g", "ln1_b", "ln2_g", "ln2_b",
    "tm_u", "tm_w", "tm_mix_r", "tm_mix_k", "tm_mix_v",
    "tm_wk", "tm_wv", "tm_wr", "tm_lo_w", "tm_lo_b",
    "cm_mix_r", "cm_mix_k", "cm_wk", "cm_wv", "cm_wr",
)
MATMUL_PARAM_NAMES = frozenset(
    ("tm_wk", "tm_wv", "tm_wr", "tm_lo_w", "cm_wk", "cm_wv", "cm_wr"))


# ----------------------------- kernel helpers ------------------------------

def _layernorm(x, gamma, beta):
    # x: (R, D), gamma/beta: (1, D)
    mean = jnp.mean(x, axis=-1, keepdims=True)
    var = jnp.mean(jnp.square(x - mean), axis=-1, keepdims=True)
    return (x - mean) * lax.rsqrt(var + EPS) * gamma + beta


def _time_shift(x, bg):
    # Rows are time-major (row = t*bg + b); torch.nn.ZeroPad2d((0,0,1,-1)) ==
    # shift time by one step == roll rows by bg (XLU) + zero the t == 0 rows.
    rolled = pltpu.roll(x, shift=bg, axis=0)
    row = lax.broadcasted_iota(jnp.int32, x.shape, 0)
    return jnp.where(row < bg, 0.0, rolled)


def _mix(xn, xs, m):
    # xn*m + xs*(1-m) rewritten as a single lerp
    return xs + (xn - xs) * m


def _dot_bf16(a, w_ref):
    # bf16 operands on the MXU, f32 accumulation (weights pre-cast to bf16).
    return jnp.dot(a.astype(jnp.bfloat16), w_ref[...],
                   preferred_element_type=jnp.float32)


# ------------------------------ fused kernel -------------------------------

def fused_rwkv_kernel(x_ref,
                      ln1_g, ln1_b, ln2_g, ln2_b,
                      tm_u, tm_w, tm_mix_r, tm_mix_k, tm_mix_v,
                      tm_wk, tm_wv, tm_wr, tm_lo_w, tm_lo_b,
                      cm_mix_r, cm_mix_k, cm_wk, cm_wv, cm_wr,
                      hw1, hb1, hw2, hb2,
                      out_ref,
                      xres, e1_s, e2_s, ev_s):
    layer = pl.program_id(1)
    n_layers = pl.num_programs(1)
    Bg, T, D = x_ref.shape
    TB = Bg * T

    # Load the residual stream into VMEM once per batch group, in time-major
    # row order (row = t*Bg + b).  It stays resident across all layer steps.
    @pl.when(layer == 0)
    def _():
        xin = x_ref[...]                              # (Bg, T, D)
        if Bg == 1:
            xres[...] = xin.reshape(TB, D)            # free reshape
        else:
            xres[...] = jnp.transpose(xin, (1, 0, 2)).reshape(TB, D)

    x2 = xres[...]                                    # (TB, D) f32

    # ---------------- TimeMixing( ln1(x) ) ----------------
    xn = _layernorm(x2, ln1_g[...], ln1_b[...])
    xs = _time_shift(xn, Bg)

    k_in = _mix(xn, xs, tm_mix_k[...])
    v_in = _mix(xn, xs, tm_mix_v[...])
    r_in = jax.nn.sigmoid(_mix(xn, xs, tm_mix_r[...]))

    k = _dot_bf16(k_in, tm_wk)                        # (TB, D) f32
    v = _dot_bf16(v_in, tm_wv)
    r = _dot_bf16(r_in, tm_wr)

    u = tm_u[...]                                     # (1, D)
    w = tm_w[...]                                     # (1, D)

    # Hoist all carry-independent exponentials out of the recurrence (exact
    # rewrite of the torch loop), vectorized over the whole (TB, D) tile.
    q = jnp.maximum(u + k, w)
    e1 = jnp.exp(-w - q)
    e2 = jnp.exp(u + k - q)
    e1_s[...] = e1.reshape(T, Bg, D)
    e2_s[...] = e2.reshape(T, Bg, D)
    ev_s[...] = (e2 * v).reshape(T, Bg, D)            # consumed then reused

    # WKV recurrence: (Bg, D) carry, 8-step unrolled chunks, two FMAs per step.
    # The division is hoisted out of the loop: a-rows overwrite ev_s and b-rows
    # overwrite e2_s (both already consumed for that chunk).
    def chunk_body(c, carry):
        a_t, b_t = carry                              # (Bg, D) each
        base = pl.multiple_of(c * CHUNK, CHUNK)
        e1c = e1_s[pl.ds(base, CHUNK), :, :]
        e2c = e2_s[pl.ds(base, CHUNK), :, :]
        evc = ev_s[pl.ds(base, CHUNK), :, :]
        a_rows, b_rows = [], []
        for j in range(CHUNK):                        # unrolled
            a_t = e1c[j] * a_t + evc[j]
            b_t = e1c[j] * b_t + e2c[j]
            a_rows.append(a_t)
            b_rows.append(b_t)
        ev_s[pl.ds(base, CHUNK), :, :] = jnp.stack(a_rows, axis=0)
        e2_s[pl.ds(base, CHUNK), :, :] = jnp.stack(b_rows, axis=0)
        return (a_t, b_t)

    zero = jnp.zeros((Bg, D), jnp.float32)
    _ = lax.fori_loop(0, T // CHUNK, chunk_body, (zero, zero))

    # One vectorized exact divide (accuracy: no approx reciprocal in the loop).
    wkv = (ev_s[...] / e2_s[...]).reshape(TB, D)
    tm_out = _dot_bf16(wkv * r, tm_lo_w) + tm_lo_b[...]
    x1 = x2 + tm_out

    # ---------------- ChannelMixing( ln2(x1) ) ----------------
    yn = _layernorm(x1, ln2_g[...], ln2_b[...])
    ys = _time_shift(yn, Bg)

    ck_in = _mix(yn, ys, cm_mix_k[...])
    cr_in = _mix(yn, ys, cm_mix_r[...])

    ck = jnp.square(jax.nn.relu(_dot_bf16(ck_in, cm_wk)))
    cv = _dot_bf16(ck, cm_wv)
    cr = jax.nn.sigmoid(_dot_bf16(cr_in, cm_wr))

    x_out = x1 + cr * cv
    xres[...] = x_out                                 # residual stream for next layer

    # -------- seq-dim MLP head, fused (last layer only, no HBM transposes) ----
    @pl.when(layer == n_layers - 1)
    def _():
        x3 = x_out.reshape(T, Bg, D)
        # TODO(synk): for large Bg, replace this unrolled per-batch loop with a
        #             single lane-packed (T, Bg*D) contraction.
        for b in range(Bg):
            xb = x3[:, b, :].astype(jnp.bfloat16)                  # (T, D)
            # h[f, d] = sum_t w1[t, f] * x[t, d]
            h = lax.dot_general(hw1[...], xb, (((0,), (0,)), ((), ())),
                                preferred_element_type=jnp.float32)  # (F, D)
            h = jax.nn.relu(h + hb1[...]).astype(jnp.bfloat16)
            # o[p, d] = sum_f w2[f, p] * h[f, d]
            o = lax.dot_general(hw2[...], h, (((0,), (0,)), ((), ())),
                                preferred_element_type=jnp.float32)  # (P, D)
            out_ref[b] = (o + hb2[...]).astype(out_ref.dtype)


# ------------------------------ model wrapper --------------------------------

def _vmem_limit_bytes(required):
    # Generation-aware VMEM budget: cap at 85% of the chip's VMEM.
    try:
        cap = int(pltpu.get_tpu_info().vmem_capacity_bytes)
    except Exception:
        cap = 64 * 1024 * 1024   # conservative fallback (v7x per-core VMEM)
    return int(min(max(2 * required, 32 * 1024 * 1024), int(0.85 * cap)))


def prepare_params(mp):
    """Stack per-layer params along a leading L axis; bf16-cast matmul weights.

    Done ONCE, outside the jitted forward (no per-call HBM casts)."""
    blocks = mp["blocks"]
    stacked = {}
    for name in BLOCK_PARAM_NAMES:
        a = jnp.stack([bp[name] for bp in blocks], axis=0)   # (L, ...)
        if name in MATMUL_PARAM_NAMES:
            a = a.astype(jnp.bfloat16)
        stacked[name] = a
    head = {
        "w1": mp["lin1_w"].astype(jnp.bfloat16),              # (T, F)
        "b1": mp["lin1_b"].reshape(-1, 1),                    # (F, 1)
        "w2": mp["lin2_w"].astype(jnp.bfloat16),              # (F, P)
        "b2": mp["lin2_b"].reshape(-1, 1),                    # (P, 1)
    }
    return {"stacked": stacked, "head": head}


def rwkv_model_fused(x, prep, *, groups=None):
    B, T, D = x.shape
    st, hd = prep["stacked"], prep["head"]
    L = st["ln1_g"].shape[0]
    P = hd["w2"].shape[1]

    # Batch groups: 2-way "parallel" grid axis keeps both v7x TensorCores busy
    # (on v5e/v6e the extra grid step is just a cheap serial iteration).
    if groups is None:
        groups = 2 if (B % 2 == 0 and B >= 2) else 1
    assert B % groups == 0
    Bg = B // groups
    assert T % CHUNK == 0, "seq_len must be a multiple of 8 for the chunked WKV loop"

    in_specs = [pl.BlockSpec((Bg, T, D), lambda g, l: (g, 0, 0))]
    args = [x]
    for name in BLOCK_PARAM_NAMES:
        p = st[name]
        # Per-layer weights: block index follows the layer axis -> the pipeline
        # prefetches layer l+1's weights while layer l computes.
        in_specs.append(pl.BlockSpec((None,) + tuple(p.shape[1:]),
                                     lambda g, l: (l, 0, 0)))
        args.append(p)
    for p in (hd["w1"], hd["b1"], hd["w2"], hd["b2"]):
        # Grid-invariant head params (small).  TODO(synk): at large shapes use
        # pipeline_mode=pl.Buffered(1) here to avoid double-buffering them.
        in_specs.append(pl.BlockSpec(tuple(p.shape), lambda g, l: (0, 0)))
        args.append(p)

    out_spec = pl.BlockSpec((Bg, P, D), lambda g, l: (g, 0, 0))

    scratch_shapes = [
        pltpu.VMEM((Bg * T, D), jnp.float32),   # residual stream (time-major rows)
        pltpu.VMEM((T, Bg, D), jnp.float32),    # e1
        pltpu.VMEM((T, Bg, D), jnp.float32),    # e2   -> wkv denominator
        pltpu.VMEM((T, Bg, D), jnp.float32),    # e2*v -> wkv numerator
    ]

    per_layer_bytes = sum(int(st[n].size) * st[n].dtype.itemsize // L
                          for n in BLOCK_PARAM_NAMES)
    head_bytes = sum(int(a.size) * a.dtype.itemsize
                     for a in (hd["w1"], hd["b1"], hd["w2"], hd["b2"]))
    io_bytes = (Bg * T * D + Bg * P * D) * 4
    scratch_bytes = 4 * T * Bg * D * 4
    required = 2 * (per_layer_bytes + head_bytes + io_bytes) + scratch_bytes

    grid_spec = pltpu.PrefetchScalarGridSpec(
        num_scalar_prefetch=0,
        grid=(groups, L),                       # layers innermost ("arbitrary")
        in_specs=in_specs,
        out_specs=out_spec,
        scratch_shapes=scratch_shapes,
    )

    return pl.pallas_call(
        fused_rwkv_kernel,
        out_shape=jax.ShapeDtypeStruct((B, P, D), jnp.float32),
        grid_spec=grid_spec,
        compiler_params=pltpu.CompilerParams(
            dimension_semantics=("parallel", "arbitrary"),
            vmem_limit_bytes=_vmem_limit_bytes(required)),
    )(*args)


@jax.jit
def rwkv_model(x, prep):
    return rwkv_model_fused(x, prep)


# ------------------------- pure-JAX reference (check) ------------------------

def _ref_layernorm(x, g, b):
    mean = jnp.mean(x, axis=-1, keepdims=True)
    var = jnp.mean(jnp.square(x - mean), axis=-1, keepdims=True)
    return (x - mean) * lax.rsqrt(var + EPS) * g + b


def _ref_time_shift(x):
    return jnp.concatenate([jnp.zeros_like(x[:1, :]), x[:-1, :]], axis=0)


def rwkv_block_ref(x, p):
    def one(xb):  # xb: (T, D)
        xn = _ref_layernorm(xb, p["ln1_g"], p["ln1_b"])
        xs = _ref_time_shift(xn)
        k_in = xn * p["tm_mix_k"] + xs * (1 - p["tm_mix_k"])
        v_in = xn * p["tm_mix_v"] + xs * (1 - p["tm_mix_v"])
        r_in = jax.nn.sigmoid(xn * p["tm_mix_r"] + xs * (1 - p["tm_mix_r"]))
        k = k_in @ p["tm_wk"]
        v = v_in @ p["tm_wv"]
        r = r_in @ p["tm_wr"]
        u, w = p["tm_u"][0], p["tm_w"][0]

        def scan_body(carry, kv):
            a_t, b_t = carry
            k_i, v_i = kv
            q = jnp.maximum(u + k_i, w)
            e1 = jnp.exp(-w - q)
            e2 = jnp.exp(u + k_i - q)
            a_t = e1 * a_t + e2 * v_i
            b_t = e1 * b_t + e2
            return (a_t, b_t), a_t / b_t

        _, wkv = lax.scan(scan_body,
                          (jnp.zeros_like(u), jnp.zeros_like(u)), (k, v))
        tm_out = (wkv * r) @ p["tm_lo_w"] + p["tm_lo_b"]
        x1 = xb + tm_out

        yn = _ref_layernorm(x1, p["ln2_g"], p["ln2_b"])
        ys = _ref_time_shift(yn)
        ck_in = yn * p["cm_mix_k"] + ys * (1 - p["cm_mix_k"])
        cr_in = yn * p["cm_mix_r"] + ys * (1 - p["cm_mix_r"])
        ck = jnp.square(jax.nn.relu(ck_in @ p["cm_wk"]))
        cv = ck @ p["cm_wv"]
        cr = jax.nn.sigmoid(cr_in @ p["cm_wr"])
        return x1 + cr * cv

    return jax.vmap(one)(x)


def rwkv_model_ref(x, mp):
    for bp in mp["blocks"]:
        x = rwkv_block_ref(x, bp)
    xt = jnp.transpose(x, (0, 2, 1))
    h = jax.nn.relu(xt @ mp["lin1_w"] + mp["lin1_b"])
    o = h @ mp["lin2_w"] + mp["lin2_b"]
    return jnp.transpose(o, (0, 2, 1))


# --------------------------------- params ------------------------------------

def make_block_params(key, dim):
    ks = jax.random.split(key, 19)
    n = lambda k, shape, s=0.1: s * jax.random.normal(k, shape, jnp.float32)
    u01 = lambda k, shape: jax.random.uniform(k, shape, jnp.float32)
    return {
        "ln1_g": 1.0 + n(ks[0], (1, dim)), "ln1_b": n(ks[1], (1, dim)),
        "ln2_g": 1.0 + n(ks[2], (1, dim)), "ln2_b": n(ks[3], (1, dim)),
        "tm_u": n(ks[4], (1, dim)), "tm_w": 0.5 + n(ks[5], (1, dim)),
        "tm_mix_r": u01(ks[6], (1, dim)),
        "tm_mix_k": u01(ks[7], (1, dim)),
        "tm_mix_v": u01(ks[8], (1, dim)),
        # matmul weights stored pre-transposed so kernels compute x @ W.T
        "tm_wk": n(ks[9], (dim, dim)), "tm_wv": n(ks[10], (dim, dim)),
        "tm_wr": n(ks[11], (dim, dim)),
        "tm_lo_w": n(ks[12], (dim, dim)), "tm_lo_b": n(ks[13], (1, dim)),
        "cm_mix_r": u01(ks[14], (1, dim)),
        "cm_mix_k": u01(ks[15], (1, dim)),
        "cm_wk": n(ks[16], (dim, dim)), "cm_wv": n(ks[17], (dim, dim)),
        "cm_wr": n(ks[18], (dim, dim)),
    }


def make_model_params(key, dim, seq_len, d_ff, pred_len, e_layers):
    keys = jax.random.split(key, e_layers + 4)
    n = lambda k, shape, s=0.1: s * jax.random.normal(k, shape, jnp.float32)
    return {
        "blocks": [make_block_params(keys[i], dim) for i in range(e_layers)],
        "lin1_w": n(keys[e_layers], (seq_len, d_ff)),
        "lin1_b": n(keys[e_layers + 1], (1, d_ff)),
        "lin2_w": n(keys[e_layers + 2], (d_ff, pred_len)),
        "lin2_b": n(keys[e_layers + 3], (1, pred_len)),
    }


# ---------------------------------- main --------------------------------------

if __name__ == "__main__":
    B, T, D = 2, 8, 32            # batch, seq_len, enc_in
    E_LAYERS, D_FF, PRED_LEN = 2, 16, 4

    key = jax.random.PRNGKey(0)
    kx, kp = jax.random.split(key)
    x = jax.random.normal(kx, (B, T, D), jnp.float32)
    params = make_model_params(kp, D, T, D_FF, PRED_LEN, E_LAYERS)

    # Stack per-layer weights + bf16-cast matmul weights ONCE, outside jit.
    prep = prepare_params(params)

    out = rwkv_model(x, prep)
    out = jax.block_until_ready(out)

    ref = rwkv_model_ref(x, params)
    assert out.shape == (B, PRED_LEN, D)
    max_err = jnp.max(jnp.abs(out - ref))
    # bf16 matmuls vs the f32 reference -> loosened tolerance
    assert jnp.allclose(out, ref, atol=3e-2, rtol=3e-2), f"max abs err {max_err}"

    print("KERNEL_OK")
</pallas_src>

<mosaic_0001>
module attributes {stable_mosaic.version = 11 : i64} {
  func.func @fused_rwkv_kernel(%arg0: i32, %arg1: i32, %arg2: memref<1x8x32xf32, #tpu.memory_space<vmem>>, %arg3: memref<1x1x32xf32, #tpu.memory_space<vmem>>, %arg4: memref<1x1x32xf32, #tpu.memory_space<vmem>>, %arg5: memref<1x1x32xf32, #tpu.memory_space<vmem>>, %arg6: memref<1x1x32xf32, #tpu.memory_space<vmem>>, %arg7: memref<1x1x32xf32, #tpu.memory_space<vmem>>, %arg8: memref<1x1x32xf32, #tpu.memory_space<vmem>>, %arg9: memref<1x1x32xf32, #tpu.memory_space<vmem>>, %arg10: memref<1x1x32xf32, #tpu.memory_space<vmem>>, %arg11: memref<1x1x32xf32, #tpu.memory_space<vmem>>, %arg12: memref<1x32x32xbf16, #tpu.memory_space<vmem>>, %arg13: memref<1x32x32xbf16, #tpu.memory_space<vmem>>, %arg14: memref<1x32x32xbf16, #tpu.memory_space<vmem>>, %arg15: memref<1x32x32xbf16, #tpu.memory_space<vmem>>, %arg16: memref<1x1x32xf32, #tpu.memory_space<vmem>>, %arg17: memref<1x1x32xf32, #tpu.memory_space<vmem>>, %arg18: memref<1x1x32xf32, #tpu.memory_space<vmem>>, %arg19: memref<1x32x32xbf16, #tpu.memory_space<vmem>>, %arg20: memref<1x32x32xbf16, #tpu.memory_space<vmem>>, %arg21: memref<1x32x32xbf16, #tpu.memory_space<vmem>>, %arg22: memref<8x16xbf16, #tpu.memory_space<vmem>>, %arg23: memref<16x1xf32, #tpu.memory_space<vmem>>, %arg24: memref<16x4xbf16, #tpu.memory_space<vmem>>, %arg25: memref<4x1xf32, #tpu.memory_space<vmem>>, %arg26: memref<1x4x32xf32, #tpu.memory_space<vmem>>, %arg27: memref<8x32xf32, #tpu.memory_space<vmem>>, %arg28: memref<8x1x32xf32, #tpu.memory_space<vmem>>, %arg29: memref<8x1x32xf32, #tpu.memory_space<vmem>>, %arg30: memref<8x1x32xf32, #tpu.memory_space<vmem>>) attributes {dimension_semantics = [#tpu.dimension_semantics<parallel>, #tpu.dimension_semantics<arbitrary>], iteration_bounds = array<i64: 2, 2>, scalar_prefetch = 0 : i64, scratch_operands = 4 : i64, tpu.core_type = #tpu.core_type<tc>, window_params = [{transform_indices = @transform_0, window_bounds = array<i64: 1, 8, 32>}, {transform_indices = @transform_1, window_bounds = array<i64: 1, 1, 32>}, {transform_indices = @transform_2, window_bounds = array<i64: 1, 1, 32>}, {transform_indices = @transform_3, window_bounds = array<i64: 1, 1, 32>}, {transform_indices = @transform_4, window_bounds = array<i64: 1, 1, 32>}, {transform_indices = @transform_5, window_bounds = array<i64: 1, 1, 32>}, {transform_indices = @transform_6, window_bounds = array<i64: 1, 1, 32>}, {transform_indices = @transform_7, window_bounds = array<i64: 1, 1, 32>}, {transform_indices = @transform_8, window_bounds = array<i64: 1, 1, 32>}, {transform_indices = @transform_9, window_bounds = array<i64: 1, 1, 32>}, {transform_indices = @transform_10, window_bounds = array<i64: 1, 32, 32>}, {transform_indices = @transform_11, window_bounds = array<i64: 1, 32, 32>}, {transform_indices = @transform_12, window_bounds = array<i64: 1, 32, 32>}, {transform_indices = @transform_13, window_bounds = array<i64: 1, 32, 32>}, {transform_indices = @transform_14, window_bounds = array<i64: 1, 1, 32>}, {transform_indices = @transform_15, window_bounds = array<i64: 1, 1, 32>}, {transform_indices = @transform_16, window_bounds = array<i64: 1, 1, 32>}, {transform_indices = @transform_17, window_bounds = array<i64: 1, 32, 32>}, {transform_indices = @transform_18, window_bounds = array<i64: 1, 32, 32>}, {transform_indices = @transform_19, window_bounds = array<i64: 1, 32, 32>}, {pipeline_mode = #tpu.pipeline_mode<synchronous>, transform_indices = @transform_20, window_bounds = array<i64: 8, 16>}, {pipeline_mode = #tpu.pipeline_mode<synchronous>, transform_indices = @transform_21, window_bounds = array<i64: 16, 1>}, {pipeline_mode = #tpu.pipeline_mode<synchronous>, transform_indices = @transform_22, window_bounds = array<i64: 16, 4>}, {pipeline_mode = #tpu.pipeline_mode<synchronous>, transform_indices = @transform_23, window_bounds = array<i64: 4, 1>}, {transform_indices = @transform_24, window_bounds = array<i64: 1, 4, 32>}]} {
    %c0_i32 = arith.constant 0 : i32
    %0 = arith.cmpi eq, %arg1, %c0_i32 : i32
    %1 = arith.extui %0 : i1 to i32
    %c0_i32_0 = arith.constant 0 : i32
    %2 = arith.cmpi ne, %1, %c0_i32_0 : i32
    scf.if %2 {
      %c0_116 = arith.constant 0 : index
      %c0_117 = arith.constant 0 : index
      %c0_118 = arith.constant 0 : index
      %306 = vector.load %arg2[%c0_116, %c0_117, %c0_118] : memref<1x8x32xf32, #tpu.memory_space<vmem>>, vector<1x8x32xf32>
      %307 = vector.shape_cast %306 : vector<1x8x32xf32> to vector<8x32xf32>
      %c0_119 = arith.constant 0 : index
      %c0_120 = arith.constant 0 : index
      %308 = vector.load %arg27[%c0_119, %c0_120] : memref<8x32xf32, #tpu.memory_space<vmem>>, vector<8x32xf32>
      tpu.vector_store %arg27[%c0_119, %c0_120], %307 {strides = array<i32>} : memref<8x32xf32, #tpu.memory_space<vmem>>, vector<8x32xf32>,
    } else {
    }
    %c0 = arith.constant 0 : index
    %c0_1 = arith.constant 0 : index
    %3 = vector.load %arg27[%c0, %c0_1] : memref<8x32xf32, #tpu.memory_space<vmem>>, vector<8x32xf32>
    %c0_2 = arith.constant 0 : index
    %c0_3 = arith.constant 0 : index
    %c0_4 = arith.constant 0 : index
    %4 = vector.load %arg3[%c0_2, %c0_3, %c0_4] : memref<1x1x32xf32, #tpu.memory_space<vmem>>, vector<1x1x32xf32>
    %5 = vector.shape_cast %4 : vector<1x1x32xf32> to vector<1x32xf32>
    %c0_5 = arith.constant 0 : index
    %c0_6 = arith.constant 0 : index
    %c0_7 = arith.constant 0 : index
    %6 = vector.load %arg4[%c0_5, %c0_6, %c0_7] : memref<1x1x32xf32, #tpu.memory_space<vmem>>, vector<1x1x32xf32>
    %7 = vector.shape_cast %6 : vector<1x1x32xf32> to vector<1x32xf32>
    %cst = arith.constant dense<0.000000e+00> : vector<8xf32>
    %8 = vector.multi_reduction <add>, %3, %cst [1] : vector<8x32xf32> to vector<8xf32>
    %9 = vector.shape_cast %8 : vector<8xf32> to vector<8x1xf32>
    %cst_8 = arith.constant 3.200000e+01 : f32
    %10 = vector.broadcast %cst_8 : f32 to vector<8x1xf32>
    %11 = arith.divf %9, %10 : vector<8x1xf32>
    %12 = vector.broadcast %11 : vector<8x1xf32> to vector<8x32xf32>
    %13 = arith.subf %3, %12 : vector<8x32xf32>
    %14 = arith.mulf %13, %13 : vector<8x32xf32>
    %cst_9 = arith.constant dense<0.000000e+00> : vector<8xf32>
    %15 = vector.multi_reduction <add>, %14, %cst_9 [1] : vector<8x32xf32> to vector<8xf32>
    %16 = vector.shape_cast %15 : vector<8xf32> to vector<8x1xf32>
    %cst_10 = arith.constant 3.200000e+01 : f32
    %17 = vector.broadcast %cst_10 : f32 to vector<8x1xf32>
    %18 = arith.divf %16, %17 : vector<8x1xf32>
    %19 = vector.broadcast %11 : vector<8x1xf32> to vector<8x32xf32>
    %20 = arith.subf %3, %19 : vector<8x32xf32>
    %cst_11 = arith.constant 9.99999974E-6 : f32
    %21 = vector.broadcast %cst_11 : f32 to vector<8x1xf32>
    %22 = arith.addf %18, %21 : vector<8x1xf32>
    %23 = math.rsqrt %22 : vector<8x1xf32>
    %24 = vector.broadcast %23 : vector<8x1xf32> to vector<8x32xf32>
    %25 = arith.mulf %20, %24 : vector<8x32xf32>
    %26 = vector.broadcast %5 : vector<1x32xf32> to vector<8x32xf32>
    %27 = arith.mulf %25, %26 : vector<8x32xf32>
    %28 = vector.broadcast %7 : vector<1x32xf32> to vector<8x32xf32>
    %29 = arith.addf %27, %28 : vector<8x32xf32>
    %c1_i32 = arith.constant 1 : i32
    %30 = tpu.dynamic_rotate %29 by %c1_i32 dim 0 : vector<8x32xf32>, i32 -> vector<8x32xf32>
    %31 = tpu.iota {dimensions = array<i32: 0>} : vector<8x32xi32>
    %c1_i32_12 = arith.constant 1 : i32
    %32 = vector.broadcast %c1_i32_12 : i32 to vector<8x32xi32>
    %33 = arith.cmpi slt, %31, %32 : vector<8x32xi32>
    %cst_13 = arith.constant 0.000000e+00 : f32
    %34 = vector.broadcast %cst_13 : f32 to vector<8x32xf32>
    %35 = arith.select %33, %34, %30 : vector<8x32xi1>, vector<8x32xf32>
    %c0_14 = arith.constant 0 : index
    %c0_15 = arith.constant 0 : index
    %c0_16 = arith.constant 0 : index
    %36 = vector.load %arg10[%c0_14, %c0_15, %c0_16] : memref<1x1x32xf32, #tpu.memory_space<vmem>>, vector<1x1x32xf32>
    %37 = vector.shape_cast %36 : vector<1x1x32xf32> to vector<1x32xf32>
    %38 = arith.subf %29, %35 : vector<8x32xf32>
    %39 = vector.broadcast %37 : vector<1x32xf32> to vector<8x32xf32>
    %40 = arith.mulf %38, %39 : vector<8x32xf32>
    %41 = arith.addf %35, %40 : vector<8x32xf32>
    %c0_17 = arith.constant 0 : index
    %c0_18 = arith.constant 0 : index
    %c0_19 = arith.constant 0 : index
    %42 = vector.load %arg11[%c0_17, %c0_18, %c0_19] : memref<1x1x32xf32, #tpu.memory_space<vmem>>, vector<1x1x32xf32>
    %43 = vector.shape_cast %42 : vector<1x1x32xf32> to vector<1x32xf32>
    %44 = arith.subf %29, %35 : vector<8x32xf32>
    %45 = vector.broadcast %43 : vector<1x32xf32> to vector<8x32xf32>
    %46 = arith.mulf %44, %45 : vector<8x32xf32>
    %47 = arith.addf %35, %46 : vector<8x32xf32>
    %c0_20 = arith.constant 0 : index
    %c0_21 = arith.constant 0 : index
    %c0_22 = arith.constant 0 : index
    %48 = vector.load %arg9[%c0_20, %c0_21, %c0_22] : memref<1x1x32xf32, #tpu.memory_space<vmem>>, vector<1x1x32xf32>
    %49 = vector.shape_cast %48 : vector<1x1x32xf32> to vector<1x32xf32>
    %50 = arith.subf %29, %35 : vector<8x32xf32>
    %51 = vector.broadcast %49 : vector<1x32xf32> to vector<8x32xf32>
    %52 = arith.mulf %50, %51 : vector<8x32xf32>
    %53 = arith.addf %35, %52 : vector<8x32xf32>
    %54 = arith.negf %53 : vector<8x32xf32>
    %55 = math.exp %54 : vector<8x32xf32>
    %cst_23 = arith.constant 1.000000e+00 : f32
    %56 = vector.broadcast %cst_23 : f32 to vector<8x32xf32>
    %57 = arith.addf %56, %55 : vector<8x32xf32>
    %58 = arith.divf %56, %57 : vector<8x32xf32>
    %59 = arith.truncf %41 : vector<8x32xf32> to vector<8x32xbf16>
    %c0_24 = arith.constant 0 : index
    %c0_25 = arith.constant 0 : index
    %c0_26 = arith.constant 0 : index
    %60 = vector.load %arg12[%c0_24, %c0_25, %c0_26] : memref<1x32x32xbf16, #tpu.memory_space<vmem>>, vector<1x32x32xbf16>
    %61 = vector.shape_cast %60 : vector<1x32x32xbf16> to vector<32x32xbf16>
    %cst_27 = arith.constant dense<0.000000e+00> : vector<8x32xf32>
    %62 = tpu.matmul %59, %61, %cst_27 {dimension_numbers = #tpu.dot_dimension_numbers<[1], [0], [0], [1], [0, 0, 1, 1], [], []>} : vector<8x32xbf16>, vector<32x32xbf16>, vector<8x32xf32> -> vector<8x32xf32>
    %63 = arith.truncf %47 : vector<8x32xf32> to vector<8x32xbf16>
    %c0_28 = arith.constant 0 : index
    %c0_29 = arith.constant 0 : index
    %c0_30 = arith.constant 0 : index
    %64 = vector.load %arg13[%c0_28, %c0_29, %c0_30] : memref<1x32x32xbf16, #tpu.memory_space<vmem>>, vector<1x32x32xbf16>
    %65 = vector.shape_cast %64 : vector<1x32x32xbf16> to vector<32x32xbf16>
    %cst_31 = arith.constant dense<0.000000e+00> : vector<8x32xf32>
    %66 = tpu.matmul %63, %65, %cst_31 {dimension_numbers = #tpu.dot_dimension_numbers<[1], [0], [0], [1], [0, 0, 1, 1], [], []>} : vector<8x32xbf16>, vector<32x32xbf16>, vector<8x32xf32> -> vector<8x32xf32>
    %67 = arith.truncf %58 : vector<8x32xf32> to vector<8x32xbf16>
    %c0_32 = arith.constant 0 : index
    %c0_33 = arith.constant 0 : index
    %c0_34 = arith.constant 0 : index
    %68 = vector.load %arg14[%c0_32, %c0_33, %c0_34] : memref<1x32x32xbf16, #tpu.memory_space<vmem>>, vector<1x32x32xbf16>
    %69 = vector.shape_cast %68 : vector<1x32x32xbf16> to vector<32x32xbf16>
    %cst_35 = arith.constant dense<0.000000e+00> : vector<8x32xf32>
    %70 = tpu.matmul %67, %69, %cst_35 {dimension_numbers = #tpu.dot_dimension_numbers<[1], [0], [0], [1], [0, 0, 1, 1], [], []>} : vector<8x32xbf16>, vector<32x32xbf16>, vector<8x32xf32> -> vector<8x32xf32>
    %c0_36 = arith.constant 0 : index
    %c0_37 = arith.constant 0 : index
    %c0_38 = arith.constant 0 : index
    %71 = vector.load %arg7[%c0_36, %c0_37, %c0_38] : memref<1x1x32xf32, #tpu.memory_space<vmem>>, vector<1x1x32xf32>
    %72 = vector.shape_cast %71 : vector<1x1x32xf32> to vector<1x32xf32>
    %c0_39 = arith.constant 0 : index
    %c0_40 = arith.constant 0 : index
    %c0_41 = arith.constant 0 : index
    %73 = vector.load %arg8[%c0_39, %c0_40, %c0_41] : memref<1x1x32xf32, #tpu.memory_space<vmem>>, vector<1x1x32xf32>
    %74 = vector.shape_cast %73 : vector<1x1x32xf32> to vector<1x32xf32>
    %75 = vector.broadcast %72 : vector<1x32xf32> to vector<8x32xf32>
    %76 = arith.addf %75, %62 : vector<8x32xf32>
    %77 = vector.broadcast %74 : vector<1x32xf32> to vector<8x32xf32>
    %78 = arith.maximumf %76, %77 : vector<8x32xf32>
    %cst_42 = arith.constant 0.000000e+00 : f32
    %79 = vector.broadcast %cst_42 : f32 to vector<1x32xf32>
    %80 = arith.subf %79, %74 : vector<1x32xf32>
    %81 = vector.broadcast %80 : vector<1x32xf32> to vector<8x32xf32>
    %82 = arith.subf %81, %78 : vector<8x32xf32>
    %83 = math.exp %82 : vector<8x32xf32>
    %84 = vector.broadcast %72 : vector<1x32xf32> to vector<8x32xf32>
    %85 = arith.addf %84, %62 : vector<8x32xf32>
    %86 = arith.subf %85, %78 : vector<8x32xf32>
    %87 = math.exp %86 : vector<8x32xf32>
    %88 = vector.shape_cast %83 : vector<8x32xf32> to vector<8x1x32xf32>
    %c0_43 = arith.constant 0 : index
    %c0_44 = arith.constant 0 : index
    %c0_45 = arith.constant 0 : index
    %89 = vector.load %arg28[%c0_43, %c0_44, %c0_45] : memref<8x1x32xf32, #tpu.memory_space<vmem>>, vector<8x1x32xf32>
    tpu.vector_store %arg28[%c0_43, %c0_44, %c0_45], %88 {strides = array<i32>} : memref<8x1x32xf32, #tpu.memory_space<vmem>>, vector<8x1x32xf32>,
    %90 = vector.shape_cast %87 : vector<8x32xf32> to vector<8x1x32xf32>
    %c0_46 = arith.constant 0 : index
    %c0_47 = arith.constant 0 : index
    %c0_48 = arith.constant 0 : index
    %91 = vector.load %arg29[%c0_46, %c0_47, %c0_48] : memref<8x1x32xf32, #tpu.memory_space<vmem>>, vector<8x1x32xf32>
    tpu.vector_store %arg29[%c0_46, %c0_47, %c0_48], %90 {strides = array<i32>} : memref<8x1x32xf32, #tpu.memory_space<vmem>>, vector<8x1x32xf32>,
    %92 = arith.mulf %87, %66 : vector<8x32xf32>
    %93 = vector.shape_cast %92 : vector<8x32xf32> to vector<8x1x32xf32>
    %c0_49 = arith.constant 0 : index
    %c0_50 = arith.constant 0 : index
    %c0_51 = arith.constant 0 : index
    %94 = vector.load %arg30[%c0_49, %c0_50, %c0_51] : memref<8x1x32xf32, #tpu.memory_space<vmem>>, vector<8x1x32xf32>
    tpu.vector_store %arg30[%c0_49, %c0_50, %c0_51], %93 {strides = array<i32>} : memref<8x1x32xf32, #tpu.memory_space<vmem>>, vector<8x1x32xf32>,
    %cst_52 = arith.constant 0.000000e+00 : f32
    %95 = vector.broadcast %cst_52 : f32 to vector<1x32xf32>
    %c0_i32_53 = arith.constant 0 : i32
    %c8_i32 = arith.constant 8 : i32
    %96 = arith.muli %c0_i32_53, %c8_i32 : i32
    %97 = tpu.assume_multiple %96, 8 : i32
    %98 = arith.index_cast %97 : i32 to index
    %c0_54 = arith.constant 0 : index
    %c0_55 = arith.constant 0 : index
    %99 = vector.load %arg28[%98, %c0_54, %c0_55] : memref<8x1x32xf32, #tpu.memory_space<vmem>>, vector<8x1x32xf32>
    %100 = arith.index_cast %97 : i32 to index
    %c0_56 = arith.constant 0 : index
    %c0_57 = arith.constant 0 : index
    %101 = vector.load %arg29[%100, %c0_56, %c0_57] : memref<8x1x32xf32, #tpu.memory_space<vmem>>, vector<8x1x32xf32>
    %102 = arith.index_cast %97 : i32 to index
    %c0_58 = arith.constant 0 : index
    %c0_59 = arith.constant 0 : index
    %103 = vector.load %arg30[%102, %c0_58, %c0_59] : memref<8x1x32xf32, #tpu.memory_space<vmem>>, vector<8x1x32xf32>
    %104 = vector.extract_strided_slice %99 {offsets = [0, 0, 0], sizes = [1, 1, 32], strides = [1, 1, 1]} : vector<8x1x32xf32> to vector<1x1x32xf32>
    %105 = vector.shape_cast %104 : vector<1x1x32xf32> to vector<1x32xf32>
    %106 = arith.mulf %105, %95 : vector<1x32xf32>
    %107 = vector.extract_strided_slice %103 {offsets = [0, 0, 0], sizes = [1, 1, 32], strides = [1, 1, 1]} : vector<8x1x32xf32> to vector<1x1x32xf32>
    %108 = vector.shape_cast %107 : vector<1x1x32xf32> to vector<1x32xf32>
    %109 = arith.addf %106, %108 : vector<1x32xf32>
    %110 = vector.extract_strided_slice %99 {offsets = [0, 0, 0], sizes = [1, 1, 32], strides = [1, 1, 1]} : vector<8x1x32xf32> to vector<1x1x32xf32>
    %111 = vector.shape_cast %110 : vector<1x1x32xf32> to vector<1x32xf32>
    %112 = arith.mulf %111, %95 : vector<1x32xf32>
    %113 = vector.extract_strided_slice %101 {offsets = [0, 0, 0], sizes = [1, 1, 32], strides = [1, 1, 1]} : vector<8x1x32xf32> to vector<1x1x32xf32>
    %114 = vector.shape_cast %113 : vector<1x1x32xf32> to vector<1x32xf32>
    %115 = arith.addf %112, %114 : vector<1x32xf32>
    %116 = vector.extract_strided_slice %99 {offsets = [1, 0, 0], sizes = [1, 1, 32], strides = [1, 1, 1]} : vector<8x1x32xf32> to vector<1x1x32xf32>
    %117 = vector.shape_cast %116 : vector<1x1x32xf32> to vector<1x32xf32>
    %118 = arith.mulf %117, %109 : vector<1x32xf32>
    %119 = vector.extract_strided_slice %103 {offsets = [1, 0, 0], sizes = [1, 1, 32], strides = [1, 1, 1]} : vector<8x1x32xf32> to vector<1x1x32xf32>
    %120 = vector.shape_cast %119 : vector<1x1x32xf32> to vector<1x32xf32>
    %121 = arith.addf %118, %120 : vector<1x32xf32>
    %122 = vector.extract_strided_slice %99 {offsets = [1, 0, 0], sizes = [1, 1, 32], strides = [1, 1, 1]} : vector<8x1x32xf32> to vector<1x1x32xf32>
    %123 = vector.shape_cast %122 : vector<1x1x32xf32> to vector<1x32xf32>
    %124 = arith.mulf %123, %115 : vector<1x32xf32>
    %125 = vector.extract_strided_slice %101 {offsets = [1, 0, 0], sizes = [1, 1, 32], strides = [1, 1, 1]} : vector<8x1x32xf32> to vector<1x1x32xf32>
    %126 = vector.shape_cast %125 : vector<1x1x32xf32> to vector<1x32xf32>
    %127 = arith.addf %124, %126 : vector<1x32xf32>
    %128 = vector.extract_strided_slice %99 {offsets = [2, 0, 0], sizes = [1, 1, 32], strides = [1, 1, 1]} : vector<8x1x32xf32> to vector<1x1x32xf32>
    %129 = vector.shape_cast %128 : vector<1x1x32xf32> to vector<1x32xf32>
    %130 = arith.mulf %129, %121 : vector<1x32xf32>
    %131 = vector.extract_strided_slice %103 {offsets = [2, 0, 0], sizes = [1, 1, 32], strides = [1, 1, 1]} : vector<8x1x32xf32> to vector<1x1x32xf32>
    %132 = vector.shape_cast %131 : vector<1x1x32xf32> to vector<1x32xf32>
    %133 = arith.addf %130, %132 : vector<1x32xf32>
    %134 = vector.extract_strided_slice %99 {offsets = [2, 0, 0], sizes = [1, 1, 32], strides = [1, 1, 1]} : vector<8x1x32xf32> to vector<1x1x32xf32>
    %135 = vector.shape_cast %134 : vector<1x1x32xf32> to vector<1x32xf32>
    %136 = arith.mulf %135, %127 : vector<1x32xf32>
    %137 = vector.extract_strided_slice %101 {offsets = [2, 0, 0], sizes = [1, 1, 32], strides = [1, 1, 1]} : vector<8x1x32xf32> to vector<1x1x32xf32>
    %138 = vector.shape_cast %137 : vector<1x1x32xf32> to vector<1x32xf32>
    %139 = arith.addf %136, %138 : vector<1x32xf32>
    %140 = vector.extract_strided_slice %99 {offsets = [3, 0, 0], sizes = [1, 1, 32], strides = [1, 1, 1]} : vector<8x1x32xf32> to vector<1x1x32xf32>
    %141 = vector.shape_cast %140 : vector<1x1x32xf32> to vector<1x32xf32>
    %142 = arith.mulf %141, %133 : vector<1x32xf32>
    %143 = vector.extract_strided_slice %103 {offsets = [3, 0, 0], sizes = [1, 1, 32], strides = [1, 1, 1]} : vector<8x1x32xf32> to vector<1x1x32xf32>
    %144 = vector.shape_cast %143 : vector<1x1x32xf32> to vector<1x32xf32>
    %145 = arith.addf %142, %144 : vector<1x32xf32>
    %146 = vector.extract_strided_slice %99 {offsets = [3, 0, 0], sizes = [1, 1, 32], strides = [1, 1, 1]} : vector<8x1x32xf32> to vector<1x1x32xf32>
    %147 = vector.shape_cast %146 : vector<1x1x32xf32> to vector<1x32xf32>
    %148 = arith.mulf %147, %139 : vector<1x32xf32>
    %149 = vector.extract_strided_slice %101 {offsets = [3, 0, 0], sizes = [1, 1, 32], strides = [1, 1, 1]} : vector<8x1x32xf32> to vector<1x1x32xf32>
    %150 = vector.shape_cast %149 : vector<1x1x32xf32> to vector<1x32xf32>
    %151 = arith.addf %148, %150 : vector<1x32xf32>
    %152 = vector.extract_strided_slice %99 {offsets = [4, 0, 0], sizes = [1, 1, 32], strides = [1, 1, 1]} : vector<8x1x32xf32> to vector<1x1x32xf32>
    %153 = vector.shape_cast %152 : vector<1x1x32xf32> to vector<1x32xf32>
    %154 = arith.mulf %153, %145 : vector<1x32xf32>
    %155 = vector.extract_strided_slice %103 {offsets = [4, 0, 0], sizes = [1, 1, 32], strides = [1, 1, 1]} : vector<8x1x32xf32> to vector<1x1x32xf32>
    %156 = vector.shape_cast %155 : vector<1x1x32xf32> to vector<1x32xf32>
    %157 = arith.addf %154, %156 : vector<1x32xf32>
    %158 = vector.extract_strided_slice %99 {offsets = [4, 0, 0], sizes = [1, 1, 32], strides = [1, 1, 1]} : vector<8x1x32xf32> to vector<1x1x32xf32>
    %159 = vector.shape_cast %158 : vector<1x1x32xf32> to vector<1x32xf32>
    %160 = arith.mulf %159, %151 : vector<1x32xf32>
    %161 = vector.extract_strided_slice %101 {offsets = [4, 0, 0], sizes = [1, 1, 32], strides = [1, 1, 1]} : vector<8x1x32xf32> to vector<1x1x32xf32>
    %162 = vector.shape_cast %161 : vector<1x1x32xf32> to vector<1x32xf32>
    %163 = arith.addf %160, %162 : vector<1x32xf32>
    %164 = vector.extract_strided_slice %99 {offsets = [5, 0, 0], sizes = [1, 1, 32], strides = [1, 1, 1]} : vector<8x1x32xf32> to vector<1x1x32xf32>
    %165 = vector.shape_cast %164 : vector<1x1x32xf32> to vector<1x32xf32>
    %166 = arith.mulf %165, %157 : vector<1x32xf32>
    %167 = vector.extract_strided_slice %103 {offsets = [5, 0, 0], sizes = [1, 1, 32], strides = [1, 1, 1]} : vector<8x1x32xf32> to vector<1x1x32xf32>
    %168 = vector.shape_cast %167 : vector<1x1x32xf32> to vector<1x32xf32>
    %169 = arith.addf %166, %168 : vector<1x32xf32>
    %170 = vector.extract_strided_slice %99 {offsets = [5, 0, 0], sizes = [1, 1, 32], strides = [1, 1, 1]} : vector<8x1x32xf32> to vector<1x1x32xf32>
    %171 = vector.shape_cast %170 : vector<1x1x32xf32> to vector<1x32xf32>
    %172 = arith.mulf %171, %163 : vector<1x32xf32>
    %173 = vector.extract_strided_slice %101 {offsets = [5, 0, 0], sizes = [1, 1, 32], strides = [1, 1, 1]} : vector<8x1x32xf32> to vector<1x1x32xf32>
    %174 = vector.shape_cast %173 : vector<1x1x32xf32> to vector<1x32xf32>
    %175 = arith.addf %172, %174 : vector<1x32xf32>
    %176 = vector.extract_strided_slice %99 {offsets = [6, 0, 0], sizes = [1, 1, 32], strides = [1, 1, 1]} : vector<8x1x32xf32> to vector<1x1x32xf32>
    %177 = vector.shape_cast %176 : vector<1x1x32xf32> to vector<1x32xf32>
    %178 = arith.mulf %177, %169 : vector<1x32xf32>
    %179 = vector.extract_strided_slice %103 {offsets = [6, 0, 0], sizes = [1, 1, 32], strides = [1, 1, 1]} : vector<8x1x32xf32> to vector<1x1x32xf32>
    %180 = vector.shape_cast %179 : vector<1x1x32xf32> to vector<1x32xf32>
    %181 = arith.addf %178, %180 : vector<1x32xf32>
    %182 = vector.extract_strided_slice %99 {offsets = [6, 0, 0], sizes = [1, 1, 32], strides = [1, 1, 1]} : vector<8x1x32xf32> to vector<1x1x32xf32>
    %183 = vector.shape_cast %182 : vector<1x1x32xf32> to vector<1x32xf32>
    %184 = arith.mulf %183, %175 : vector<1x32xf32>
    %185 = vector.extract_strided_slice %101 {offsets = [6, 0, 0], sizes = [1, 1, 32], strides = [1, 1, 1]} : vector<8x1x32xf32> to vector<1x1x32xf32>
    %186 = vector.shape_cast %185 : vector<1x1x32xf32> to vector<1x32xf32>
    %187 = arith.addf %184, %186 : vector<1x32xf32>
    %188 = vector.extract_strided_slice %99 {offsets = [7, 0, 0], sizes = [1, 1, 32], strides = [1, 1, 1]} : vector<8x1x32xf32> to vector<1x1x32xf32>
    %189 = vector.shape_cast %188 : vector<1x1x32xf32> to vector<1x32xf32>
    %190 = arith.mulf %189, %181 : vector<1x32xf32>
    %191 = vector.extract_strided_slice %103 {offsets = [7, 0, 0], sizes = [1, 1, 32], strides = [1, 1, 1]} : vector<8x1x32xf32> to vector<1x1x32xf32>
    %192 = vector.shape_cast %191 : vector<1x1x32xf32> to vector<1x32xf32>
    %193 = arith.addf %190, %192 : vector<1x32xf32>
    %194 = vector.extract_strided_slice %99 {offsets = [7, 0, 0], sizes = [1, 1, 32], strides = [1, 1, 1]} : vector<8x1x32xf32> to vector<1x1x32xf32>
    %195 = vector.shape_cast %194 : vector<1x1x32xf32> to vector<1x32xf32>
    %196 = arith.mulf %195, %187 : vector<1x32xf32>
    %197 = vector.extract_strided_slice %101 {offsets = [7, 0, 0], sizes = [1, 1, 32], strides = [1, 1, 1]} : vector<8x1x32xf32> to vector<1x1x32xf32>
    %198 = vector.shape_cast %197 : vector<1x1x32xf32> to vector<1x32xf32>
    %199 = arith.addf %196, %198 : vector<1x32xf32>
    %200 = vector.shape_cast %109 : vector<1x32xf32> to vector<1x1x32xf32>
    %201 = vector.shape_cast %121 : vector<1x32xf32> to vector<1x1x32xf32>
    %202 = vector.shape_cast %133 : vector<1x32xf32> to vector<1x1x32xf32>
    %203 = vector.shape_cast %145 : vector<1x32xf32> to vector<1x1x32xf32>
    %204 = vector.shape_cast %157 : vector<1x32xf32> to vector<1x1x32xf32>
    %205 = vector.shape_cast %169 : vector<1x32xf32> to vector<1x1x32xf32>
    %206 = vector.shape_cast %181 : vector<1x32xf32> to vector<1x1x32xf32>
    %207 = vector.shape_cast %193 : vector<1x32xf32> to vector<1x1x32xf32>
    %208 = tpu.concatenate %200, %201, %202, %203, %204, %205, %206, %207 in 0 : vector<1x1x32xf32>, vector<1x1x32xf32>, vector<1x1x32xf32>, vector<1x1x32xf32>, vector<1x1x32xf32>, vector<1x1x32xf32>, vector<1x1x32xf32>, vector<1x1x32xf32> -> vector<8x1x32xf32>
    %209 = arith.index_cast %97 : i32 to index
    %c0_60 = arith.constant 0 : index
    %c0_61 = arith.constant 0 : index
    %210 = vector.load %arg30[%209, %c0_60, %c0_61] : memref<8x1x32xf32, #tpu.memory_space<vmem>>, vector<8x1x32xf32>
    tpu.vector_store %arg30[%209, %c0_60, %c0_61], %208 {strides = array<i32>} : memref<8x1x32xf32, #tpu.memory_space<vmem>>, vector<8x1x32xf32>,
    %211 = vector.shape_cast %115 : vector<1x32xf32> to vector<1x1x32xf32>
    %212 = vector.shape_cast %127 : vector<1x32xf32> to vector<1x1x32xf32>
    %213 = vector.shape_cast %139 : vector<1x32xf32> to vector<1x1x32xf32>
    %214 = vector.shape_cast %151 : vector<1x32xf32> to vector<1x1x32xf32>
    %215 = vector.shape_cast %163 : vector<1x32xf32> to vector<1x1x32xf32>
    %216 = vector.shape_cast %175 : vector<1x32xf32> to vector<1x1x32xf32>
    %217 = vector.shape_cast %187 : vector<1x32xf32> to vector<1x1x32xf32>
    %218 = vector.shape_cast %199 : vector<1x32xf32> to vector<1x1x32xf32>
    %219 = tpu.concatenate %211, %212, %213, %214, %215, %216, %217, %218 in 0 : vector<1x1x32xf32>, vector<1x1x32xf32>, vector<1x1x32xf32>, vector<1x1x32xf32>, vector<1x1x32xf32>, vector<1x1x32xf32>, vector<1x1x32xf32>, vector<1x1x32xf32> -> vector<8x1x32xf32>
    %220 = arith.index_cast %97 : i32 to index
    %c0_62 = arith.constant 0 : index
    %c0_63 = arith.constant 0 : index
    %221 = vector.load %arg29[%220, %c0_62, %c0_63] : memref<8x1x32xf32, #tpu.memory_space<vmem>>, vector<8x1x32xf32>
    tpu.vector_store %arg29[%220, %c0_62, %c0_63], %219 {strides = array<i32>} : memref<8x1x32xf32, #tpu.memory_space<vmem>>, vector<8x1x32xf32>,
    %c1_i32_64 = arith.constant 1 : i32
    %c0_65 = arith.constant 0 : index
    %c0_66 = arith.constant 0 : index
    %c0_67 = arith.constant 0 : index
    %222 = vector.load %arg30[%c0_65, %c0_66, %c0_67] : memref<8x1x32xf32, #tpu.memory_space<vmem>>, vector<8x1x32xf32>
    %c0_68 = arith.constant 0 : index
    %c0_69 = arith.constant 0 : index
    %c0_70 = arith.constant 0 : index
    %223 = vector.load %arg29[%c0_68, %c0_69, %c0_70] : memref<8x1x32xf32, #tpu.memory_space<vmem>>, vector<8x1x32xf32>
    %224 = arith.divf %222, %223 : vector<8x1x32xf32>
    %225 = vector.shape_cast %224 : vector<8x1x32xf32> to vector<8x32xf32>
    %226 = arith.mulf %225, %70 : vector<8x32xf32>
    %227 = arith.truncf %226 : vector<8x32xf32> to vector<8x32xbf16>
    %c0_71 = arith.constant 0 : index
    %c0_72 = arith.constant 0 : index
    %c0_73 = arith.constant 0 : index
    %228 = vector.load %arg15[%c0_71, %c0_72, %c0_73] : memref<1x32x32xbf16, #tpu.memory_space<vmem>>, vector<1x32x32xbf16>
    %229 = vector.shape_cast %228 : vector<1x32x32xbf16> to vector<32x32xbf16>
    %cst_74 = arith.constant dense<0.000000e+00> : vector<8x32xf32>
    %230 = tpu.matmul %227, %229, %cst_74 {dimension_numbers = #tpu.dot_dimension_numbers<[1], [0], [0], [1], [0, 0, 1, 1], [], []>} : vector<8x32xbf16>, vector<32x32xbf16>, vector<8x32xf32> -> vector<8x32xf32>
    %c0_75 = arith.constant 0 : index
    %c0_76 = arith.constant 0 : index
    %c0_77 = arith.constant 0 : index
    %231 = vector.load %arg16[%c0_75, %c0_76, %c0_77] : memref<1x1x32xf32, #tpu.memory_space<vmem>>, vector<1x1x32xf32>
    %232 = vector.shape_cast %231 : vector<1x1x32xf32> to vector<1x32xf32>
    %233 = vector.broadcast %232 : vector<1x32xf32> to vector<8x32xf32>
    %234 = arith.addf %230, %233 : vector<8x32xf32>
    %235 = arith.addf %3, %234 : vector<8x32xf32>
    %c0_78 = arith.constant 0 : index
    %c0_79 = arith.constant 0 : index
    %c0_80 = arith.constant 0 : index
    %236 = vector.load %arg5[%c0_78, %c0_79, %c0_80] : memref<1x1x32xf32, #tpu.memory_space<vmem>>, vector<1x1x32xf32>
    %237 = vector.shape_cast %236 : vector<1x1x32xf32> to vector<1x32xf32>
    %c0_81 = arith.constant 0 : index
    %c0_82 = arith.constant 0 : index
    %c0_83 = arith.constant 0 : index
    %238 = vector.load %arg6[%c0_81, %c0_82, %c0_83] : memref<1x1x32xf32, #tpu.memory_space<vmem>>, vector<1x1x32xf32>
    %239 = vector.shape_cast %238 : vector<1x1x32xf32> to vector<1x32xf32>
    %cst_84 = arith.constant dense<0.000000e+00> : vector<8xf32>
    %240 = vector.multi_reduction <add>, %235, %cst_84 [1] : vector<8x32xf32> to vector<8xf32>
    %241 = vector.shape_cast %240 : vector<8xf32> to vector<8x1xf32>
    %cst_85 = arith.constant 3.200000e+01 : f32
    %242 = vector.broadcast %cst_85 : f32 to vector<8x1xf32>
    %243 = arith.divf %241, %242 : vector<8x1xf32>
    %244 = vector.broadcast %243 : vector<8x1xf32> to vector<8x32xf32>
    %245 = arith.subf %235, %244 : vector<8x32xf32>
    %246 = arith.mulf %245, %245 : vector<8x32xf32>
    %cst_86 = arith.constant dense<0.000000e+00> : vector<8xf32>
    %247 = vector.multi_reduction <add>, %246, %cst_86 [1] : vector<8x32xf32> to vector<8xf32>
    %248 = vector.shape_cast %247 : vector<8xf32> to vector<8x1xf32>
    %cst_87 = arith.constant 3.200000e+01 : f32
    %249 = vector.broadcast %cst_87 : f32 to vector<8x1xf32>
    %250 = arith.divf %248, %249 : vector<8x1xf32>
    %251 = vector.broadcast %243 : vector<8x1xf32> to vector<8x32xf32>
    %252 = arith.subf %235, %251 : vector<8x32xf32>
    %cst_88 = arith.constant 9.99999974E-6 : f32
    %253 = vector.broadcast %cst_88 : f32 to vector<8x1xf32>
    %254 = arith.addf %250, %253 : vector<8x1xf32>
    %255 = math.rsqrt %254 : vector<8x1xf32>
    %256 = vector.broadcast %255 : vector<8x1xf32> to vector<8x32xf32>
    %257 = arith.mulf %252, %256 : vector<8x32xf32>
    %258 = vector.broadcast %237 : vector<1x32xf32> to vector<8x32xf32>
    %259 = arith.mulf %257, %258 : vector<8x32xf32>
    %260 = vector.broadcast %239 : vector<1x32xf32> to vector<8x32xf32>
    %261 = arith.addf %259, %260 : vector<8x32xf32>
    %c1_i32_89 = arith.constant 1 : i32
    %262 = tpu.dynamic_rotate %261 by %c1_i32_89 dim 0 : vector<8x32xf32>, i32 -> vector<8x32xf32>
    %263 = tpu.iota {dimensions = array<i32: 0>} : vector<8x32xi32>
    %c1_i32_90 = arith.constant 1 : i32
    %264 = vector.broadcast %c1_i32_90 : i32 to vector<8x32xi32>
    %265 = arith.cmpi slt, %263, %264 : vector<8x32xi32>
    %cst_91 = arith.constant 0.000000e+00 : f32
    %266 = vector.broadcast %cst_91 : f32 to vector<8x32xf32>
    %267 = arith.select %265, %266, %262 : vector<8x32xi1>, vector<8x32xf32>
    %c0_92 = arith.constant 0 : index
    %c0_93 = arith.constant 0 : index
    %c0_94 = arith.constant 0 : index
    %268 = vector.load %arg18[%c0_92, %c0_93, %c0_94] : memref<1x1x32xf32, #tpu.memory_space<vmem>>, vector<1x1x32xf32>
    %269 = vector.shape_cast %268 : vector<1x1x32xf32> to vector<1x32xf32>
    %270 = arith.subf %261, %267 : vector<8x32xf32>
    %271 = vector.broadcast %269 : vector<1x32xf32> to vector<8x32xf32>
    %272 = arith.mulf %270, %271 : vector<8x32xf32>
    %273 = arith.addf %267, %272 : vector<8x32xf32>
    %c0_95 = arith.constant 0 : index
    %c0_96 = arith.constant 0 : index
    %c0_97 = arith.constant 0 : index
    %274 = vector.load %arg17[%c0_95, %c0_96, %c0_97] : memref<1x1x32xf32, #tpu.memory_space<vmem>>, vector<1x1x32xf32>
    %275 = vector.shape_cast %274 : vector<1x1x32xf32> to vector<1x32xf32>
    %276 = arith.subf %261, %267 : vector<8x32xf32>
    %277 = vector.broadcast %275 : vector<1x32xf32> to vector<8x32xf32>
    %278 = arith.mulf %276, %277 : vector<8x32xf32>
    %279 = arith.addf %267, %278 : vector<8x32xf32>
    %280 = arith.truncf %273 : vector<8x32xf32> to vector<8x32xbf16>
    %c0_98 = arith.constant 0 : index
    %c0_99 = arith.constant 0 : index
    %c0_100 = arith.constant 0 : index
    %281 = vector.load %arg19[%c0_98, %c0_99, %c0_100] : memref<1x32x32xbf16, #tpu.memory_space<vmem>>, vector<1x32x32xbf16>
    %282 = vector.shape_cast %281 : vector<1x32x32xbf16> to vector<32x32xbf16>
    %cst_101 = arith.constant dense<0.000000e+00> : vector<8x32xf32>
    %283 = tpu.matmul %280, %282, %cst_101 {dimension_numbers = #tpu.dot_dimension_numbers<[1], [0], [0], [1], [0, 0, 1, 1], [], []>} : vector<8x32xbf16>, vector<32x32xbf16>, vector<8x32xf32> -> vector<8x32xf32>
    %cst_102 = arith.constant 0.000000e+00 : f32
    %284 = vector.broadcast %cst_102 : f32 to vector<8x32xf32>
    %285 = arith.maximumf %283, %284 : vector<8x32xf32>
    %286 = arith.mulf %285, %285 : vector<8x32xf32>
    %287 = arith.truncf %286 : vector<8x32xf32> to vector<8x32xbf16>
    %c0_103 = arith.constant 0 : index
    %c0_104 = arith.constant 0 : index
    %c0_105 = arith.constant 0 : index
    %288 = vector.load %arg20[%c0_103, %c0_104, %c0_105] : memref<1x32x32xbf16, #tpu.memory_space<vmem>>, vector<1x32x32xbf16>
    %289 = vector.shape_cast %288 : vector<1x32x32xbf16> to vector<32x32xbf16>
    %cst_106 = arith.constant dense<0.000000e+00> : vector<8x32xf32>
    %290 = tpu.matmul %287, %289, %cst_106 {dimension_numbers = #tpu.dot_dimension_numbers<[1], [0], [0], [1], [0, 0, 1, 1], [], []>} : vector<8x32xbf16>, vector<32x32xbf16>, vector<8x32xf32> -> vector<8x32xf32>
    %291 = arith.truncf %279 : vector<8x32xf32> to vector<8x32xbf16>
    %c0_107 = arith.constant 0 : index
    %c0_108 = arith.constant 0 : index
    %c0_109 = arith.constant 0 : index
    %292 = vector.load %arg21[%c0_107, %c0_108, %c0_109] : memref<1x32x32xbf16, #tpu.memory_space<vmem>>, vector<1x32x32xbf16>
    %293 = vector.shape_cast %292 : vector<1x32x32xbf16> to vector<32x32xbf16>
    %cst_110 = arith.constant dense<0.000000e+00> : vector<8x32xf32>
    %294 = tpu.matmul %291, %293, %cst_110 {dimension_numbers = #tpu.dot_dimension_numbers<[1], [0], [0], [1], [0, 0, 1, 1], [], []>} : vector<8x32xbf16>, vector<32x32xbf16>, vector<8x32xf32> -> vector<8x32xf32>
    %295 = arith.negf %294 : vector<8x32xf32>
    %296 = math.exp %295 : vector<8x32xf32>
    %cst_111 = arith.constant 1.000000e+00 : f32
    %297 = vector.broadcast %cst_111 : f32 to vector<8x32xf32>
    %298 = arith.addf %297, %296 : vector<8x32xf32>
    %299 = arith.divf %297, %298 : vector<8x32xf32>
    %300 = arith.mulf %299, %290 : vector<8x32xf32>
    %301 = arith.addf %235, %300 : vector<8x32xf32>
    %c0_112 = arith.constant 0 : index
    %c0_113 = arith.constant 0 : index
    %302 = vector.load %arg27[%c0_112, %c0_113] : memref<8x32xf32, #tpu.memory_space<vmem>>, vector<8x32xf32>
    tpu.vector_store %arg27[%c0_112, %c0_113], %301 {strides = array<i32>} : memref<8x32xf32, #tpu.memory_space<vmem>>, vector<8x32xf32>,
    %c1_i32_114 = arith.constant 1 : i32
    %303 = arith.cmpi eq, %arg1, %c1_i32_114 : i32
    %304 = arith.extui %303 : i1 to i32
    %c0_i32_115 = arith.constant 0 : i32
    %305 = arith.cmpi ne, %304, %c0_i32_115 : i32
    scf.if %305 {
      %306 = vector.shape_cast %301 : vector<8x32xf32> to vector<8x1x32xf32>
      %307 = vector.shape_cast %306 : vector<8x1x32xf32> to vector<8x32xf32>
      %308 = arith.truncf %307 : vector<8x32xf32> to vector<8x32xbf16>
      %c0_116 = arith.constant 0 : index
      %c0_117 = arith.constant 0 : index
      %309 = vector.load %arg22[%c0_116, %c0_117] : memref<8x16xbf16, #tpu.memory_space<vmem>>, vector<8x16xbf16>
      %cst_118 = arith.constant dense<0.000000e+00> : vector<16x32xf32>
      %310 = tpu.matmul %309, %308, %cst_118 {dimension_numbers = #tpu.dot_dimension_numbers<[0], [0], [1], [1], [0, 1, 1, 1], [], []>} : vector<8x16xbf16>, vector<8x32xbf16>, vector<16x32xf32> -> vector<16x32xf32>
      %c0_119 = arith.constant 0 : index
      %c0_120 = arith.constant 0 : index
      %311 = vector.load %arg23[%c0_119, %c0_120] : memref<16x1xf32, #tpu.memory_space<vmem>>, vector<16x1xf32>
      %312 = vector.broadcast %311 : vector<16x1xf32> to vector<16x32xf32>
      %313 = arith.addf %310, %312 : vector<16x32xf32>
      %cst_121 = arith.constant 0.000000e+00 : f32
      %314 = vector.broadcast %cst_121 : f32 to vector<16x32xf32>
      %315 = arith.maximumf %313, %314 : vector<16x32xf32>
      %316 = arith.truncf %315 : vector<16x32xf32> to vector<16x32xbf16>
      %c0_122 = arith.constant 0 : index
      %c0_123 = arith.constant 0 : index
      %317 = vector.load %arg24[%c0_122, %c0_123] : memref<16x4xbf16, #tpu.memory_space<vmem>>, vector<16x4xbf16>
      %cst_124 = arith.constant dense<0.000000e+00> : vector<4x32xf32>
      %318 = tpu.matmul %317, %316, %cst_124 {dimension_numbers = #tpu.dot_dimension_numbers<[0], [0], [1], [1], [0, 1, 1, 1], [], []>} : vector<16x4xbf16>, vector<16x32xbf16>, vector<4x32xf32> -> vector<4x32xf32>
      %c0_125 = arith.constant 0 : index
      %c0_126 = arith.constant 0 : index
      %319 = vector.load %arg25[%c0_125, %c0_126] : memref<4x1xf32, #tpu.memory_space<vmem>>, vector<4x1xf32>
      %320 = vector.broadcast %319 : vector<4x1xf32> to vector<4x32xf32>
      %321 = arith.addf %318, %320 : vector<4x32xf32>
      %c0_127 = arith.constant 0 : index
      %c0_128 = arith.constant 0 : index
      %c0_129 = arith.constant 0 : index
      %322 = vector.load %arg26[%c0_127, %c0_128, %c0_129] : memref<1x4x32xf32, #tpu.memory_space<vmem>>, vector<1x4x32xf32>
      %323 = vector.shape_cast %322 : vector<1x4x32xf32> to vector<4x32xf32>
      %324 = vector.shape_cast %321 : vector<4x32xf32> to vector<1x4x32xf32>
      tpu.vector_store %arg26[%c0_127, %c0_128, %c0_129], %324 {strides = array<i32>} : memref<1x4x32xf32, #tpu.memory_space<vmem>>, vector<1x4x32xf32>,
    } else {
    }
    return
  }
  func.func @transform_0(%arg0: i32, %arg1: i32) -> (i32, i32, i32) {
    %c0_i32 = arith.constant 0 : i32
    %c0_i32_0 = arith.constant 0 : i32
    %c0_i32_1 = arith.constant 0 : i32
    return %arg0, %c0_i32, %c0_i32_0 : i32, i32, i32
  }
  func.func @transform_1(%arg0: i32, %arg1: i32) -> (i32, i32, i32) {
    %c0_i32 = arith.constant 0 : i32
    %c0_i32_0 = arith.constant 0 : i32
    %c0_i32_1 = arith.constant 0 : i32
    return %arg1, %c0_i32, %c0_i32_0 : i32, i32, i32
  }
  func.func @transform_2(%arg0: i32, %arg1: i32) -> (i32, i32, i32) {
    %c0_i32 = arith.constant 0 : i32
    %c0_i32_0 = arith.constant 0 : i32
    %c0_i32_1 = arith.constant 0 : i32
    return %arg1, %c0_i32, %c0_i32_0 : i32, i32, i32
  }
  func.func @transform_3(%arg0: i32, %arg1: i32) -> (i32, i32, i32) {
    %c0_i32 = arith.constant 0 : i32
    %c0_i32_0 = arith.constant 0 : i32
    %c0_i32_1 = arith.constant 0 : i32
    return %arg1, %c0_i32, %c0_i32_0 : i32, i32, i32
  }
  func.func @transform_4(%arg0: i32, %arg1: i32) -> (i32, i32, i32) {
    %c0_i32 = arith.constant 0 : i32
    %c0_i32_0 = arith.constant 0 : i32
    %c0_i32_1 = arith.constant 0 : i32
    return %arg1, %c0_i32, %c0_i32_0 : i32, i32, i32
  }
  func.func @transform_5(%arg0: i32, %arg1: i32) -> (i32, i32, i32) {
    %c0_i32 = arith.constant 0 : i32
    %c0_i32_0 = arith.constant 0 : i32
    %c0_i32_1 = arith.constant 0 : i32
    return %arg1, %c0_i32, %c0_i32_0 : i32, i32, i32
  }
  func.func @transform_6(%arg0: i32, %arg1: i32) -> (i32, i32, i32) {
    %c0_i32 = arith.constant 0 : i32
    %c0_i32_0 = arith.constant 0 : i32
    %c0_i32_1 = arith.constant 0 : i32
    return %arg1, %c0_i32, %c0_i32_0 : i32, i32, i32
  }
  func.func @transform_7(%arg0: i32, %arg1: i32) -> (i32, i32, i32) {
    %c0_i32 = arith.constant 0 : i32
    %c0_i32_0 = arith.constant 0 : i32
    %c0_i32_1 = arith.constant 0 : i32
    return %arg1, %c0_i32, %c0_i32_0 : i32, i32, i32
  }
  func.func @transform_8(%arg0: i32, %arg1: i32) -> (i32, i32, i32) {
    %c0_i32 = arith.constant 0 : i32
    %c0_i32_0 = arith.constant 0 : i32
    %c0_i32_1 = arith.constant 0 : i32
    return %arg1, %c0_i32, %c0_i32_0 : i32, i32, i32
  }
  func.func @transform_9(%arg0: i32, %arg1: i32) -> (i32, i32, i32) {
    %c0_i32 = arith.constant 0 : i32
    %c0_i32_0 = arith.constant 0 : i32
    %c0_i32_1 = arith.constant 0 : i32
    return %arg1, %c0_i32, %c0_i32_0 : i32, i32, i32
  }
  func.func @transform_10(%arg0: i32, %arg1: i32) -> (i32, i32, i32) {
    %c0_i32 = arith.constant 0 : i32
    %c0_i32_0 = arith.constant 0 : i32
    %c0_i32_1 = arith.constant 0 : i32
    return %arg1, %c0_i32, %c0_i32_0 : i32, i32, i32
  }
  func.func @transform_11(%arg0: i32, %arg1: i32) -> (i32, i32, i32) {
    %c0_i32 = arith.constant 0 : i32
    %c0_i32_0 = arith.constant 0 : i32
    %c0_i32_1 = arith.constant 0 : i32
    return %arg1, %c0_i32, %c0_i32_0 : i32, i32, i32
  }
  func.func @transform_12(%arg0: i32, %arg1: i32) -> (i32, i32, i32) {
    %c0_i32 = arith.constant 0 : i32
    %c0_i32_0 = arith.constant 0 : i32
    %c0_i32_1 = arith.constant 0 : i32
    return %arg1, %c0_i32, %c0_i32_0 : i32, i32, i32
  }
  func.func @transform_13(%arg0: i32, %arg1: i32) -> (i32, i32, i32) {
    %c0_i32 = arith.constant 0 : i32
    %c0_i32_0 = arith.constant 0 : i32
    %c0_i32_1 = arith.constant 0 : i32
    return %arg1, %c0_i32, %c0_i32_0 : i32, i32, i32
  }
  func.func @transform_14(%arg0: i32, %arg1: i32) -> (i32, i32, i32) {
    %c0_i32 = arith.constant 0 : i32
    %c0_i32_0 = arith.constant 0 : i32
    %c0_i32_1 = arith.constant 0 : i32
    return %arg1, %c0_i32, %c0_i32_0 : i32, i32, i32
  }
  func.func @transform_15(%arg0: i32, %arg1: i32) -> (i32, i32, i32) {
    %c0_i32 = arith.constant 0 : i32
    %c0_i32_0 = arith.constant 0 : i32
    %c0_i32_1 = arith.constant 0 : i32
    return %arg1, %c0_i32, %c0_i32_0 : i32, i32, i32
  }
  func.func @transform_16(%arg0: i32, %arg1: i32) -> (i32, i32, i32) {
    %c0_i32 = arith.constant 0 : i32
    %c0_i32_0 = arith.constant 0 : i32
    %c0_i32_1 = arith.constant 0 : i32
    return %arg1, %c0_i32, %c0_i32_0 : i32, i32, i32
  }
  func.func @transform_17(%arg0: i32, %arg1: i32) -> (i32, i32, i32) {
    %c0_i32 = arith.constant 0 : i32
    %c0_i32_0 = arith.constant 0 : i32
    %c0_i32_1 = arith.constant 0 : i32
    return %arg1, %c0_i32, %c0_i32_0 : i32, i32, i32
  }
  func.func @transform_18(%arg0: i32, %arg1: i32) -> (i32, i32, i32) {
    %c0_i32 = arith.constant 0 : i32
    %c0_i32_0 = arith.constant 0 : i32
    %c0_i32_1 = arith.constant 0 : i32
    return %arg1, %c0_i32, %c0_i32_0 : i32, i32, i32
  }
  func.func @transform_19(%arg0: i32, %arg1: i32) -> (i32, i32, i32) {
    %c0_i32 = arith.constant 0 : i32
    %c0_i32_0 = arith.constant 0 : i32
    %c0_i32_1 = arith.constant 0 : i32
    return %arg1, %c0_i32, %c0_i32_0 : i32, i32, i32
  }
  func.func @transform_20(%arg0: i32, %arg1: i32) -> (i32, i32) {
    %c0_i32 = arith.constant 0 : i32
    %c0_i32_0 = arith.constant 0 : i32
    %c0_i32_1 = arith.constant 0 : i32
    return %c0_i32, %c0_i32_0 : i32, i32
  }
  func.func @transform_21(%arg0: i32, %arg1: i32) -> (i32, i32) {
    %c0_i32 = arith.constant 0 : i32
    %c0_i32_0 = arith.constant 0 : i32
    %c0_i32_1 = arith.constant 0 : i32
    return %c0_i32, %c0_i32_0 : i32, i32
  }
  func.func @transform_22(%arg0: i32, %arg1: i32) -> (i32, i32) {
    %c0_i32 = arith.constant 0 : i32
    %c0_i32_0 = arith.constant 0 : i32
    %c0_i32_1 = arith.constant 0 : i32
    return %c0_i32, %c0_i32_0 : i32, i32
  }
  func.func @transform_23(%arg0: i32, %arg1: i32) -> (i32, i32) {
    %c0_i32 = arith.constant 0 : i32
    %c0_i32_0 = arith.constant 0 : i32
    %c0_i32_1 = arith.constant 0 : i32
    return %c0_i32, %c0_i32_0 : i32, i32
  }
  func.func @transform_24(%arg0: i32, %arg1: i32) -> (i32, i32, i32) {
    %c0_i32 = arith.constant 0 : i32
    %c0_i32_0 = arith.constant 0 : i32
    %c0_i32_1 = arith.constant 0 : i32
    return %arg0, %c0_i32, %c0_i32_0 : i32, i32, i32
  }
}

</mosaic_0001>

<bundles_post_ra>
// kernel: rwkv_model.1
= control target key start
LH: loop header
LB: loop body
LE: loop exit
PB: predicated region body
PF: predicated region fallthrough
CT: control target
= control target key end

     0   :  { %s5065_s0 = inlined_call_operand.hbm [shape: f32[2,8,32], index: 0, kind: input, shape index: {}]   ;;  %s5066_s1 = inlined_call_operand.hbm [shape: f32[2,1,32], index: 1, kind: input, shape index: {}]   ;;  %s5067_s2 = inlined_call_operand.hbm [shape: f32[2,1,32], index: 2, kind: input, shape index: {}]   ;;  %s5068_s3 = inlined_call_operand.hbm [shape: f32[2,1,32], index: 3, kind: input, shape index: {}]   ;;  %s5069_s4 = inlined_call_operand.hbm [shape: f32[2,1,32], index: 4, kind: input, shape index: {}]   ;;  %s5070_s5 = inlined_call_operand.vmem [shape: f32[2,1,32], index: 5, kind: input, shape index: {}]   ;;  %s5071_s6 = inlined_call_operand.vmem [shape: f32[2,1,32], index: 6, kind: input, shape index: {}]   ;;  %s5072_s7 = inlined_call_operand.hbm [shape: f32[2,1,32], index: 7, kind: input, shape index: {}]   ;;  %s5073_s8 = inlined_call_operand.hbm [shape: f32[2,1,32], index: 8, kind: input, shape index: {}]   ;;  %s5074_s9 = inlined_call_operand.hbm [shape: f32[2,1,32], index: 9, kind: input, shape index: {}]   ;;  %s5075_s10 = inlined_call_operand.vmem [shape: bf16[2,32,32], index: 10, kind: input, shape index: {}]   ;;  %s5076_s11 = inlined_call_operand.vmem [shape: bf16[2,32,32], index: 11, kind: input, shape index: {}]   ;;  %s5077_s12 = inlined_call_operand.vmem [shape: bf16[2,32,32], index: 12, kind: input, shape index: {}]   ;;  %s5078_s13 = inlined_call_operand.hbm [shape: bf16[2,32,32], index: 13, kind: input, shape index: {}]   ;;  %s5079_s14 = inlined_call_operand.hbm [shape: f32[2,1,32], index: 14, kind: input, shape index: {}]   ;;  %s5080_s15 = inlined_call_operand.hbm [shape: f32[2,1,32], index: 15, kind: input, shape index: {}]   ;;  %s5081_s16 = inlined_call_operand.hbm [shape: f32[2,1,32], index: 16, kind: input, shape index: {}]   ;;  %s5082_s17 = inlined_call_operand.hbm [shape: bf16[2,32,32], index: 17, kind: input, shape index: {}]   ;;  %s5083_s18 = inlined_call_operand.hbm [shape: bf16[2,32,32], index: 18, kind: input, shape index: {}]   ;;  %s5084_s19 = inlined_call_operand.hbm [shape: bf16[2,32,32], index: 19, kind: input, shape index: {}]   ;;  %s5085_s20 = inlined_call_operand.hbm [shape: bf16[8,16], index: 20, kind: input, shape index: {}]   ;;  %s5086_s21 = inlined_call_operand.vmem [shape: f32[16,1], index: 21, kind: input, shape index: {}]   ;;  %s5087_s22 = inlined_call_operand.vmem [shape: bf16[16,4], index: 22, kind: input, shape index: {}]   ;;  %s5088_s23 = inlined_call_operand.vmem [shape: f32[4,1], index: 23, kind: input, shape index: {}]   ;;  %s5089_s24 = inlined_call_operand.hbm [shape: f32[2,4,32], index: 24, kind: output, shape index: {}]  }
   0x1   :  { %5139 = sst [smem:[#allocation61_spill]] %s5065_s0 }
   0x2   :  { %5140 = sst [smem:[#allocation62_spill]] %s5066_s1 }
   0x3   :  { %5141 = sst [smem:[#allocation63_spill]] %s5067_s2 }
   0x4   :  { %5142 = sst [smem:[#allocation64_spill]] %s5068_s3 }
   0x5   :  { %5143 = sst [smem:[#allocation65_spill]] %s5069_s4 }
   0x6   :  { %5144 = sst [smem:[#allocation66_spill]] %s5070_s5 }
   0x7   :  { %5145 = sst [smem:[#allocation67_spill]] %s5071_s6 }
   0x8   :  { %5146 = sst [smem:[#allocation68_spill]] %s5072_s7 }
   0x9   :  { %5147 = sst [smem:[#allocation69_spill]] %s5073_s8 }
   0xa   :  { %5148 = sst [smem:[#allocation70_spill]] %s5074_s9 }
   0xb   :  { %5149 = sst [smem:[#allocation71_spill]] %s5075_s10 }
   0xc   :  { %5150 = sst [smem:[#allocation72_spill]] %s5076_s11 }
   0xd   :  { %5151 = sst [smem:[#allocation73_spill]] %s5077_s12 }
   0xe   :  { %5152 = sst [smem:[#allocation74_spill]] %s5078_s13 }
   0xf   :  { %5153 = sst [smem:[#allocation75_spill]] %s5079_s14 }
  0x10   :  { %5154 = sst [smem:[#allocation76_spill]] %s5080_s15 }
  0x11   :  { %5155 = sst [smem:[#allocation77_spill]] %s5081_s16 }
  0x12   :  { %5156 = sst [smem:[#allocation78_spill]] %s5082_s17 }
  0x13   :  { %5157 = sst [smem:[#allocation79_spill]] %s5083_s18 }
  0x14   :  { %5158 = sst [smem:[#allocation80_spill]] %s5084_s19 }
  0x15   :  { %5159 = sst [smem:[#allocation81_spill]] %s5085_s20 }
  0x16   :  { %5160 = sst [smem:[#allocation82_spill]] %s5086_s21 }
  0x17   :  { %5161 = sst [smem:[#allocation83_spill]] %s5087_s22 }
  0x18   :  { %5162 = sst [smem:[#allocation84_spill]] %s5088_s23 }
  0x19   :  { %5163 = sst [smem:[#allocation85_spill]] %s5089_s24 }
  0x1a   :  { %29 = vsyncpa [#allocation7], 0 }
  0x1b   :  { %31 = vsyncpa [#allocation7 + $0x1], 0 }
  0x1c   :  { %32 = vsyncpa [#allocation10], 0 }
  0x1d   :  { %34 = vsyncpa [#allocation10 + $0x1], 0 }
  0x1e   :  { %35 = vsyncpa [#allocation13], 0 }
  0x1f   :  { %37 = vsyncpa [#allocation13 + $0x1], 0 }
  0x20   :  { %38 = vsyncpa [#allocation16], 0 }
  0x21   :  { %40 = vsyncpa [#allocation16 + $0x1], 0 }
  0x22   :  { %41 = vsyncpa [#allocation19], 0 }
  0x23   :  { %43 = vsyncpa [#allocation19 + $0x1], 0 }
  0x24   :  { %44 = vsyncpa [#allocation22], 0 }
  0x25   :  { %46 = vsyncpa [#allocation22 + $0x1], 0 }
  0x26   :  { %47 = vsyncpa [#allocation25], 0 }
  0x27   :  { %49 = vsyncpa [#allocation25 + $0x1], 0 }
  0x28   :  { %50 = vsyncpa [#allocation28], 0 }
  0x29   :  { %52 = vsyncpa [#allocation28 + $0x1], 0 }
  0x2a   :  { %53 = vsyncpa [#allocation31], 0 }
  0x2b   :  { %54 = vsyncpa [#allocation8], 0 }
  0x2c   :  { %56 = vsyncpa [#allocation8 + $0x1], 0  ;;  %s4081_s5 = smov 0   ;;  %s4083_s26 = smov 0  }
  0x2d   :  { %s4085_s27 = smov 0   ;;  %s4087_s28 = smov 0  }
  0x2e   :  { %s4089_s6 = smov 0   ;;  %s4091_s2 = smov 0  }
  0x2f   :  { %s4093_s29 = smov 0   ;;  %s4095_s0 = smov 0  }
  0x30   :  { %s4097_s7 = smov 0   ;;  %s4099_s30 = smov 0  }
  0x31   :  { %s4101_s3 = smov 0  }
  0x32 LB: > { %5164 = sst [smem:[#allocation43_spill]] %s3893_s26  ;;  %s4137_s25 = sadd.s32 4294967295, %s3929_s3   ;;  %s3929_s3 = sphi %s4101_s3, %s62_s3   ;;  %s3925_s30 = sphi %s4099_s30, %s5286_s30   ;;  %s3921_s7 = sphi %s4097_s7, %s5281_s7   ;;  %s3917_s0 = sphi %s4095_s0, %s5285_s0   ;;  %s3913_s29 = sphi %s4093_s29, %s5280_s29   ;;  %s3909_s2 = sphi %s4091_s2, %s5284_s2   ;;  %s3905_s6 = sphi %s4089_s6, %s5283_s6   ;;  %s3901_s28 = sphi %s4087_s28, %s5278_s28   ;;  %s3897_s27 = sphi %s4085_s27, %s5277_s27   ;;  %s3893_s26 = sphi %s4083_s26, %s5276_s26   ;;  %s3889_s5 = sphi %s4081_s5, %s5275_s5  }
  0x33   : > { %5165 = sst [smem:[#allocation44_spill]] %s3897_s27  ;;  %s2949_s8 = sadd.s32 4294967294, %s3929_s3  }
  0x34   : > { %5166 = sst [smem:[#allocation45_spill]] %s3901_s28  ;;  %s71_s4 = sadd.s32 1, %s3921_s7 }
  0x35   : > { %5167 = sst [smem:[#allocation46_spill]] %s3905_s6  ;;  %s74_s1 = sadd.s32 1, %s3925_s30 }
  0x36   : > { %5168 = sst [smem:[#allocation47_spill]] %s3913_s29  ;;  %p72_p0 = scmp.ge.s32.totalorder %s71_s4, 2 }
  0x37   : > { %5169 = sst [smem:[#allocation48_spill]] %s3917_s0  ;;  %s81_s24 = sadd.s32 1, %s3909_s2 }
  0x38   : > { %5170 = sst [smem:[#allocation49_spill]] %s3921_s7  ;;  %p5102_p1 = scmp.ne.s32.totalorder %s3909_s2, %s3905_s6 }
  0x39   : > { %5171 = sst [smem:[#allocation50_spill]] %s3929_s3  ;;  %p89_p2 = scmp.eq.s32.totalorder %s3929_s3, 0 }
  0x3a   : > { %5172 = sst [smem:[#allocation51_spill]] %s4137_s25  ;;  %s5288_s4 = smov (%p72_p0, %s71_s4), 0 }
  0x3b   : > { %5173 = sst [smem:[#allocation52_spill]] %s5288_s4  ;;  %s5290_s1 = smov (!%p72_p0, %s74_s1), %s3925_s30 }
  0x3c   : > { %p4154_p3 = por %p89_p2, %p5102_p1  ;;  %p5101_p4 = scmp.ne.s32.totalorder %s3905_s6, %s3901_s28 }
  0x3d   : > { %p76_p5 = scmp.ge.s32.totalorder %s5290_s1, 2  ;;  %p5112_p6 = scmp.eq.s32.totalorder %s4137_s25, 0 }
  0x3e   : > { %s5174_s0 = scalar_select %p4154_p3, 1, 0 }
  0x3f   : > { %s104_s22 = ssub.s32 %s3921_s7, %s5288_s4  ;;  %s107_s23 = sadd.s32 1, %s3897_s27 }
  0x40   : > { %s5292_s1 = smov (%p76_p5, %s5290_s1), 0  ;;  %p4171_p7 = por %p5112_p6, %p5101_p4 }
  0x41   : > { %5175 = sst [smem:[#allocation53_spill]] %s5292_s1  ;;  %p105_p8 = scmp.eq.s32.totalorder %s104_s22, 0 }
  0x42   : > { %s5176_s21 = scalar_select %p4171_p7, 1, 0 }
  0x43   : > { %s78_s12 = ssub.s32 %s3925_s30, %s5292_s1  ;;  %p114_p9 = scmp.ne.s32.totalorder %s3897_s27, %s3893_s26 }
  0x44   : > { %5177 = sst [smem:[#allocation54_spill]] %s5176_s21  ;;  %p79_p10 = scmp.eq.s32.totalorder %s78_s12, 0 }
  0x45   : > { %p120_p11 = scmp.ne.s32.totalorder %s3893_s26, %s3889_s5  ;;  %p4189_p12 = por %p114_p9, %p89_p2 }
  0x46   : > { %s4182_s4 = scalar_select %p105_p8, %s3897_s27, %s107_s23  }
  0x47   : > { %s4185_s11 = scalar_select %p79_p10, %s3909_s2, %s81_s24  }
  0x48   : > { %5178 = sst [smem:[#allocation55_spill]] %s4182_s4  ;;  %p4195_p13 = por %p120_p11, %p5112_p6 }
  0x49   : > { %5179 = sst [smem:[#allocation56_spill]] %s4185_s11  ;;  %p696_p0 = scmp.eq.s32.totalorder %s4137_s25, 3 }
  0x4a   : > { %s5180_s10 = scalar_select %p4189_p12, 1, 0 }
  0x4b   : > { %s5181_s29 = scalar_select %p4195_p13, 1, 0 }
  0x4c   : > { %p702_p5 = scmp.eq.s32.totalorder %s2949_s8, 3  ;;  %p2950_p4 = scmp.ge.s32.totalorder %s3929_s3, 1 }
  0x4d   : > { %5182 = sst [smem:[#allocation57_spill]] %s5181_s29  ;;  %p709_p1 = scmp.lt.s32.totalorder %s3929_s3, 5 }
  0x4e   : > { %p5183_p7 = scmp.ne.s32.totalorder %s3909_s2, %s3905_s6  ;;  %p5186_p8 = scmp.ne.s32.totalorder %s3905_s6, %s3901_s28 }
  0x4f   : > { %p4216_p2 = pnand %p2950_p4, %p709_p1  ;;  %s3931_s24 = smov [#allocation30]  }
  0x50   : > { %p4205_p3 = por %p696_p0, %p5183_p7  ;;  %p4212_p10 = por %p702_p5, %p5186_p8 }
  0x51   : > { %s5189_s23 = scalar_select %p4216_p2, 1, 0 }
  0x52   : > { %s5184_s12 = scalar_select %p4205_p3, 1, 0 }
  0x53   : > { %s5187_s22 = scalar_select %p4212_p10, 1, 0 }
  0x54   : > { %5185 = sst [smem:[#allocation58_spill]] %s5184_s12  ;;  %p3170_p9 = pneg %p4216_p2 }
  0x55   : > { %5188 = sst [smem:[#allocation59_spill]] %s5187_s22  ;;  %s722_s5 = sshll.u32 %s3931_s24, 4  ;;  %s723_s5 = int_to_ptr.vmem [resolvable:$true] %s722_s5 }
  0x56   : > { %5190 = sst [smem:[#allocation60_spill]] %s5189_s23  ;;  %p4224_p7 = pnand %p3170_p9, %p5112_p6 }
  0x57   : > { %s5192_s20 = sld [smem:[#allocation81_spill]] }
  0x58   : > { %p3329_p4 = pneg %p4224_p7 }
  0x5d   : > { %s3327_s4 = scalar_lea.hbm %s5192_s20, 64 }
  0x5e   : > { %p3328_p1 = scmp.ne.s32.totalorder %s5192_s20, %s3327_s4  ;;  %p3334_p5 = scmp.lt.u32.totalorder %s3327_s4, %s5192_s20 }
  0x60   : > { %p3330_p11 = pnand %p3329_p4, %p3328_p1 }
  0x62   : > { %p3331_p0 = pneg %p3330_p11 }
  0x64   : > { %p3336_p8 = pnand %p3334_p5, %p3331_p0 }
  0x66   : > { %3339 = shalt.err (!%p3336_p8)
}
  0x67   : > { %s3340_s29 = scalar_lea.vmem %s723_s5, 64  ;;  %p3348_p3 = scmp.lt.s32.totalorder %s723_s5, %s723_s5 }
  0x68   : > { %p3341_p9 = scmp.ne.s32.totalorder %s723_s5, %s3340_s29  ;;  %p3349_p13 = scmp.lt.s32.totalorder %s3340_s29, %s3340_s29 }
  0x6a   : > { %p3343_p6 = pnand %p3341_p9, %p3329_p4  ;;  %p3350_p2 = por %p3349_p13, %p3348_p3 }
  0x6c   : > { %p3344_p10 = pneg %p3343_p6 }
  0x6e   : > { %p3351_p12 = pnand %p3350_p2, %p3344_p10 }
  0x70   : > { %3354 = shalt.err (!%p3351_p12)
}
  0x71   : > { %3173 = dma.hbm_to_vmem [thread:$0]  (!%p4224_p7), %s5192_s20, 64, %s723_s5, [#allocation31]  }
  0x72   : > { %p2952_p1 = scmp.ge.s32.totalorder %s3929_s3, 4 }
  0x73   : > { %s4246_s4 = sand.u32 (!%p2952_p1), 1, %s3929_s3   ;;  %s4249_s29 = sand.u32 (!%p2952_p1), 1, %s3897_s27  }
  0x74   : > { %738 = sbr.rel (%p2952_p1) target bundleno = 507 (0x1fb), region = 32  ;;  %s4252_s1 = sshll.u32 (!%p2952_p1), %s3921_s7, 4 }
  0x75   : > { %s763_s12 = scalar_lea.vmem (!%p2952_p1), [#allocation9], %s4249_s29  ;;  %s5193_s24 = sld [smem:[#allocation62_spill]] (!%p2952_p1) }
  0x76   : > { %s770_s22 = sshll.u32 (!%p2952_p1), %s763_s12, 4  ;;  %p5194_p6 = scmp.ne.s32.totalorder (!%p2952_p1), %s5180_s10, 0  ;;  %s771_s22 = int_to_ptr.vmem [resolvable:$true] %s770_s22 }
  0x7b   : > { %s4259_s11 = scalar_lea.hbm %s5193_s24, %s4252_s1  ;;  %s3359_s12 = scalar_lea.hbm %s5193_s24, 32 }
  0x7c   : > { %s3355_s20 = scalar_lea.hbm %s4259_s11, 16  ;;  %p3360_p10 = scmp.lt.u32.totalorder %s4259_s11, %s5193_s24 }
  0x7d   : > { %p3356_p3 = scmp.ne.s32.totalorder %s4259_s11, %s3355_s20  ;;  %p3361_p2 = scmp.lt.u32.totalorder %s3359_s12, %s3355_s20 }
  0x7e   : > { %p3363_p4 = scmp.lt.u32.totalorder %s3355_s20, %s4259_s11 }
  0x7f   : > { %p3357_p12 = pnand %p3356_p3, %p5194_p6  ;;  %p3362_p7 = por %p3361_p2, %p3360_p10 }
  0x81   : > { %p3358_p13 = pneg %p3357_p12  ;;  %p3364_p11 = por %p3363_p4, %p3362_p7 }
  0x83   : > { %p3365_p0 = pnand %p3364_p11, %p3358_p13 }
  0x85   : > { %3368 = shalt.err (!%p3365_p0)
}
  0x86   : > { %s3369_s8 = scalar_lea.vmem %s771_s22, 16  ;;  %s3932_s5 = smov [#allocation9]  }
  0x87   : > { %p3370_p5 = scmp.ne.s32.totalorder %s771_s22, %s3369_s8  ;;  %s3373_s28 = sshll.u32 %s3932_s5, 4  ;;  %s3374_s28 = int_to_ptr.vmem [resolvable:$false] %s3373_s28 }
  0x88   : > { %s3375_s27 = scalar_lea.vmem %s3374_s28, 32  ;;  %p3376_p1 = scmp.lt.s32.totalorder %s771_s22, %s3374_s28 }
  0x89   : > { %p3371_p8 = pnand %p3370_p5, %p5194_p6  ;;  %p3377_p3 = scmp.lt.s32.totalorder %s3375_s27, %s3369_s8 }
  0x8b   : > { %p3372_p9 = pneg %p3371_p8  ;;  %p3378_p12 = por %p3377_p3, %p3376_p1 }
  0x8d   : > { %p3379_p2 = pnand %p3378_p12, %p3372_p9 }
  0x8f   : > { %3382 = shalt.err (!%p3379_p2)
}
  0x90   : > { %s5195_s20 = scalar_lea.sflag [#allocation10], %s4246_s4  ;;  %s5196_s25 = sld [smem:[#allocation64_spill]] }
  0x91   : > { %3137 = dma.hbm_to_vmem [thread:$0]  (%p5194_p6), %s4259_s11, 16, %s771_s22, %s5195_s20  }
  0x92   : > { %s797_s28 = scalar_lea.vmem [#allocation12], %s4249_s29 }
  0x93   : > { %s804_s8 = sshll.u32 %s797_s28, 4  ;;  %s805_s8 = int_to_ptr.vmem [resolvable:$true] %s804_s8 }
  0x96   : > { %s4285_s12 = scalar_lea.hbm %s5196_s25, %s4252_s1  ;;  %s3387_s11 = scalar_lea.hbm %s5196_s25, 32 }
  0x97   : > { %s3383_s27 = scalar_lea.hbm %s4285_s12, 16  ;;  %p3388_p4 = scmp.lt.u32.totalorder %s4285_s12, %s5196_s25 }
  0x98   : > { %p3384_p13 = scmp.ne.s32.totalorder %s4285_s12, %s3383_s27  ;;  %p3389_p11 = scmp.lt.u32.totalorder %s3387_s11, %s3383_s27 }
  0x99   : > { %p3391_p5 = scmp.lt.u32.totalorder %s3383_s27, %s4285_s12 }
  0x9a   : > { %p3385_p10 = pnand %p3384_p13, %p5194_p6  ;;  %p3390_p0 = por %p3389_p11, %p3388_p4 }
  0x9c   : > { %p3386_p7 = pneg %p3385_p10  ;;  %p3392_p8 = por %p3391_p5, %p3390_p0 }
  0x9e   : > { %p3393_p9 = pnand %p3392_p8, %p3386_p7 }
  0xa0   : > { %3396 = shalt.err (!%p3393_p9)
}
  0xa1   : > { %s3397_s3 = scalar_lea.vmem %s805_s8, 16  ;;  %s3933_s28 = smov [#allocation12]  }
  0xa2   : > { %p3398_p1 = scmp.ne.s32.totalorder %s805_s8, %s3397_s3  ;;  %s3401_s5 = sshll.u32 %s3933_s28, 4  ;;  %s3402_s5 = int_to_ptr.vmem [resolvable:$false] %s3401_s5 }
  0xa3   : > { %s3403_s24 = scalar_lea.vmem %s3402_s5, 32  ;;  %p3404_p2 = scmp.lt.s32.totalorder %s805_s8, %s3402_s5 }
  0xa4   : > { %p3399_p3 = pnand %p3398_p1, %p5194_p6  ;;  %p3405_p13 = scmp.lt.s32.totalorder %s3403_s24, %s3397_s3 }
  0xa6   : > { %p3400_p12 = pneg %p3399_p3  ;;  %p3406_p10 = por %p3405_p13, %p3404_p2 }
  0xa8   : > { %p3407_p4 = pnand %p3406_p10, %p3400_p12 }
  0xaa   : > { %3410 = shalt.err (!%p3407_p4)
}
  0xab   : > { %s5197_s27 = scalar_lea.sflag [#allocation13], %s4246_s4  ;;  %s5198_s20 = sld [smem:[#allocation68_spill]] }
  0xac   : > { %3139 = dma.hbm_to_vmem [thread:$0]  (%p5194_p6), %s4285_s12, 16, %s805_s8, %s5197_s27  }
  0xad   : > { %s843_s5 = scalar_lea.vmem [#allocation15], %s4249_s29 }
  0xae   : > { %s850_s3 = sshll.u32 %s843_s5, 4  ;;  %s851_s3 = int_to_ptr.vmem [resolvable:$true] %s850_s3 }
  0xb1   : > { %s4312_s26 = scalar_lea.hbm %s5198_s20, %s4252_s1  ;;  %s3415_s8 = scalar_lea.hbm %s5198_s20, 32 }
  0xb2   : > { %s3411_s24 = scalar_lea.hbm %s4312_s26, 16  ;;  %p3416_p5 = scmp.lt.u32.totalorder %s4312_s26, %s5198_s20 }
  0xb3   : > { %p3412_p7 = scmp.ne.s32.totalorder %s4312_s26, %s3411_s24  ;;  %p3417_p8 = scmp.lt.u32.totalorder %s3415_s8, %s3411_s24 }
  0xb4   : > { %p3419_p1 = scmp.lt.u32.totalorder %s3411_s24, %s4312_s26 }
  0xb5   : > { %p3413_p11 = pnand %p3412_p7, %p5194_p6  ;;  %p3418_p9 = por %p3417_p8, %p3416_p5 }
  0xb7   : > { %p3414_p0 = pneg %p3413_p11  ;;  %p3420_p3 = por %p3419_p1, %p3418_p9 }
  0xb9   : > { %p3421_p12 = pnand %p3420_p3, %p3414_p0 }
  0xbb   : > { %3424 = shalt.err (!%p3421_p12)
}
  0xbc   : > { %s3425_s11 = scalar_lea.vmem %s851_s3, 16  ;;  %s3934_s5 = smov [#allocation15]  }
  0xbd   : > { %p3426_p2 = scmp.ne.s32.totalorder %s851_s3, %s3425_s11  ;;  %s3429_s28 = sshll.u32 %s3934_s5, 4  ;;  %s3430_s28 = int_to_ptr.vmem [resolvable:$false] %s3429_s28 }
  0xbe   : > { %s3431_s25 = scalar_lea.vmem %s3430_s28, 32  ;;  %p3432_p4 = scmp.lt.s32.totalorder %s851_s3, %s3430_s28 }
  0xbf   : > { %p3427_p13 = pnand %p3426_p2, %p5194_p6  ;;  %p3433_p7 = scmp.lt.s32.totalorder %s3431_s25, %s3425_s11 }
  0xc1   : > { %p3428_p10 = pneg %p3427_p13  ;;  %p3434_p11 = por %p3433_p7, %p3432_p4 }
  0xc3   : > { %p3435_p5 = pnand %p3434_p11, %p3428_p10 }
  0xc5   : > { %3438 = shalt.err (!%p3435_p5)
}
  0xc6   : > { %s5199_s24 = scalar_lea.sflag [#allocation16], %s4246_s4  ;;  %s5200_s9 = sld [smem:[#allocation70_spill]] }
  0xc7   : > { %3141 = dma.hbm_to_vmem [thread:$0]  (%p5194_p6), %s4312_s26, 16, %s851_s3, %s5199_s24  }
  0xc8   : > { %s877_s28 = scalar_lea.vmem [#allocation18], %s4249_s29 }
  0xc9   : > { %s884_s22 = sshll.u32 %s877_s28, 4  ;;  %s885_s22 = int_to_ptr.vmem [resolvable:$true] %s884_s22 }
  0xcc   : > { %s4339_s27 = scalar_lea.hbm %s5200_s9, %s4252_s1  ;;  %s3443_s3 = scalar_lea.hbm %s5200_s9, 32 }
  0xcd   : > { %s3439_s5 = scalar_lea.hbm %s4339_s27, 16  ;;  %p3444_p1 = scmp.lt.u32.totalorder %s4339_s27, %s5200_s9 }
  0xce   : > { %p3440_p0 = scmp.ne.s32.totalorder %s4339_s27, %s3439_s5  ;;  %p3445_p3 = scmp.lt.u32.totalorder %s3443_s3, %s3439_s5 }
  0xcf   : > { %p3447_p2 = scmp.lt.u32.totalorder %s3439_s5, %s4339_s27 }
  0xd0   : > { %p3441_p8 = pnand %p3440_p0, %p5194_p6  ;;  %p3446_p12 = por %p3445_p3, %p3444_p1 }
  0xd2   : > { %p3442_p9 = pneg %p3441_p8  ;;  %p3448_p13 = por %p3447_p2, %p3446_p12 }
  0xd4   : > { %p3449_p10 = pnand %p3448_p13, %p3442_p9 }
  0xd6   : > { %3452 = shalt.err (!%p3449_p10)
}
  0xd7   : > { %s3453_s8 = scalar_lea.vmem %s885_s22, 16  ;;  %s3935_s28 = smov [#allocation18]  }
  0xd8   : > { %p3454_p4 = scmp.ne.s32.totalorder %s885_s22, %s3453_s8  ;;  %s3457_s11 = sshll.u32 %s3935_s28, 4  ;;  %s3458_s11 = int_to_ptr.vmem [resolvable:$false] %s3457_s11 }
  0xd9   : > { %s3459_s25 = scalar_lea.vmem %s3458_s11, 32  ;;  %p3460_p5 = scmp.lt.s32.totalorder %s885_s22, %s3458_s11 }
  0xda   : > { %p3455_p7 = pnand %p3454_p4, %p5194_p6  ;;  %p3461_p0 = scmp.lt.s32.totalorder %s3459_s25, %s3453_s8 }
  0xdc   : > { %p3456_p11 = pneg %p3455_p7  ;;  %p3462_p8 = por %p3461_p0, %p3460_p5 }
  0xde   : > { %p3463_p1 = pnand %p3462_p8, %p3456_p11 }
  0xe0   : > { %3466 = shalt.err (!%p3463_p1)
}
  0xe1   : > { %s5201_s5 = scalar_lea.sflag [#allocation19], %s4246_s4  ;;  %s5202_s14 = sld [smem:[#allocation75_spill]] }
  0xe2   : > { %3143 = dma.hbm_to_vmem [thread:$0]  (%p5194_p6), %s4339_s27, 16, %s885_s22, %s5201_s5  }
  0xe3   : > { %s939_s11 = scalar_lea.vmem [#allocation21], %s4249_s29 }
  0xe4   : > { %s946_s12 = sshll.u32 %s939_s11, 4  ;;  %s947_s12 = int_to_ptr.vmem [resolvable:$true] %s946_s12 }
  0xe7   : > { %s4366_s24 = scalar_lea.hbm %s5202_s14, %s4252_s1  ;;  %s3471_s22 = scalar_lea.hbm %s5202_s14, 32 }
  0xe8   : > { %s3467_s28 = scalar_lea.hbm %s4366_s24, 16  ;;  %p3472_p2 = scmp.lt.u32.totalorder %s4366_s24, %s5202_s14 }
  0xe9   : > { %p3468_p9 = scmp.ne.s32.totalorder %s4366_s24, %s3467_s28  ;;  %p3473_p13 = scmp.lt.u32.totalorder %s3471_s22, %s3467_s28 }
  0xea   : > { %p3475_p4 = scmp.lt.u32.totalorder %s3467_s28, %s4366_s24 }
  0xeb   : > { %p3469_p3 = pnand %p3468_p9, %p5194_p6  ;;  %p3474_p10 = por %p3473_p13, %p3472_p2 }
  0xed   : > { %p3470_p12 = pneg %p3469_p3  ;;  %p3476_p7 = por %p3475_p4, %p3474_p10 }
  0xef   : > { %p3477_p11 = pnand %p3476_p7, %p3470_p12 }
  0xf1   : > { %3480 = shalt.err (!%p3477_p11)
}
  0xf2   : > { %s3481_s3 = scalar_lea.vmem %s947_s12, 16  ;;  %s3936_s11 = smov [#allocation21]  }
  0xf3   : > { %p3482_p5 = scmp.ne.s32.totalorder %s947_s12, %s3481_s3  ;;  %s3485_s8 = sshll.u32 %s3936_s11, 4  ;;  %s3486_s8 = int_to_ptr.vmem [resolvable:$false] %s3485_s8 }
  0xf4   : > { %s3487_s25 = scalar_lea.vmem %s3486_s8, 32  ;;  %p3488_p1 = scmp.lt.s32.totalorder %s947_s12, %s3486_s8 }
  0xf5   : > { %p3483_p0 = pnand %p3482_p5, %p5194_p6  ;;  %p3489_p9 = scmp.lt.s32.totalorder %s3487_s25, %s3481_s3 }
  0xf7   : > { %p3484_p8 = pneg %p3483_p0  ;;  %p3490_p3 = por %p3489_p9, %p3488_p1 }
  0xf9   : > { %p3491_p2 = pnand %p3490_p3, %p3484_p8 }
  0xfb   : > { %3494 = shalt.err (!%p3491_p2)
}
  0xfc   : > { %s5203_s28 = scalar_lea.sflag [#allocation22], %s4246_s4  ;;  %s5204_s16 = sld [smem:[#allocation77_spill]] }
  0xfd   : > { %3145 = dma.hbm_to_vmem [thread:$0]  (%p5194_p6), %s4366_s24, 16, %s947_s12, %s5203_s28  }
  0xfe   : > { %s973_s8 = scalar_lea.vmem [#allocation24], %s4249_s29  ;;  %s4399_s3 = sshll.u32 %s4249_s29, 4 }
  0xff   : > { %s980_s26 = sshll.u32 %s973_s8, 4  ;;  %s5125_s11 = scalar_lea.sflag [#allocation25], %s4246_s4  ;;  %s4396_s26 = int_to_ptr.vmem [resolvable:$true] %s980_s26 }
 0x102   : > { %s4393_s5 = scalar_lea.hbm %s5204_s16, %s4252_s1  ;;  %s3499_s28 = scalar_lea.hbm %s5204_s16, 32 }
 0x103   : > { %s3495_s25 = scalar_lea.hbm %s4393_s5, 16  ;;  %p3500_p4 = scmp.lt.u32.totalorder %s4393_s5, %s5204_s16 }
 0x104   : > { %p3496_p12 = scmp.ne.s32.totalorder %s4393_s5, %s3495_s25  ;;  %p3501_p7 = scmp.lt.u32.totalorder %s3499_s28, %s3495_s25 }
 0x105   : > { %p3503_p5 = scmp.lt.u32.totalorder %s3495_s25, %s4393_s5 }
 0x106   : > { %p3497_p13 = pnand %p3496_p12, %p5194_p6  ;;  %p3502_p11 = por %p3501_p7, %p3500_p4 }
 0x108   : > { %p3498_p10 = pneg %p3497_p13  ;;  %p3504_p0 = por %p3503_p5, %p3502_p11 }
 0x10a   : > { %p3505_p8 = pnand %p3504_p0, %p3498_p10 }
 0x10c   : > { %3508 = shalt.err (!%p3505_p8)
}
 0x10d   : > { %s3509_s8 = scalar_lea.vmem %s4396_s26, 16  ;;  %s3937_s24 = smov [#allocation24]  }
 0x10e   : > { %p3510_p1 = scmp.ne.s32.totalorder %s4396_s26, %s3509_s8  ;;  %s3513_s12 = sshll.u32 %s3937_s24, 4  ;;  %s3514_s12 = int_to_ptr.vmem [resolvable:$false] %s3513_s12 }
 0x10f   : > { %s3515_s27 = scalar_lea.vmem %s3514_s12, 32  ;;  %p3516_p2 = scmp.lt.s32.totalorder %s4396_s26, %s3514_s12 }
 0x110   : > { %p3511_p9 = pnand %p3510_p1, %p5194_p6  ;;  %p3517_p12 = scmp.lt.s32.totalorder %s3515_s27, %s3509_s8 }
 0x112   : > { %p3512_p3 = pneg %p3511_p9  ;;  %p3518_p13 = por %p3517_p12, %p3516_p2 }
 0x114   : > { %p3519_p4 = pnand %p3518_p13, %p3512_p3 }
 0x116   : > { %3522 = shalt.err (!%p3519_p4)
}
 0x117   : > { %3147 = dma.hbm_to_vmem [thread:$0]  (%p5194_p6), %s4393_s5, 16, %s4396_s26, %s5125_s11  }
 0x118   : > { %s4426_s25 = sshll.u32 %s3921_s7, 8  ;;  %s5205_s18 = sld [smem:[#allocation79_spill]] }
 0x119   : > { %s1012_s24 = scalar_lea.vmem [#allocation27], %s4399_s3  ;;  %s742_s27 = sand.u32 1, %s3909_s2  }
 0x11a   : > { %s1019_s12 = sshll.u32 %s1012_s24, 4  ;;  %s5132_s9 = scalar_lea.sflag [#allocation28], %s4246_s4  ;;  %s4436_s12 = int_to_ptr.vmem [resolvable:$true] %s1019_s12 }
 0x11e   : > { %s4432_s8 = scalar_lea.hbm %s5205_s18, %s4426_s25  ;;  %s3527_s28 = scalar_lea.hbm %s5205_s18, 512 }
 0x11f   : > { %s3523_s14 = scalar_lea.hbm %s4432_s8, 256  ;;  %p3528_p5 = scmp.lt.u32.totalorder %s4432_s8, %s5205_s18 }
 0x120   : > { %p3524_p10 = scmp.ne.s32.totalorder %s4432_s8, %s3523_s14  ;;  %p3529_p0 = scmp.lt.u32.totalorder %s3527_s28, %s3523_s14 }
 0x121   : > { %p3531_p1 = scmp.lt.u32.totalorder %s3523_s14, %s4432_s8 }
 0x122   : > { %p3525_p7 = pnand %p3524_p10, %p5194_p6  ;;  %p3530_p8 = por %p3529_p0, %p3528_p5 }
 0x124   : > { %p3526_p11 = pneg %p3525_p7  ;;  %p3532_p9 = por %p3531_p1, %p3530_p8 }
 0x126   : > { %p3533_p3 = pnand %p3532_p9, %p3526_p11 }
 0x128   : > { %3536 = shalt.err (!%p3533_p3)
}
 0x129   : > { %s3537_s24 = scalar_lea.vmem %s4436_s12, 256  ;;  %s3938_s5 = smov [#allocation27]  }
 0x12a   : > { %p3538_p2 = scmp.ne.s32.totalorder %s4436_s12, %s3537_s24  ;;  %s3541_s26 = sshll.u32 %s3938_s5, 4  ;;  %s3542_s26 = int_to_ptr.vmem [resolvable:$false] %s3541_s26 }
 0x12b   : > { %s3543_s11 = scalar_lea.vmem %s3542_s26, 512  ;;  %p3544_p4 = scmp.lt.s32.totalorder %s4436_s12, %s3542_s26 }
 0x12c   : > { %p3539_p12 = pnand %p3538_p2, %p5194_p6  ;;  %p3545_p10 = scmp.lt.s32.totalorder %s3543_s11, %s3537_s24 }
 0x12e   : > { %p3540_p13 = pneg %p3539_p12  ;;  %p3546_p7 = por %p3545_p10, %p3544_p4 }
 0x130   : > { %p3547_p5 = pnand %p3546_p7, %p3540_p13 }
 0x132   : > { %3550 = shalt.err (!%p3547_p5)
}
 0x133   : > { %s5133_s14 = smov 64   ;;  %s5135_s28 = smov 4  }
 0x134   : > { %3149 = dma.hbm_to_vmem [thread:$0]  (%p5194_p6), %s4432_s8, 256, %s4436_s12, %s5132_s9, %s5133_s14, %s5133_s14, %s5135_s28  }
 0x135   : > { %s2953_s22 = sshll.u32 %s742_s27, 3  ;;  %s2954_s24 = sshll.u32 %s3925_s30, 7 }
 0x136   : > { %s5206_s11 = sld [smem:[#allocation61_spill]]  ;;  %s746_s18 = scalar_lea.vmem [#allocation6], %s2953_s22 }
 0x137   : > { %s753_s20 = sshll.u32 %s746_s18, 4  ;;  %s5207_s6 = sld [smem:[#allocation63_spill]]  ;;  %s4473_s20 = int_to_ptr.vmem [resolvable:$true] %s753_s20 }
 0x138   : > { %s743_s12 = scalar_lea.sflag [#allocation7], %s742_s27  ;;  %p5209_p0 = scmp.ne.s32.totalorder %s5174_s0, 0 }
 0x13c   : > { %s4471_s16 = scalar_lea.hbm %s5206_s11, %s2954_s24  ;;  %s3555_s26 = scalar_lea.hbm %s5206_s11, 256 }
 0x13d   : > { %s5208_s23 = smov %s5207_s6  ;;  %s4479_s8 = scalar_lea.hbm %s5207_s6, %s4252_s1 }
 0x13e   : > { %s3551_s9 = scalar_lea.hbm %s4471_s16, 128  ;;  %p3556_p9 = scmp.lt.u32.totalorder %s4471_s16, %s5206_s11 }
 0x13f   : > { %p3552_p11 = scmp.ne.s32.totalorder %s4471_s16, %s3551_s9  ;;  %p3557_p3 = scmp.lt.u32.totalorder %s3555_s26, %s3551_s9 }
 0x140   : > { %p3559_p12 = scmp.lt.u32.totalorder %s3551_s9, %s4471_s16 }
 0x141   : > { %p3553_p8 = pnand %p3552_p11, %p5209_p0  ;;  %p3558_p2 = por %p3557_p3, %p3556_p9 }
 0x143   : > { %p3554_p1 = pneg %p3553_p8  ;;  %p3560_p13 = por %p3559_p12, %p3558_p2 }
 0x145   : > { %p3561_p4 = pnand %p3560_p13, %p3554_p1 }
 0x147   : > { %3564 = shalt.err (!%p3561_p4)
}
 0x148   : > { %s3565_s21 = scalar_lea.vmem %s4473_s20, 128  ;;  %s3941_s6 = smov [#allocation6]  }
 0x149   : > { %p3566_p10 = scmp.ne.s32.totalorder %s4473_s20, %s3565_s21  ;;  %s3569_s7 = sshll.u32 %s3941_s6, 4  ;;  %s3570_s7 = int_to_ptr.vmem [resolvable:$false] %s3569_s7 }
 0x14a   : > { %s3571_s27 = scalar_lea.vmem %s3570_s7, 256  ;;  %p3572_p11 = scmp.lt.s32.totalorder %s4473_s20, %s3570_s7 }
 0x14b   : > { %p3567_p7 = pnand %p3566_p10, %p5209_p0  ;;  %p3573_p8 = scmp.lt.s32.totalorder %s3571_s27, %s3565_s21 }
 0x14d   : > { %p3568_p5 = pneg %p3567_p7  ;;  %p3574_p9 = por %p3573_p8, %p3572_p11 }
 0x14f   : > { %p3575_p3 = pnand %p3574_p9, %p3568_p5 }
 0x151   : > { %3578 = shalt.err (!%p3575_p3)
}
 0x152   : > { %3136 = dma.hbm_to_vmem [thread:$0]  (%p5209_p0), %s4471_s16, 128, %s4473_s20, %s743_s12  }
 0x153   : > { %s780_s9 = scalar_lea.vmem [#allocation11], %s4249_s29  ;;  %s5210_s22 = sld [smem:[#allocation65_spill]] }
 0x154   : > { %s787_s24 = sshll.u32 %s780_s9, 4  ;;  %s3579_s21 = scalar_lea.hbm %s4479_s8, 16  ;;  %s788_s24 = int_to_ptr.vmem [resolvable:$true] %s787_s24 }
 0x155   : > { %p3580_p1 = scmp.ne.s32.totalorder %s4479_s8, %s3579_s21  ;;  %s3583_s7 = scalar_lea.hbm %s5208_s23, 32 }
 0x156   : > { %p3584_p0 = scmp.lt.u32.totalorder %s4479_s8, %s5208_s23  ;;  %p3585_p13 = scmp.lt.u32.totalorder %s3583_s7, %s3579_s21 }
 0x157   : > { %p3581_p2 = pnand %p3580_p1, %p5194_p6  ;;  %p3587_p10 = scmp.lt.u32.totalorder %s3579_s21, %s4479_s8 }
 0x158   : > { %p3586_p4 = por %p3585_p13, %p3584_p0 }
 0x159   : > { %s4509_s18 = scalar_lea.hbm %s5210_s22, %s4252_s1  ;;  %p3582_p12 = pneg %p3581_p2 }
 0x15a   : > { %p3588_p7 = por %p3587_p10, %p3586_p4 }
 0x15c   : > { %p3589_p5 = pnand %p3588_p7, %p3582_p12 }
 0x15e   : > { %3592 = shalt.err (!%p3589_p5)
}
 0x15f   : > { %s3593_s16 = scalar_lea.vmem %s788_s24, 16  ;;  %s3942_s20 = smov [#allocation11]  }
 0x160   : > { %p3594_p11 = scmp.ne.s32.totalorder %s788_s24, %s3593_s16  ;;  %s3597_s12 = sshll.u32 %s3942_s20, 4  ;;  %s3598_s12 = int_to_ptr.vmem [resolvable:$false] %s3597_s12 }
 0x161   : > { %s3599_s9 = scalar_lea.vmem %s3598_s12, 32  ;;  %p3600_p3 = scmp.lt.s32.totalorder %s788_s24, %s3598_s12 }
 0x162   : > { %p3595_p8 = pnand %p3594_p11, %p5194_p6  ;;  %p3601_p1 = scmp.lt.s32.totalorder %s3599_s9, %s3593_s16 }
 0x164   : > { %p3596_p9 = pneg %p3595_p8  ;;  %p3602_p2 = por %p3601_p1, %p3600_p3 }
 0x166   : > { %p3603_p0 = pnand %p3602_p2, %p3596_p9 }
 0x168   : > { %3606 = shalt.err (!%p3603_p0)
}
 0x169   : > { %s5211_s14 = scalar_lea.sflag [#allocation10], %s4246_s4  ;;  %s814_s5 = scalar_lea.vmem [#allocation14], %s4249_s29 }
 0x16a   : > { %3138 = dma.hbm_to_vmem [thread:$0]  (%p5194_p6), %s4479_s8, 16, %s788_s24, %s5211_s14  }
 0x16b   : > { %s821_s26 = sshll.u32 %s814_s5, 4  ;;  %s5212_s6 = sld [smem:[#allocation69_spill]]  ;;  %s822_s26 = int_to_ptr.vmem [resolvable:$true] %s821_s26 }
 0x16c   : > { %s3607_s27 = scalar_lea.hbm %s4509_s18, 16  ;;  %s3611_s9 = scalar_lea.hbm %s5210_s22, 32 }
 0x16d   : > { %p3608_p12 = scmp.ne.s32.totalorder %s4509_s18, %s3607_s27  ;;  %p3612_p10 = scmp.lt.u32.totalorder %s4509_s18, %s5210_s22 }
 0x16e   : > { %p3613_p7 = scmp.lt.u32.totalorder %s3611_s9, %s3607_s27  ;;  %p3615_p11 = scmp.lt.u32.totalorder %s3607_s27, %s4509_s18 }
 0x16f   : > { %p3609_p13 = pnand %p3608_p12, %p5194_p6 }
 0x170   : > { %p3614_p5 = por %p3613_p7, %p3612_p10 }
 0x171   : > { %s5213_s16 = smov %s5212_s6  ;;  %s4535_s7 = scalar_lea.hbm %s5212_s6, %s4252_s1 }
 0x172   : > { %p3610_p4 = pneg %p3609_p13  ;;  %p3616_p8 = por %p3615_p11, %p3614_p5 }
 0x174   : > { %p3617_p9 = pnand %p3616_p8, %p3610_p4 }
 0x176   : > { %3620 = shalt.err (!%p3617_p9)
}
 0x177   : > { %s3621_s8 = scalar_lea.vmem %s822_s26, 16  ;;  %s3943_s24 = smov [#allocation14]  }
 0x178   : > { %p3622_p3 = scmp.ne.s32.totalorder %s822_s26, %s3621_s8  ;;  %s3625_s14 = sshll.u32 %s3943_s24, 4  ;;  %s3626_s14 = int_to_ptr.vmem [resolvable:$false] %s3625_s14 }
 0x179   : > { %s3627_s5 = scalar_lea.vmem %s3626_s14, 32  ;;  %p3628_p0 = scmp.lt.s32.totalorder %s822_s26, %s3626_s14 }
 0x17a   : > { %p3623_p1 = pnand %p3622_p3, %p5194_p6  ;;  %p3629_p12 = scmp.lt.s32.totalorder %s3627_s5, %s3621_s8 }
 0x17c   : > { %p3624_p2 = pneg %p3623_p1  ;;  %p3630_p13 = por %p3629_p12, %p3628_p0 }
 0x17e   : > { %p3631_p7 = pnand %p3630_p13, %p3624_p2 }
 0x180   : > { %3634 = shalt.err (!%p3631_p7)
}
 0x181   : > { %s5214_s28 = scalar_lea.sflag [#allocation13], %s4246_s4  ;;  %s860_s11 = scalar_lea.vmem [#allocation17], %s4249_s29 }
 0x182   : > { %3140 = dma.hbm_to_vmem [thread:$0]  (%p5194_p6), %s4509_s18, 16, %s822_s26, %s5214_s28  }
 0x183   : > { %s867_s21 = sshll.u32 %s860_s11, 4  ;;  %s5215_s13 = sld [smem:[#allocation74_spill]]  ;;  %s868_s21 = int_to_ptr.vmem [resolvable:$true] %s867_s21 }
 0x184   : > { %s3635_s20 = scalar_lea.hbm %s4535_s7, 16  ;;  %s3639_s8 = scalar_lea.hbm %s5213_s16, 32 }
 0x185   : > { %p3636_p4 = scmp.ne.s32.totalorder %s4535_s7, %s3635_s20  ;;  %p3640_p11 = scmp.lt.u32.totalorder %s4535_s7, %s5213_s16 }
 0x186   : > { %p3641_p8 = scmp.lt.u32.totalorder %s3639_s8, %s3635_s20  ;;  %p3643_p3 = scmp.lt.u32.totalorder %s3635_s20, %s4535_s7 }
 0x187   : > { %p3637_p10 = pnand %p3636_p4, %p5194_p6 }
 0x188   : > { %p3642_p9 = por %p3641_p8, %p3640_p11 }
 0x189   : > { %s4561_s27 = scalar_lea.hbm %s5215_s13, %s4426_s25  ;;  %p3638_p5 = pneg %p3637_p10 }
 0x18a   : > { %p3644_p1 = por %p3643_p3, %p3642_p9 }
 0x18c   : > { %p3645_p2 = pnand %p3644_p1, %p3638_p5 }
 0x18e   : > { %3648 = shalt.err (!%p3645_p2)
}
 0x18f   : > { %s3649_s18 = scalar_lea.vmem %s868_s21, 16  ;;  %s3944_s26 = smov [#allocation17]  }
 0x190   : > { %p3650_p0 = scmp.ne.s32.totalorder %s868_s21, %s3649_s18  ;;  %s3653_s5 = sshll.u32 %s3944_s26, 4  ;;  %s3654_s5 = int_to_ptr.vmem [resolvable:$false] %s3653_s5 }
 0x191   : > { %s3655_s28 = scalar_lea.vmem %s3654_s5, 32  ;;  %p3656_p7 = scmp.lt.s32.totalorder %s868_s21, %s3654_s5 }
 0x192   : > { %p3651_p12 = pnand %p3650_p0, %p5194_p6  ;;  %p3657_p4 = scmp.lt.s32.totalorder %s3655_s28, %s3649_s18 }
 0x194   : > { %p3652_p13 = pneg %p3651_p12  ;;  %p3658_p10 = por %p3657_p4, %p3656_p7 }
 0x196   : > { %p3659_p8 = pnand %p3658_p10, %p3652_p13 }
 0x198   : > { %3662 = shalt.err (!%p3659_p8)
}
 0x199   : > { %s5216_s11 = scalar_lea.sflag [#allocation16], %s4246_s4  ;;  %s919_s0 = scalar_lea.vmem [#allocation20], %s4399_s3 }
 0x19a   : > { %3142 = dma.hbm_to_vmem [thread:$0]  (%p5194_p6), %s4535_s7, 16, %s868_s21, %s5216_s11  }
 0x19b   : > { %s926_s6 = sshll.u32 %s919_s0, 4  ;;  %s5217_s15 = sld [smem:[#allocation76_spill]]  ;;  %s4583_s6 = int_to_ptr.vmem [resolvable:$true] %s926_s6 }
 0x19c   : > { %s3663_s8 = scalar_lea.hbm %s4561_s27, 256  ;;  %s3667_s18 = scalar_lea.hbm %s5215_s13, 512 }
 0x19d   : > { %p3664_p5 = scmp.ne.s32.totalorder %s4561_s27, %s3663_s8  ;;  %p3668_p3 = scmp.lt.u32.totalorder %s4561_s27, %s5215_s13 }
 0x19e   : > { %p3669_p1 = scmp.lt.u32.totalorder %s3667_s18, %s3663_s8  ;;  %p3671_p0 = scmp.lt.u32.totalorder %s3663_s8, %s4561_s27 }
 0x19f   : > { %p3665_p11 = pnand %p3664_p5, %p5194_p6 }
 0x1a0   : > { %p3670_p2 = por %p3669_p1, %p3668_p3 }
 0x1a1   : > { %s4589_s9 = scalar_lea.hbm %s5217_s15, %s4252_s1  ;;  %p3666_p9 = pneg %p3665_p11 }
 0x1a2   : > { %p3672_p12 = por %p3671_p0, %p3670_p2 }
 0x1a4   : > { %p3673_p13 = pnand %p3672_p12, %p3666_p9 }
 0x1a6   : > { %3676 = shalt.err (!%p3673_p13)
}
 0x1a7   : > { %s3677_s1 = scalar_lea.vmem %s4583_s6, 256  ;;  %s3945_s21 = smov [#allocation20]  }
 0x1a8   : > { %p3678_p7 = scmp.ne.s32.totalorder %s4583_s6, %s3677_s1  ;;  %s3681_s5 = sshll.u32 %s3945_s21, 4  ;;  %s3682_s5 = int_to_ptr.vmem [resolvable:$false] %s3681_s5 }
 0x1a9   : > { %s3683_s28 = scalar_lea.vmem %s3682_s5, 512  ;;  %p3684_p8 = scmp.lt.s32.totalorder %s4583_s6, %s3682_s5 }
 0x1aa   : > { %p3679_p4 = pnand %p3678_p7, %p5194_p6  ;;  %p3685_p5 = scmp.lt.s32.totalorder %s3683_s28, %s3677_s1 }
 0x1ac   : > { %p3680_p10 = pneg %p3679_p4  ;;  %p3686_p11 = por %p3685_p5, %p3684_p8 }
 0x1ae   : > { %p3687_p3 = pnand %p3686_p11, %p3680_p10 }
 0x1b0   : > { %3690 = shalt.err (!%p3687_p3)
}
 0x1b1   : > { %s5218_s11 = smov 4   ;;  %s5219_s0 = smov 64  }
 0x1b2   : > { %s5220_s20 = scalar_lea.sflag [#allocation19], %s4246_s4  ;;  %s956_s12 = scalar_lea.vmem [#allocation23], %s4249_s29 }
 0x1b3   : > { %3144 = dma.hbm_to_vmem [thread:$0]  (%p5194_p6), %s4561_s27, 256, %s4583_s6, %s5220_s20, %s5219_s0, %s5219_s0, %s5218_s11  }
 0x1b4   : > { %s963_s8 = sshll.u32 %s956_s12, 4  ;;  %s5221_s17 = sld [smem:[#allocation78_spill]]  ;;  %s964_s8 = int_to_ptr.vmem [resolvable:$true] %s963_s8 }
 0x1b5   : > { %s3691_s26 = scalar_lea.hbm %s4589_s9, 16  ;;  %s3695_s21 = scalar_lea.hbm %s5217_s15, 32 }
 0x1b6   : > { %p3692_p9 = scmp.ne.s32.totalorder %s4589_s9, %s3691_s26  ;;  %p3696_p0 = scmp.lt.u32.totalorder %s4589_s9, %s5217_s15 }
 0x1b7   : > { %p3697_p12 = scmp.lt.u32.totalorder %s3695_s21, %s3691_s26  ;;  %p3699_p7 = scmp.lt.u32.totalorder %s3691_s26, %s4589_s9 }
 0x1b8   : > { %p3693_p1 = pnand %p3692_p9, %p5194_p6 }
 0x1b9   : > { %p3698_p13 = por %p3697_p12, %p3696_p0 }
 0x1ba   : > { %s4622_s18 = scalar_lea.hbm %s5221_s17, %s4426_s25  ;;  %p3694_p2 = pneg %p3693_p1 }
 0x1bb   : > { %p3700_p4 = por %p3699_p7, %p3698_p13 }
 0x1bd   : > { %p3701_p10 = pnand %p3700_p4, %p3694_p2 }
 0x1bf   : > { %3704 = shalt.err (!%p3701_p10)
}
 0x1c0   : > { %s3705_s29 = scalar_lea.vmem %s964_s8, 16  ;;  %s3946_s27 = smov [#allocation23]  }
 0x1c1   : > { %p3706_p8 = scmp.ne.s32.totalorder %s964_s8, %s3705_s29  ;;  %s3709_s6 = sshll.u32 %s3946_s27, 4  ;;  %s3710_s6 = int_to_ptr.vmem [resolvable:$false] %s3709_s6 }
 0x1c2   : > { %s3711_s20 = scalar_lea.vmem %s3710_s6, 32  ;;  %p3712_p3 = scmp.lt.s32.totalorder %s964_s8, %s3710_s6 }
 0x1c3   : > { %p3707_p5 = pnand %p3706_p8, %p5194_p6  ;;  %p3713_p9 = scmp.lt.s32.totalorder %s3711_s20, %s3705_s29 }
 0x1c5   : > { %p3708_p11 = pneg %p3707_p5  ;;  %p3714_p1 = por %p3713_p9, %p3712_p3 }
 0x1c7   : > { %p3715_p0 = pnand %p3714_p1, %p3708_p11 }
 0x1c9   : > { %3718 = shalt.err (!%p3715_p0)
}
 0x1ca   : > { %s5222_s12 = scalar_lea.sflag [#allocation22], %s4246_s4  ;;  %s991_s24 = scalar_lea.vmem [#allocation26], %s4399_s3 }
 0x1cb   : > { %3146 = dma.hbm_to_vmem [thread:$0]  (%p5194_p6), %s4589_s9, 16, %s964_s8, %s5222_s12  }
 0x1cc   : > { %s998_s14 = sshll.u32 %s991_s24, 4  ;;  %s5223_s19 = sld [smem:[#allocation80_spill]]  ;;  %s4644_s14 = int_to_ptr.vmem [resolvable:$true] %s998_s14 }
 0x1cd   : > { %s3719_s21 = scalar_lea.hbm %s4622_s18, 256  ;;  %s3723_s29 = scalar_lea.hbm %s5221_s17, 512 }
 0x1ce   : > { %p3720_p2 = scmp.ne.s32.totalorder %s4622_s18, %s3719_s21  ;;  %p3724_p7 = scmp.lt.u32.totalorder %s4622_s18, %s5221_s17 }
 0x1cf   : > { %p3725_p4 = scmp.lt.u32.totalorder %s3723_s29, %s3719_s21  ;;  %p3727_p8 = scmp.lt.u32.totalorder %s3719_s21, %s4622_s18 }
 0x1d0   : > { %p3721_p12 = pnand %p3720_p2, %p5194_p6 }
 0x1d1   : > { %p3726_p10 = por %p3725_p4, %p3724_p7 }
 0x1d2   : > { %s4650_s1 = scalar_lea.hbm %s5223_s19, %s4426_s25  ;;  %p3722_p13 = pneg %p3721_p12 }
 0x1d3   : > { %p3728_p5 = por %p3727_p8, %p3726_p10 }
 0x1d5   : > { %p3729_p11 = pnand %p3728_p5, %p3722_p13 }
 0x1d7   : > { %3732 = shalt.err (!%p3729_p11)
}
 0x1d8   : > { %s3733_s25 = scalar_lea.vmem %s4644_s14, 256  ;;  %s3947_s8 = smov [#allocation26]  }
 0x1d9   : > { %p3734_p3 = scmp.ne.s32.totalorder %s4644_s14, %s3733_s25  ;;  %s3737_s6 = sshll.u32 %s3947_s8, 4  ;;  %s3738_s6 = int_to_ptr.vmem [resolvable:$false] %s3737_s6 }
 0x1da   : > { %s3739_s20 = scalar_lea.vmem %s3738_s6, 512  ;;  %p3740_p0 = scmp.lt.s32.totalorder %s4644_s14, %s3738_s6 }
 0x1db   : > { %p3735_p9 = pnand %p3734_p3, %p5194_p6  ;;  %p3741_p2 = scmp.lt.s32.totalorder %s3739_s20, %s3733_s25 }
 0x1dd   : > { %p3736_p1 = pneg %p3735_p9  ;;  %p3742_p12 = por %p3741_p2, %p3740_p0 }
 0x1df   : > { %p3743_p7 = pnand %p3742_p12, %p3736_p1 }
 0x1e1   : > { %3746 = shalt.err (!%p3743_p7)
}
 0x1e2   : > { %s5224_s12 = scalar_lea.sflag [#allocation25], %s4246_s4  ;;  %s1033_s24 = scalar_lea.vmem [#allocation29], %s4399_s3 }
 0x1e3   : > { %3148 = dma.hbm_to_vmem [thread:$0]  (%p5194_p6), %s4622_s18, 256, %s4644_s14, %s5224_s12, %s5219_s0, %s5219_s0, %s5218_s11  }
 0x1e4   : > { %s1040_s26 = sshll.u32 %s1033_s24, 4  ;;  %s3747_s7 = scalar_lea.hbm %s4650_s1, 256  ;;  %s4679_s26 = int_to_ptr.vmem [resolvable:$true] %s1040_s26 }
 0x1e5   : > { %p3748_p13 = scmp.ne.s32.totalorder %s4650_s1, %s3747_s7  ;;  %s3751_s28 = scalar_lea.hbm %s5223_s19, 512 }
 0x1e6   : > { %p3752_p8 = scmp.lt.u32.totalorder %s4650_s1, %s5223_s19  ;;  %p3753_p5 = scmp.lt.u32.totalorder %s3751_s28, %s3747_s7 }
 0x1e7   : > { %p3749_p4 = pnand %p3748_p13, %p5194_p6  ;;  %p3755_p3 = scmp.lt.u32.totalorder %s3747_s7, %s4650_s1 }
 0x1e8   : > { %p3754_p11 = por %p3753_p5, %p3752_p8 }
 0x1e9   : > { %p3750_p10 = pneg %p3749_p4 }
 0x1ea   : > { %p3756_p9 = por %p3755_p3, %p3754_p11 }
 0x1ec   : > { %p3757_p1 = pnand %p3756_p9, %p3750_p10 }
 0x1ee   : > { %3760 = shalt.err (!%p3757_p1)
}
 0x1ef   : > { %s3761_s3 = scalar_lea.vmem %s4679_s26, 256  ;;  %s3948_s18 = smov [#allocation29]  }
 0x1f0   : > { %p3762_p0 = scmp.ne.s32.totalorder %s4679_s26, %s3761_s3  ;;  %s3765_s14 = sshll.u32 %s3948_s18, 4  ;;  %s3766_s14 = int_to_ptr.vmem [resolvable:$false] %s3765_s14 }
 0x1f1   : > { %s3767_s9 = scalar_lea.vmem %s3766_s14, 512  ;;  %p3768_p7 = scmp.lt.s32.totalorder %s4679_s26, %s3766_s14 }
 0x1f2   : > { %p3763_p2 = pnand %p3762_p0, %p5194_p6  ;;  %p3769_p13 = scmp.lt.s32.totalorder %s3767_s9, %s3761_s3 }
 0x1f4   : > { %p3764_p12 = pneg %p3763_p2  ;;  %p3770_p4 = por %p3769_p13, %p3768_p7 }
 0x1f6   : > { %p3771_p8 = pnand %p3770_p4, %p3764_p12 }
 0x1f8   : > { %3774 = shalt.err (!%p3771_p8)
}
 0x1f9   : > { %s5225_s25 = scalar_lea.sflag [#allocation28], %s4246_s4 }
 0x1fa   : > { %3150 = dma.hbm_to_vmem [thread:$0]  (%p5194_p6), %s4650_s1, 256, %s4679_s26, %s5225_s25, %s5219_s0, %s5219_s0, %s5218_s11  }
 0x1fb PF: > { %s5226_s8 = sld [smem:[#allocation60_spill]] }
 0x201   : > { %p5227_p10 = scmp.ne.s32.totalorder %s5226_s8, 0 }
 0x202   : > { %s5228_s6 = sld [smem:[#allocation46_spill]] (!%p5227_p10)  ;;  %s5229_s20 = sld [smem:[#allocation54_spill]] (!%p5227_p10) }
 0x203   : > { %1052 = sbr.rel (%p5227_p10) target bundleno = 2642 (0xa52), region = 116 }
 0x208   : > { %s4710_s12 = sand.u32 (!%p5227_p10), 1, %s5228_s6   ;;  %p5230_p5 = scmp.ne.s32.totalorder (!%p5227_p10), %s5229_s20, 0 }
 0x209   : > { %s2978_s24 = sshll.u32 (!%p5227_p10), %s4710_s12, 3  ;;  %s1055_s10 = scalar_lea.sflag (!%p5227_p10), [#allocation7], %s4710_s12 }
 0x20a   : > { %s4714_s7 = scalar_lea.vmem [#allocation6], %s2978_s24 }
 0x20b   : > { %3848 = dma.done.wait (%p5230_p5), %s1055_s10, 128  }
 0x20c   : > { %3850 = vsyncadd (%p5230_p5), %s1055_s10, 4294967168  ;;  %s5231_s4 = sld [smem:[#allocation51_spill]]  ;;  %s5232_s11 = sld [smem:[#allocation43_spill]] }
 0x20d   : > { %s5233_s0 = sld [smem:[#allocation57_spill]] }
 0x212   : > { %s4721_s1 = sand.u32 1, %s5231_s4   ;;  %s4724_s26 = sand.u32 1, %s5232_s11  }
 0x213   : > { %s1064_s21 = scalar_lea.sflag [#allocation10], %s4721_s1  ;;  %p5234_p6 = scmp.ne.s32.totalorder %s5233_s0, 0 }
 0x215   : > { %3852 = dma.done.wait (%p5234_p6), %s1064_s21, 32  }
 0x216   : > { %3854 = vsyncadd (%p5234_p6), %s1064_s21, 4294967264  ;;  %s1080_s29 = scalar_lea.sflag [#allocation13], %s4721_s1 }
 0x217   : > { %3856 = dma.done.wait (%p5234_p6), %s1080_s29, 32  }
 0x218   : > { %3858 = vsyncadd (%p5234_p6), %s1080_s29, 4294967264  ;;  %s1096_s18 = scalar_lea.sflag [#allocation16], %s4721_s1 }
 0x219   : > { %3860 = dma.done.wait (%p5234_p6), %s1096_s18, 32  }
 0x21a   : > { %3862 = vsyncadd (%p5234_p6), %s1096_s18, 4294967264  ;;  %s1112_s25 = scalar_lea.sflag [#allocation19], %s4721_s1 }
 0x21b   : > { %3864 = dma.done.wait (%p5234_p6), %s1112_s25, 272  }
 0x21c   : > { %3866 = vsyncadd (%p5234_p6), %s1112_s25, 4294967024  ;;  %s4754_s6 = sshll.u32 %s4724_s26, 4  ;;  %s1129_s24 = scalar_lea.sflag [#allocation22], %s4721_s1 }
 0x21d   : > { %3868 = dma.done.wait (%p5234_p6), %s1129_s24, 32  }
 0x21e   : > { %3870 = vsyncadd (%p5234_p6), %s1129_s24, 4294967264  ;;  %s1145_s21 = scalar_lea.sflag [#allocation25], %s4721_s1 }
 0x21f   : > { %3872 = dma.done.wait (%p5234_p6), %s1145_s21, 272  }
 0x220   : > { %3874 = vsyncadd (%p5234_p6), %s1145_s21, 4294967024  ;;  %s1162_s25 = scalar_lea.sflag [#allocation28], %s4721_s1 }
 0x221   : > { %3876 = dma.done.wait (%p5234_p6), %s1162_s25, 512  }
 0x222   : > { %3878 = vsyncadd (%p5234_p6), %s1162_s25, 4294966784  ;;  %p5235_p11 = scmp.eq.s32.totalorder %s5231_s4, 0 }
 0x224   : > { %3880 = dma.done.wait (%p5235_p11), [#allocation31], 64   ;;  %p5236_p3 = pmov %p5235_p11 }
 0x225   : > { %s5237_s21 = sld [smem:[#allocation47_spill]]  ;;  %s2984_s11 = sshll.u32 %s4710_s12, 2 }
 0x226   : > { %3882 = vsyncadd (%p5236_p3), [#allocation31], 4294967232  ;;  %s5238_s0 = sld [smem:[#allocation66_spill]]  ;;  %s5239_s18 = sld [smem:[#allocation67_spill]] }
 0x227   : > { %s5240_s14 = sld [smem:[#allocation71_spill]]  ;;  %s5241_s13 = sld [smem:[#allocation72_spill]] }
 0x228   : > { %s5242_s19 = sld [smem:[#allocation73_spill]]  ;;  %s4807_s29 = scalar_lea.vmem [#allocation32], %s2984_s11 }
 0x22b   : > { %p1324_p9 = scmp.lt.s32.totalorder %s5237_s21, 1  ;;  %p2991_p1 = scmp.ne.s32.totalorder %s5237_s21, 0 }
 0x22c   : > { %v1350_v0 = vld [vmem:[%s4714_s7] sm:$0xff] (!%p2991_p1)  ;;  %vm1351_vm0 = vcmask (!%p2991_p1), 261120  }
 0x22d   : > { %s4785_s1 = scalar_select %p1324_p9, %s5237_s21, 1 }
 0x22e   : > { %1349 = sbr.rel (%p2991_p1) target bundleno = 565 (0x235), region = 184  ;;  %1352 = vst.msk [vmem:[#allocation2] sm:$0xff] (!%p2991_p1), %vm1351_vm0, %v1350_v0 }
 0x22f   : > { %s1326_s25 = scalar_lea.vmem %s5238_s0, %s4785_s1  ;;  %s1329_s10 = scalar_lea.vmem %s5239_s18, %s4785_s1 }
 0x230   : > { %s3038_s4 = sshll.u32 %s4785_s1, 4 }
 0x231   : > { %s1334_s9 = scalar_lea.vmem %s5240_s14, %s3038_s4  ;;  %s1339_s15 = scalar_lea.vmem %s5241_s13, %s3038_s4 }
 0x232   : > { %s4805_s27 = scalar_lea.vmem %s5242_s19, %s3038_s4 }
 0x235 PF: > { %v4811_v1 = vld [vmem:[#allocation2] sm:$0xff]  ;;  %vm1356_vm1 = vcmask 261120   ;;  %v3949_v10 = vmov 0.0   ;;  %v3280_v11 = vld [vmem:[%s1334_s9 + $0x8] sm:$0xff]   ;;  %vm3950_vm2 = vmmov 0   ;;  %v1386_v16 = vlaneseq  ;;  %s5243_s13 = scalar_lea.vmem [#allocation9], %s4724_s26 }
 0x236   : > { %v1357_v2 = vsel %vm1356_vm1, %v4811_v1, 0.0  ;;  %v3278_v8 = vld [vmem:[%s1334_s9] sm:$0xff]   ;;  %3066 = vmatprep.subr.bf16.mxu0 %v3949_v10  ;;  %3074 = vmatprep.subr.bf16.mxu1 %v3949_v10  ;;  %v3281_v12 = vld [vmem:[%s1339_s15 + $0x8] sm:$0xff]   ;;  %s5245_s17 = scalar_lea.vmem [#allocation17], %s4724_s26  ;;  %s5246_s19 = scalar_lea.vmem [#allocation15], %s4724_s26  ;;  %vm1691_vm4 = vcmask 253952  }
 0x237   : > { %1358 = vadd.xlane.f32.xlu0 %v1357_v2  ;;  %v3279_v9 = vld [vmem:[%s1339_s15] sm:$0xff]   ;;  %3067 = vmatpush3.bf16.msra.mxu0 %v3278_v8  ;;  %s5244_s15 = scalar_lea.vmem [#allocation11], %s4724_s26  ;;  %v4831_v21 = vshrl.u32 %v1386_v16, 7  ;;  %s5247_s16 = scalar_lea.vmem [#allocation18], %s4724_s26  ;;  %v3283_v40 = vld [vmem:[%s4805_s27 + $0x8] sm:$0xff]   ;;  %vm2038_vm5 = vcmask 1041409  }
 0x238   : > { %3075 = vmatpush3.bf16.msra.mxu1 %v3279_v9  ;;  %3068 = vmatprep.subr.bf16.mxu0 %v3949_v10  ;;  %v2992_v18 = vld [vmem:[%s5243_s13] ss:$0 sm:$0xff]  ;;  %s5248_s7 = scalar_lea.vmem [#allocation20], %s4754_s6  ;;  %vm2041_vm6 = vcmask 1042434   ;;  %vm2044_vm7 = vcmask 1043459   ;;  %vm2047_vm8 = vcmask 1044484  }
 0x239   : > { %3076 = vmatprep.subr.bf16.mxu1 %v3949_v10  ;;  %3070 = vmatprep.mubr.msk.bf16.mxu0 %vm3950_vm2, %v3949_v10  ;;  %v2993_v20 = vld [vmem:[%s5244_s15] ss:$0 sm:$0xff]  ;;  %vm1388_vm3 = vcmp.lt.s32.totalorder %v4831_v21, 1  ;;  %s5249_s5 = smov %s5248_s7  ;;  %v1616_v48 = vsub.s32 0, %v4831_v21  ;;  %vm2050_vm9 = vcmask 1045509   ;;  %vm2053_vm10 = vcmask 1046534  }
 0x23a   : > { %3078 = vmatprep.mubr.msk.bf16.mxu1 %vm3950_vm2, %v3949_v10  ;;  %v2994_v25 = vld [vmem:[%s5245_s17] ss:$0 sm:$0xff]  ;;  %v3285_v46 = vld [vmem:[%s5249_s5 + $0x8] sm:$0xff]   ;;  %vm2056_vm11 = vcmask 1047559   ;;  %s5253_s11 = scalar_lea.vmem [#allocation26], %s4754_s6  ;;  %s5255_s24 = scalar_lea.vmem [#allocation27], %s4754_s6 }
 0x23b   : > { %3069 = vmatpush3.bf16.msra.mxu0 %v3280_v11  ;;  %v2996_v27 = vld [vmem:[%s5246_s19] ss:$0 sm:$0xff]  ;;  %s5254_s18 = smov %s5253_s11  ;;  %s5256_s21 = scalar_lea.vmem [#allocation12], %s4724_s26 }
 0x23c   : > { %3077 = vmatpush3.bf16.msra.mxu1 %v3281_v12  ;;  %3082 = vmatprep.subr.bf16.mxu0 %v3949_v10  ;;  %v2995_v28 = vld [vmem:[%s5247_s16] ss:$0 sm:$0xff]  ;;  %s5257_s1 = scalar_lea.vmem [#allocation14], %s4724_s26  ;;  %s5258_s0 = scalar_lea.vmem [#allocation24], %s4724_s26 }
 0x23d   : > { %3090 = vmatprep.subr.bf16.mxu1 %v3949_v10  ;;  %v3282_v36 = vld [vmem:[%s4805_s27] sm:$0xff]   ;;  %s5260_s4 = scalar_lea.vmem [#allocation29], %s4754_s6  ;;  %s5263_s6 = sld [smem:[#allocation47_spill]] }
 0x23e   : > { %v3284_v45 = vld [vmem:[%s5248_s7] sm:$0xff]   ;;  %s5261_s27 = smov %s5260_s4 }
 0x23f   : > { %v1605_v47 = vld [vmem:[%s1329_s10] sm:$0x1]  ;;  %s5252_s10 = scalar_lea.vmem [#allocation21], %s4724_s26 }
 0x240   : > { %v1620_v49 = vsub.f32 0.0, %v1605_v47  ;;  %v3007_v50 = vld [vmem:[%s1326_s25] ss:$0 sm:$0xff]  ;;  %v1617_v51 = vrot.slane %v1605_v47, %v1616_v48  ;;  %s5259_s25 = scalar_lea.vmem [#allocation23], %s4724_s26  ;;  %s5262_s26 = smov %s5255_s24 }
 0x242   : > { %v1625_v55 = vrot.slane %v1620_v49, %v1616_v48 }
 0x243   : > { %p3026_p0 = scmp.ne.s32.totalorder %s5263_s6, 1 }
 0x244   : > { %vm2394_vm12 = vcmask (!%p3026_p0), 1043456   ;;  %s5264_s17 = sld [smem:[#allocation82_spill]] (!%p3026_p0)  ;;  %vm3953_vm13 = vmmov (!%p3026_p0), 0   ;;  %s5265_s28 = sld [smem:[#allocation84_spill]] (!%p3026_p0)  ;;  %vm2390_vm14 = vcmask (!%p3026_p0), 64512   ;;  %vm2472_vm15 = vcmask (!%p3026_p0), 130048  }
 0x245   : > { %s5266_s9 = sld [smem:[#allocation83_spill]] (!%p3026_p0)  ;;  %vm2516_vm0 = vcmask (!%p3026_p0), 257024  }
 0x2c4   : > { %v1359_v3 = vpop.xlane.xlu0 %1358 }
 0x2c5   : > { %v1361_v4 = vmul.f32 0.03125, %v1359_v3 }
 0x2c7   : > { %v1362_v5 = vsub.f32 %v4811_v1, %v1361_v4  ;;  %v3951_v4 = vmov 1966171168  }
 0x2c9   : > { %v1363_v6 = vmul.f32 %v1362_v5, %v1362_v5 }
 0x2cb   : > { %v1364_v7 = vsel %vm1356_vm1, %v1363_v6, 0.0 }
 0x2cc   : > { %1365 = vadd.xlane.f32.xlu0 %v1364_v7 }
 0x359   : > { %v1366_v13 = vpop.xlane.xlu0 %1365 }
 0x35a   : > { %v1367_v14 = vmul.f32 0.03125, %v1366_v13 }
 0x35c   : > { %v1368_v15 = vadd.f32 1e-05, %v1367_v14 }
 0x35e   : > { %3292 = vrsqrt.f32 %v1368_v15 }
 0x368   : > { %v3293_v17 = vpop.eup %3292 }
 0x369   : > { %v1370_v19 = vmul.f32 %v3293_v17, %v1362_v5  ;;  %v1636_v5 = vunpack.c.l.s4 %v3951_v4 }
 0x36b   : > { %v1377_v22 = vmul.f32 %v2992_v18, %v1370_v19  ;;  %v1637_v6 = vunpack.c.0.s8 %v1636_v5 }
 0x36d   : > { %v1384_v23 = vadd.f32 %v2993_v20, %v1377_v22  ;;  %v4873_v7 = vsub.s32 %v1637_v6, %v4831_v21 }
 0x36f   : > { %v1385_v24 = vrot.slane %v1384_v23, 7 }
 0x371   : > { %v1389_v26 = vsel %vm1388_vm3, 0.0, %v1385_v24 }
 0x372   : > { %v1391_v29 = vsub.f32 %v1384_v23, %v1389_v26 }
 0x374   : > { %v1398_v30 = vmul.f32 %v2994_v25, %v1391_v29  ;;  %v1416_v31 = vmul.f32 %v2996_v27, %v1391_v29  ;;  %v1407_v32 = vmul.f32 %v2995_v28, %v1391_v29 }
 0x376   : > { %v1399_v33 = vadd.f32 %v1398_v30, %v1389_v26  ;;  %v1417_v34 = vadd.f32 %v1416_v31, %v1389_v26  ;;  %v1408_v35 = vadd.f32 %v1407_v32, %v1389_v26 }
 0x378   : > { %v2997_v37 = vmul.f32 -1.442695, %v1417_v34  ;;  %v1424_v38 = vpack.c.bf16 %v1399_v33, %v1399_v33  ;;  %v1484_v39 = vpack.c.bf16 %v1408_v35, %v1408_v35 }
 0x37a   : > { %3294 = vpow2.f32 %v2997_v37  ;;  %3071 = vmatmul.mubr.msk.bf16.vlgmr.msra.gmra.mrb[0].mxu0 %vm1356_vm1, %v1424_v38  ;;  %3079 = vmatmul.mubr.msk.bf16.vlgmr.msra.gmra.mrb[0].mxu1 %vm1356_vm1, %v1484_v39 }
 0x37b   : > { %3083 = vmatpush3.bf16.msra.mxu0 %v3282_v36  ;;  %3086 = vmatprep.mubr.msk.bf16.mxu0 %vm3950_vm2, %v3949_v10 }
 0x37c   : > { %3084 = vmatprep.subr.bf16.mxu0 %v3949_v10  ;;  %3094 = vmatprep.mubr.msk.bf16.mxu1 %vm3950_vm2, %v3949_v10 }
 0x37d   : > { %3091 = vmatpush3.bf16.msra.mxu1 %v3284_v45 }
 0x37e   : > { %3092 = vmatprep.subr.bf16.mxu1 %v3949_v10 }
 0x37f   : > { %3085 = vmatpush3.bf16.msra.mxu0 %v3283_v40 }
 0x380   : > { %3098 = vmatprep.subr.bf16.mxu0 %v3949_v10 }
 0x381   : > { %3093 = vmatpush3.bf16.msra.mxu1 %v3285_v46 }
 0x382   : > { %3106 = vmatprep.subr.bf16.mxu1 %v3949_v10 }
 0x384   : > { %v3295_v41 = vpop.eup %3294 }
 0x385   : > { %v1421_v42 = vadd.f32 1.0, %v3295_v41 }
 0x387   : > { %3296 = vrcp.f32 %v1421_v42 }
 0x391   : > { %v3297_v43 = vpop.eup %3296 }
 0x392   : > { %v1544_v44 = vpack.c.bf16 %v3297_v43, %v3297_v43 }
 0x394   : > { %3087 = vmatmul.mubr.msk.bf16.vlgmr.msra.gmra.mrb[4].mxu0 %vm1356_vm1, %v1544_v44 }
 0x395   : > { %3102 = vmatprep.mubr.msk.bf16.mxu0 %vm3950_vm2, %v3949_v10 }
 0x44d   : > { %v1478_v52 = vpop.f32.mrb[0].mxu0  ;;  %v1538_v53 = vpop.f32.mrb[0].mxu1 }
 0x44e   : > { %v1612_v54 = vadd.f32 %v3007_v50, %v1478_v52  ;;  %v3072_v56 = vpop.f32.mrb[1].mxu0  ;;  %v3080_v57 = vpop.f32.mrb[1].mxu1 }
 0x44f   : > { %v1481_v58 = vpop.f32.mrb[2].mxu0  ;;  %v1541_v59 = vpop.f32.mrb[2].mxu1 }
 0x450   : > { %v1619_v60 = vmax.f32 %v1612_v54, %v1617_v51  ;;  %v3073_v61 = vpop.f32.mrb[3].mxu0  ;;  %v3081_v62 = vpop.f32.mrb[3].mxu1 }
 0x452   : > { %v1627_v63 = vsub.f32 %v1625_v55, %v1619_v60  ;;  %v1630_v0 = vsub.f32 %v1612_v54, %v1619_v60 }
 0x454   : > { %v1628_v2 = vmul.f32 1.442695, %v1627_v63  ;;  %v1631_v3 = vmul.f32 1.442695, %v1630_v0 }
 0x456   : > { %3298 = vpow2.f32 %v1628_v2 }
 0x457   : > { %3300 = vpow2.f32 %v1631_v3 }
 0x460   : > { %v3299_v8 = vpop.eup %3298 }
 0x461   : > { %v3301_v9 = vpop.eup %3300  ;;  %v1634_v11 = vcombine.high %v3299_v8, %v3299_v8  ;;  %v1641_v12 = vrot.slane %v3299_v8, %v4873_v7 }
 0x462   : > { %v1701_v13 = vcombine.high %v3301_v9, %v3301_v9  ;;  %v1708_v14 = vrot.slane %v3301_v9, %v4873_v7  ;;  %v1766_v15 = vmul.f32 %v3301_v9, %v1538_v53 }
 0x463   : > { %v1648_v16 = vrot.slane %v1634_v11, %v4873_v7  ;;  %v1649_v17 = vcombine.high %v1641_v12, %v1641_v12  ;;  %v1657_v18 = vrot.slane %v1641_v12, %v4873_v7 }
 0x464   : > { %v1715_v19 = vrot.slane %v1701_v13, %v4873_v7  ;;  %v1716_v20 = vcombine.high %v1708_v14, %v1708_v14  ;;  %v1724_v22 = vrot.slane %v1708_v14, %v4873_v7  ;;  %v1768_v23 = vcombine.high %v1766_v15, %v1766_v15 }
 0x465   : > { %v1650_v24 = vcombine.high %v1648_v16, %v1648_v16  ;;  %v1664_v25 = vrot.slane %v1648_v16, %v4873_v7  ;;  %v1671_v26 = vrot.slane %v1649_v17, %v4873_v7  ;;  %v1679_v27 = vcombine.high %v1657_v18, %v1657_v18  ;;  %1692 = vst.msk [vmem:[#allocation3] sm:$0x1] %vm1691_vm4, %v1657_v18 }
 0x466   : > { %v1717_v28 = vcombine.high %v1715_v19, %v1715_v19  ;;  %v1731_v29 = vrot.slane %v1715_v19, %v4873_v7  ;;  %v1738_v30 = vrot.slane %v1716_v20, %v4873_v7  ;;  %v1746_v31 = vcombine.high %v1724_v22, %v1724_v22  ;;  %1758 = vst.msk [vmem:[#allocation4] sm:$0x1] %vm1691_vm4, %v1724_v22 }
 0x467   : > { %v1678_v32 = vrot.slane %v1650_v24, %v4873_v7  ;;  %v1680_v33 = vcombine.high %v1664_v25, %v1664_v25  ;;  %v1681_v34 = vcombine.high %v1671_v26, %v1671_v26  ;;  %1693 = vst.msk [vmem:[#allocation3 + $0x1] sm:$0x1] %vm1691_vm4, %v1671_v26  ;;  %1694 = vst.msk [vmem:[#allocation3 + $0x2] sm:$0x1] %vm1691_vm4, %v1679_v27  ;;  %v4892_v36 = vpop.f32.mrb[4].mxu0 }
 0x468   : > { %1696 = vst.msk [vmem:[#allocation3 + $0x4] sm:$0x1] %vm1691_vm4, %v1664_v25  ;;  %v1775_v35 = vrot.slane %v1766_v15, %v4873_v7  ;;  %v1745_v37 = vrot.slane %v1717_v28, %v4873_v7  ;;  %v1747_v38 = vcombine.high %v1731_v29, %v1731_v29  ;;  %v1748_v39 = vcombine.high %v1738_v30, %v1738_v30  ;;  %v3088_v41 = vpop.f32.mrb[5].mxu0 }
 0x469   : > { %1759 = vst.msk [vmem:[#allocation4 + $0x1] sm:$0x1] %vm1691_vm4, %v1738_v30  ;;  %1760 = vst.msk [vmem:[#allocation4 + $0x2] sm:$0x1] %vm1691_vm4, %v1746_v31  ;;  %v1782_v40 = vrot.slane %v1768_v23, %v4873_v7  ;;  %v1682_v42 = vcombine.high %v1678_v32, %v1678_v32  ;;  %v1601_v45 = vpop.f32.mrb[6].mxu0 }
 0x46a   : > { %1762 = vst.msk [vmem:[#allocation4 + $0x4] sm:$0x1] %vm1691_vm4, %v1731_v29  ;;  %1695 = vst.msk [vmem:[#allocation3 + $0x3] sm:$0x1] %vm1691_vm4, %v1681_v34  ;;  %v1783_v43 = vcombine.high %v1775_v35, %v1775_v35  ;;  %v1791_v44 = vrot.slane %v1775_v35, %v4873_v7  ;;  %v1749_v46 = vcombine.high %v1745_v37, %v1745_v37  ;;  %v3089_v49 = vpop.f32.mrb[7].mxu0 }
 0x46b   : > { %1697 = vst.msk [vmem:[#allocation3 + $0x5] sm:$0x1] %vm1691_vm4, %v1678_v32  ;;  %1698 = vst.msk [vmem:[#allocation3 + $0x6] sm:$0x1] %vm1691_vm4, %v1680_v33  ;;  %v1784_v47 = vcombine.high %v1782_v40, %v1782_v40  ;;  %v1798_v48 = vrot.slane %v1782_v40, %v4873_v7 }
 0x46c   : > { %1761 = vst.msk [vmem:[#allocation4 + $0x3] sm:$0x1] %vm1691_vm4, %v1748_v39  ;;  %1763 = vst.msk [vmem:[#allocation4 + $0x5] sm:$0x1] %vm1691_vm4, %v1745_v37  ;;  %v1805_v50 = vrot.slane %v1783_v43, %v4873_v7  ;;  %v1813_v51 = vcombine.high %v1791_v44, %v1791_v44  ;;  %v1833_v54 = vld [vmem:[#allocation3] sm:$0x1] }
 0x46d   : > { %1764 = vst.msk [vmem:[#allocation4 + $0x6] sm:$0x1] %vm1691_vm4, %v1747_v38  ;;  %1699 = vst.msk [vmem:[#allocation3 + $0x7] sm:$0x1] %vm1691_vm4, %v1682_v42  ;;  %v1812_v52 = vrot.slane %v1784_v47, %v4873_v7  ;;  %v1814_v53 = vcombine.high %v1798_v48, %v1798_v48  ;;  %v1857_v56 = vmul.f32 0.0, %v1833_v54 }
 0x46e   : > { %1825 = vst.msk [vmem:[#allocation5] sm:$0x1] %vm1691_vm4, %v1791_v44  ;;  %1765 = vst.msk [vmem:[#allocation4 + $0x7] sm:$0x1] %vm1691_vm4, %v1749_v46  ;;  %v1815_v55 = vcombine.high %v1805_v50, %v1805_v50  ;;  %v1841_v58 = vld [vmem:[#allocation4] sm:$0x1] }
 0x46f   : > { %1829 = vst.msk [vmem:[#allocation5 + $0x4] sm:$0x1] %vm1691_vm4, %v1798_v48  ;;  %1826 = vst.msk [vmem:[#allocation5 + $0x1] sm:$0x1] %vm1691_vm4, %v1805_v50  ;;  %v1816_v57 = vcombine.high %v1812_v52, %v1812_v52  ;;  %v1859_v59 = vadd.f32 %v1857_v56, %v1841_v58  ;;  %v1834_v60 = vld [vmem:[#allocation3 + $0x1] sm:$0x1]  ;;  %v1944_v48 = vrot.slane %v4892_v36, %v4873_v7 }
 0x470   : > { %1827 = vst.msk [vmem:[#allocation5 + $0x2] sm:$0x1] %vm1691_vm4, %v1813_v51  ;;  %1830 = vst.msk [vmem:[#allocation5 + $0x5] sm:$0x1] %vm1691_vm4, %v1812_v52  ;;  %v1842_v62 = vld [vmem:[#allocation4 + $0x1] sm:$0x1] }
 0x471   : > { %1831 = vst.msk [vmem:[#allocation5 + $0x6] sm:$0x1] %vm1691_vm4, %v1814_v53  ;;  %1828 = vst.msk [vmem:[#allocation5 + $0x3] sm:$0x1] %vm1691_vm4, %v1815_v55  ;;  %v1862_v61 = vmul.f32 %v1859_v59, %v1834_v60  ;;  %v1835_v3 = vld [vmem:[#allocation3 + $0x2] sm:$0x1] }
 0x472   : > { %1832 = vst.msk [vmem:[#allocation5 + $0x7] sm:$0x1] %vm1691_vm4, %v1816_v57  ;;  %1896 = vst.msk [vmem:[#allocation4] sm:$0x1] %vm1691_vm4, %v1859_v59  ;;  %v1843_v6 = vld [vmem:[#allocation4 + $0x2] sm:$0x1]  ;;  %v1952_v57 = vcombine.high %v1944_v48, %v1944_v48 }
 0x473   : > { %v1863_v2 = vadd.f32 %v1862_v61, %v1842_v62  ;;  %v1836_v12 = vld [vmem:[#allocation3 + $0x3] sm:$0x1]  ;;  %v1844_v15 = vld [vmem:[#allocation4 + $0x3] sm:$0x1]  ;;  %v1837_v19 = vld [vmem:[#allocation3 + $0x4] sm:$0x1] }
 0x474   : > { %v1845_v23 = vld [vmem:[#allocation4 + $0x4] sm:$0x1]  ;;  %v1838_v27 = vld [vmem:[#allocation3 + $0x5] sm:$0x1]  ;;  %v1846_v32 = vld [vmem:[#allocation4 + $0x5] sm:$0x1] }
 0x475   : > { %v1849_v63 = vld [vmem:[#allocation5] sm:$0x1]  ;;  %v1866_v5 = vmul.f32 %v1863_v2, %v1835_v3  ;;  %1897 = vst.msk [vmem:[#allocation4 + $0x1] sm:$0x1] %vm1691_vm4, %v1863_v2  ;;  %v1839_v37 = vld [vmem:[#allocation3 + $0x6] sm:$0x1]  ;;  %v1960_v2 = vrot.slane %v1944_v48, %v4873_v7 }
 0x476   : > { %v1858_v0 = vadd.f32 %v1857_v56, %v1849_v63  ;;  %v1850_v8 = vld [vmem:[#allocation5 + $0x1] sm:$0x1]  ;;  %v1853_v33 = vld [vmem:[#allocation5 + $0x4] sm:$0x1]  ;;  %v1847_v42 = vld [vmem:[#allocation4 + $0x6] sm:$0x1]  ;;  %v1937_v56 = vcombine.high %v4892_v36, %v4892_v36 }
 0x477   : > { %v1867_v11 = vadd.f32 %v1866_v5, %v1843_v6  ;;  %v1851_v16 = vld [vmem:[#allocation5 + $0x2] sm:$0x1]  ;;  %v1854_v43 = vld [vmem:[#allocation5 + $0x5] sm:$0x1]  ;;  %v1840_v46 = vld [vmem:[#allocation3 + $0x7] sm:$0x1]  ;;  %v1974_v6 = vrot.slane %v1952_v57, %v4873_v7 }
 0x478   : > { %v1860_v4 = vmul.f32 %v1858_v0, %v1834_v60  ;;  %1888 = vst.msk [vmem:[#allocation5] sm:$0x1] %vm1691_vm4, %v1858_v0  ;;  %v1852_v24 = vld [vmem:[#allocation5 + $0x3] sm:$0x1]  ;;  %v1848_v51 = vld [vmem:[#allocation4 + $0x7] sm:$0x1]  ;;  %v1951_v36 = vrot.slane %v1937_v56, %v4873_v7 }
 0x479   : > { %v1870_v14 = vmul.f32 %v1867_v11, %v1836_v12  ;;  %1898 = vst.msk [vmem:[#allocation4 + $0x2] sm:$0x1] %vm1691_vm4, %v1867_v11  ;;  %v1912_v41 = vld [vmem:[#allocation4] sm:$0x1]  ;;  %v1855_v52 = vld [vmem:[#allocation5 + $0x6] sm:$0x1] }
 0x47a   : > { %v1861_v9 = vadd.f32 %v1860_v4, %v1850_v8  ;;  %v1856_v61 = vld [vmem:[#allocation5 + $0x7] sm:$0x1] }
 0x47b   : > { %v1871_v18 = vadd.f32 %v1870_v14, %v1844_v15  ;;  %v1982_v15 = vcombine.high %v1960_v2, %v1960_v2 }
 0x47c   : > { %v1864_v13 = vmul.f32 %v1861_v9, %v1835_v3  ;;  %1889 = vst.msk [vmem:[#allocation5 + $0x1] sm:$0x1] %vm1691_vm4, %v1861_v9  ;;  %v1913_v28 = vld [vmem:[#allocation4 + $0x1] sm:$0x1] }
 0x47d   : > { %v1874_v22 = vmul.f32 %v1871_v18, %v1837_v19  ;;  %1899 = vst.msk [vmem:[#allocation4 + $0x3] sm:$0x1] %vm1691_vm4, %v1871_v18  ;;  %3302 = vrcp.f32 %v1913_v28  ;;  %v1953_v18 = vcombine.high %v1951_v36, %v1951_v36 }
 0x47e   : > { %v1865_v17 = vadd.f32 %v1864_v13, %v1851_v16 }
 0x47f   : > { %v1875_v26 = vadd.f32 %v1874_v22, %v1845_v23  ;;  %v1904_v22 = vld [vmem:[#allocation5] sm:$0x1]  ;;  %v1967_v23 = vrot.slane %v1951_v36, %v4873_v7 }
 0x480   : > { %v1868_v20 = vmul.f32 %v1865_v17, %v1836_v12  ;;  %1890 = vst.msk [vmem:[#allocation5 + $0x2] sm:$0x1] %vm1691_vm4, %v1865_v17  ;;  %v1914_v31 = vld [vmem:[#allocation4 + $0x2] sm:$0x1] }
 0x481   : > { %v1878_v30 = vmul.f32 %v1875_v26, %v1838_v27  ;;  %1900 = vst.msk [vmem:[#allocation4 + $0x4] sm:$0x1] %vm1691_vm4, %v1875_v26  ;;  %3304 = vrcp.f32 %v1914_v31  ;;  %v1981_v31 = vrot.slane %v1953_v18, %v4873_v7 }
 0x482   : > { %v1869_v25 = vadd.f32 %v1868_v20, %v1852_v24 }
 0x483   : > { %v1879_v35 = vadd.f32 %v1878_v30, %v1846_v32  ;;  %v1905_v0 = vld [vmem:[#allocation5 + $0x1] sm:$0x1] }
 0x484   : > { %v1872_v29 = vmul.f32 %v1869_v25, %v1837_v19  ;;  %1891 = vst.msk [vmem:[#allocation5 + $0x3] sm:$0x1] %vm1691_vm4, %v1869_v25  ;;  %v1915_v38 = vld [vmem:[#allocation4 + $0x3] sm:$0x1]  ;;  %v1984_v19 = vcombine.high %v1974_v6, %v1974_v6 }
 0x485   : > { %v1882_v40 = vmul.f32 %v1879_v35, %v1839_v37  ;;  %1901 = vst.msk [vmem:[#allocation4 + $0x5] sm:$0x1] %vm1691_vm4, %v1879_v35  ;;  %3306 = vrcp.f32 %v1915_v38 }
 0x486   : > { %v1873_v34 = vadd.f32 %v1872_v29, %v1853_v33  ;;  %3308 = vrcp.f32 %v1912_v41 }
 0x487   : > { %v1883_v45 = vadd.f32 %v1882_v40, %v1847_v42  ;;  %v3303_v58 = vpop.eup %3302  ;;  %v1906_v3 = vld [vmem:[#allocation5 + $0x2] sm:$0x1]  ;;  %v1983_v42 = vcombine.high %v1967_v23, %v1967_v23 }
 0x488   : > { %v1876_v39 = vmul.f32 %v1873_v34, %v1838_v27  ;;  %1892 = vst.msk [vmem:[#allocation5 + $0x4] sm:$0x1] %vm1691_vm4, %v1873_v34  ;;  %v1916_v47 = vld [vmem:[#allocation4 + $0x4] sm:$0x1]  ;;  %v1923_v5 = vmul.f32 %v3303_v58, %v1905_v0 }
 0x489   : > { %v1886_v50 = vmul.f32 %v1883_v45, %v1840_v46  ;;  %1902 = vst.msk [vmem:[#allocation4 + $0x6] sm:$0x1] %vm1691_vm4, %v1883_v45  ;;  %3310 = vrcp.f32 %v1916_v47 }
 0x48a   : > { %v1877_v44 = vadd.f32 %v1876_v39, %v1854_v43  ;;  %v1995_v20 = vmul.f32 %v1974_v6, %v1923_v5 }
 0x48b   : > { %v1887_v54 = vadd.f32 %v1886_v50, %v1848_v51  ;;  %v3305_v60 = vpop.eup %3304  ;;  %v1907_v8 = vld [vmem:[#allocation5 + $0x3] sm:$0x1]  ;;  %v1985_v51 = vcombine.high %v1981_v31, %v1981_v31 }
 0x48c   : > { %v1880_v49 = vmul.f32 %v1877_v44, %v1839_v37  ;;  %1893 = vst.msk [vmem:[#allocation5 + $0x5] sm:$0x1] %vm1691_vm4, %v1877_v44  ;;  %v1917_v55 = vld [vmem:[#allocation4 + $0x5] sm:$0x1]  ;;  %v1925_v9 = vmul.f32 %v3305_v60, %v1906_v3  ;;  %v2003_v32 = vpack.c.bf16 %v1995_v20, %v1995_v20 }
 0x48d   : > { %1903 = vst.msk [vmem:[#allocation4 + $0x7] sm:$0x1] %vm1691_vm4, %v1887_v54  ;;  %3312 = vrcp.f32 %v1917_v55 }
 0x48e   : > { %v1881_v53 = vadd.f32 %v1880_v49, %v1855_v52  ;;  %v1996_v24 = vmul.f32 %v1982_v15, %v1925_v9  ;;  %v2030_v44 = vunpack.c.l.b16 %v2003_v32 }
 0x48f   : > { %v3307_v62 = vpop.eup %3306  ;;  %v1908_v14 = vld [vmem:[#allocation5 + $0x4] sm:$0x1] }
 0x490   : > { %v1884_v59 = vmul.f32 %v1881_v53, %v1840_v46  ;;  %1894 = vst.msk [vmem:[#allocation5 + $0x6] sm:$0x1] %vm1691_vm4, %v1881_v53  ;;  %v1918_v4 = vld [vmem:[#allocation4 + $0x6] sm:$0x1]  ;;  %v3309_v11 = vpop.eup %3308  ;;  %v1927_v12 = vmul.f32 %v3307_v62, %v1907_v8  ;;  %v2004_v33 = vpack.c.bf16 %v1996_v24, %v1996_v24  ;;  %v2037_v55 = vrot.slane %v2030_v44, 7 }
 0x491   : > { %3314 = vrcp.f32 %v1918_v4  ;;  %v1921_v25 = vmul.f32 %v3309_v11, %v1904_v22  ;;  %v3015_v44 = vld [vmem:[%s5259_s25] ss:$0 sm:$0xff] }
 0x492   : > { %v1885_v63 = vadd.f32 %v1884_v59, %v1856_v61  ;;  %v1997_v26 = vmul.f32 %v1984_v19, %v1927_v12  ;;  %v2031_v45 = vunpack.c.l.b16 %v2004_v33  ;;  %v3012_v33 = vld [vmem:[%s5256_s21] ss:$0 sm:$0xff] }
 0x493   : > { %v3311_v13 = vpop.eup %3310  ;;  %v1909_v28 = vld [vmem:[#allocation5 + $0x5] sm:$0x1]  ;;  %v1994_v34 = vmul.f32 %v1960_v2, %v1921_v25 }
 0x494   : > { %1895 = vst.msk [vmem:[#allocation5 + $0x7] sm:$0x1] %vm1691_vm4, %v1885_v63  ;;  %v1919_v16 = vld [vmem:[#allocation4 + $0x7] sm:$0x1]  ;;  %v1929_v17 = vmul.f32 %v3311_v13, %v1908_v14  ;;  %v2005_v37 = vpack.c.bf16 %v1997_v26, %v1997_v26  ;;  %v2040_v56 = vrot.slane %v2031_v45, 6 }
 0x495   : > { %3316 = vrcp.f32 %v1919_v16  ;;  %v2002_v47 = vpack.c.bf16 %v1994_v34, %v1994_v34  ;;  %v3008_v13 = vld [vmem:[%s5252_s10] ss:$0 sm:$0xff] }
 0x496   : > { %v1998_v29 = vmul.f32 %v1967_v23, %v1929_v17  ;;  %v2032_v48 = vunpack.c.l.b16 %v2005_v37 }
 0x497   : > { %v3313_v27 = vpop.eup %3312  ;;  %v1910_v39 = vld [vmem:[#allocation5 + $0x6] sm:$0x1]  ;;  %v2029_v58 = vunpack.c.l.b16 %v2002_v47 }
 0x498   : > { %v1931_v30 = vmul.f32 %v3313_v27, %v1909_v28  ;;  %v2006_v40 = vpack.c.bf16 %v1998_v29, %v1998_v29  ;;  %v2043_v60 = vrot.slane %v2032_v48, 5  ;;  %v3286_v27 = vld [vmem:[%s5253_s11] sm:$0xff]  }
 0x499   : > { %v2039_v63 = vsel %vm2038_vm5, %v2037_v55, %v2029_v58  ;;  %3099 = vmatpush3.bf16.msra.mxu0 %v3286_v27  ;;  %v3290_v28 = vld [vmem:[%s5255_s24] sm:$0xff]  }
 0x49a   : > { %v1999_v35 = vmul.f32 %v1981_v31, %v1931_v30  ;;  %v2033_v7 = vunpack.c.l.b16 %v2006_v40  ;;  %v2042_v2 = vsel %vm2041_vm6, %v2040_v56, %v2039_v63  ;;  %3100 = vmatprep.subr.bf16.mxu0 %v3949_v10 }
 0x49b   : > { %v3315_v38 = vpop.eup %3314  ;;  %v1911_v50 = vld [vmem:[#allocation5 + $0x7] sm:$0x1]  ;;  %v2045_v5 = vsel %vm2044_vm7, %v2043_v60, %v2042_v2 }
 0x49c   : > { %v1933_v41 = vmul.f32 %v3315_v38, %v1910_v39  ;;  %v2007_v43 = vpack.c.bf16 %v1999_v35, %v1999_v35  ;;  %v2046_v61 = vrot.slane %v2033_v7, 4  ;;  %v3013_v35 = vld [vmem:[%s5257_s1] ss:$0 sm:$0xff] }
 0x49e   : > { %v2000_v46 = vmul.f32 %v1983_v42, %v1933_v41  ;;  %v2034_v54 = vunpack.c.l.b16 %v2007_v43  ;;  %v2048_v36 = vsel %vm2047_vm8, %v2046_v61, %v2045_v5  ;;  %v3014_v41 = vld [vmem:[%s5258_s0] ss:$0 sm:$0xff] }
 0x49f   : > { %v3317_v49 = vpop.eup %3316 }
 0x4a0   : > { %v1935_v52 = vmul.f32 %v3317_v49, %v1911_v50  ;;  %v2008_v53 = vpack.c.bf16 %v2000_v46, %v2000_v46  ;;  %v2049_v0 = vrot.slane %v2034_v54, 3  ;;  %v3288_v46 = vld [vmem:[%s5260_s4] sm:$0xff]  }
 0x4a1   : > { %v3289_v49 = vld [vmem:[%s5261_s27 + $0x8] sm:$0xff]  }
 0x4a2   : > { %v2001_v57 = vmul.f32 %v1985_v51, %v1935_v52  ;;  %v2035_v59 = vunpack.c.l.b16 %v2008_v53  ;;  %v2051_v6 = vsel %vm2050_vm9, %v2049_v0, %v2048_v36  ;;  %v3291_v51 = vld [vmem:[%s5262_s26 + $0x8] sm:$0xff]  }
 0x4a4   : > { %v2009_v62 = vpack.c.bf16 %v2001_v57, %v2001_v57  ;;  %v2052_v3 = vrot.slane %v2035_v59, 2 }
 0x4a6   : > { %v2036_v4 = vunpack.c.l.b16 %v2009_v62  ;;  %v2054_v9 = vsel %vm2053_vm10, %v2052_v3, %v2051_v6 }
 0x4a8   : > { %v2055_v8 = vrot.slane %v2036_v4, 1 }
 0x4aa   : > { %v2057_v11 = vsel %vm2056_vm11, %v2055_v8, %v2054_v9  ;;  %v2361_v8 = vld [vmem:[#allocation30] sm:$0xf] (!%p3026_p0) }
 0x4ab   : > { %v2058_v12 = vpack.c.b16 %v2057_v11, %v2057_v11  ;;  %2374 = vxpose.xlu0.c.b16.start.end [1/1] (short) (narrow) (!%p3026_p0), %v2361_v8, 16  ;;  %v3952_v11 = vmov (!%p3026_p0), 0.0  }
 0x4ad   : > { %3095 = vmatmul.mubr.msk.bf16.vlgmr.msra.gmra.mrb[4].mxu1 %vm1356_vm1, %v2058_v12  ;;  %v2363_v12 = vld [vmem:[%s5264_s17 + $0x8] sm:$0xff] (!%p3026_p0) }
 0x4ae   : > { %3110 = vmatprep.mubr.msk.bf16.mxu1 %vm3950_vm2, %v3949_v10  ;;  %3107 = vmatpush3.bf16.msra.mxu1 %v3290_v28 }
 0x4af   : > { %3108 = vmatprep.subr.bf16.mxu1 %v3949_v10 }
 0x4b2   : > { %3109 = vmatpush3.bf16.msra.mxu1 %v3291_v51 }
 0x4b3   : > { %3128 = vmatprep.subr.bf16.mxu1 (!%p3026_p0), %v3952_v11 }
 0x580   : > { %v2108_v14 = vpop.f32.mrb[4].mxu1 }
 0x581   : > { %v2109_v15 = vadd.f32 %v3008_v13, %v2108_v14  ;;  %v3096_v16 = vpop.f32.mrb[5].mxu1  ;;  %v3954_v14 = vmov (!%p3026_p0), 0  }
 0x582   : > { %v2111_v17 = vpop.f32.mrb[6].mxu1  ;;  %3325 = vset.pattern.permute.xlu1 (!%p3026_p0), %v3954_v14  ;;  %3324 = vset.pattern.permute.xlu0 (!%p3026_p0), %v3954_v14  ;;  %v2444_v16 = vld [vmem:[%s5265_s28] sm:$0xf] (!%p3026_p0) }
 0x583   : > { %v4950_v18 = vadd.f32 %v2109_v15, %v4811_v1  ;;  %v3097_v19 = vpop.f32.mrb[7].mxu1  ;;  %v3287_v1 = vld [vmem:[%s5254_s18 + $0x8] sm:$0xff]   ;;  %v2362_v15 = vld [vmem:[%s5264_s17] sm:$0xff] (!%p3026_p0) }
 0x584   : > { %3101 = vmatpush3.bf16.msra.mxu0 %v3287_v1  ;;  %2366 = vperm.xlu0 (!%p3026_p0), %3324, %v2362_v15   ;;  %v3326_v17 = vld [vmem:[%s5266_s9] sm:$0xff] (!%p3026_p0)  }
 0x585   : > { %v2117_v20 = vsel %vm1356_vm1, %v4950_v18, 0.0  ;;  %3114 = vmatprep.subr.bf16.mxu0 %v3949_v10 }
 0x586   : > { %2118 = vadd.xlane.f32.xlu1 %v2117_v20 }
 0x588   : > { %2447 = vperm.xlu0 (!%p3026_p0), %3324, %v2444_v16  }
 0x613   : > { %v2119_v22 = vpop.xlane.xlu1 %2118 }
 0x614   : > { %v2120_v23 = vmul.f32 0.03125, %v2119_v22 }
 0x616   : > { %v2121_v24 = vsub.f32 %v4950_v18, %v2120_v23 }
 0x618   : > { %v2122_v25 = vmul.f32 %v2121_v24, %v2121_v24 }
 0x61a   : > { %v2123_v26 = vsel %vm1356_vm1, %v2122_v25, 0.0 }
 0x61b   : > { %2124 = vadd.xlane.f32.xlu1 %v2123_v26 }
 0x62c   : > { %2371 = vperm.xlu1 (!%p3026_p0), %3325, %v2363_v12  }
 0x64f   : > { %2456 = vxpose.xlu1.c.b16.start.end [1/1] (short) (narrow) (!%p3026_p0), %v3326_v17, 16 }
 0x6a8   : > { %v2125_v29 = vpop.xlane.xlu1 %2124 }
 0x6a9   : > { %v2126_v30 = vmul.f32 0.03125, %v2125_v29 }
 0x6ab   : > { %v2127_v31 = vadd.f32 1e-05, %v2126_v30 }
 0x6ac   : > { %v2372_v22 = vpop.permute.xlu1 (!%p3026_p0), %2371 }
 0x6ad   : > { %3318 = vrsqrt.f32 %v2127_v31 }
 0x6b5   : > { %v2464_v30 = vpop.trf.xlu1 (!%p3026_p0) }
 0x6b7   : > { %v3319_v32 = vpop.eup %3318 }
 0x6b8   : > { %v2129_v34 = vmul.f32 %v3319_v32, %v2121_v24 }
 0x6ba   : > { %v2136_v37 = vmul.f32 %v3012_v33, %v2129_v34 }
 0x6bc   : > { %v2143_v38 = vadd.f32 %v3013_v35, %v2136_v37 }
 0x6be   : > { %v2144_v39 = vrot.slane %v2143_v38, 7 }
 0x6c0   : > { %v2145_v40 = vsel %vm1388_vm3, 0.0, %v2144_v39 }
 0x6c1   : > { %v2147_v42 = vsub.f32 %v2143_v38, %v2145_v40 }
 0x6c3   : > { %v2154_v43 = vmul.f32 %v3014_v41, %v2147_v42  ;;  %v2163_v48 = vmul.f32 %v3015_v44, %v2147_v42 }
 0x6c5   : > { %v2155_v45 = vadd.f32 %v2154_v43, %v2145_v40  ;;  %v2164_v21 = vadd.f32 %v2163_v48, %v2145_v40 }
 0x6c7   : > { %v2165_v47 = vpack.c.bf16 %v2155_v45, %v2155_v45  ;;  %v2287_v50 = vpack.c.bf16 %v2164_v21, %v2164_v21 }
 0x6c9   : > { %3103 = vmatmul.mubr.msk.bf16.vlgmr.msra.gmra.mrb[8].mxu0 %vm1356_vm1, %v2165_v47 }
 0x6ca   : > { %3115 = vmatpush3.bf16.msra.mxu0 %v3288_v46  ;;  %3118 = vmatprep.mubr.msk.bf16.mxu0 %vm3950_vm2, %v3949_v10 }
 0x6cb   : > { %3116 = vmatprep.subr.bf16.mxu0 %v3949_v10 }
 0x6ce   : > { %3117 = vmatpush3.bf16.msra.mxu0 %v3289_v49 }
 0x6cf   : > { %3122 = vmatprep.subr.bf16.mxu0 (!%p3026_p0), %v3952_v11 }
 0x6d1   : > { %3119 = vmatmul.mubr.msk.bf16.vlgmr.msra.gmra.mrb[12].mxu0 %vm1356_vm1, %v2287_v50 }
 0x6d2   : > { %3124 = vmatprep.mubr.msk.bf16.mxu0 (!%p3026_p0), %vm3953_vm13, %v3952_v11 }
 0x79c   : > { %v2219_v7 = vpop.f32.mrb[8].mxu0 }
 0x79d   : > { %v2225_v52 = vmax.f32 %v2219_v7, 0.0  ;;  %v3104_v53 = vpop.f32.mrb[9].mxu0 }
 0x79e   : > { %v2222_v54 = vpop.f32.mrb[10].mxu0 }
 0x79f   : > { %v2226_v55 = vmul.f32 %v2225_v52, %v2225_v52  ;;  %v3105_v56 = vpop.f32.mrb[11].mxu0 }
 0x7a1   : > { %v2227_v57 = vpack.c.bf16 %v2226_v55, %v2226_v55 }
 0x7a3   : > { %3111 = vmatmul.mubr.msk.bf16.vlgmr.msra.gmra.mrb[8].mxu1 %vm1356_vm1, %v2227_v57 }
 0x7a4   : > { %v2341_v58 = vpop.f32.mrb[12].mxu0  ;;  %3130 = vmatprep.mubr.msk.bf16.mxu1 (!%p3026_p0), %vm3953_vm13, %v3952_v11 }
 0x7a5   : > { %v3120_v59 = vpop.f32.mrb[13].mxu0  ;;  %v3025_v61 = vmul.f32 -1.442695, %v2341_v58 }
 0x7a6   : > { %v2344_v10 = vpop.f32.mrb[14].mxu0 }
 0x7a7   : > { %v3121_v60 = vpop.f32.mrb[15].mxu0  ;;  %3320 = vpow2.f32 %v3025_v61 }
 0x7b1   : > { %v3321_v62 = vpop.eup %3320 }
 0x7b2   : > { %v2350_v63 = vadd.f32 1.0, %v3321_v62 }
 0x7b4   : > { %3322 = vrcp.f32 %v2350_v63 }
 0x7be   : > { %v3323_v0 = vpop.eup %3322 }
 0x875   : > { %2359 = sbr.rel (%p3026_p0) target bundleno = 2615 (0xa37), region = 188 }
 0x876   : > { %v2281_v2 = vpop.f32.mrb[8].mxu1 }
 0x877   : > { %v2353_v3 = vmul.f32 %v3323_v0, %v2281_v2  ;;  %v3112_v4 = vpop.f32.mrb[9].mxu1 }
 0x878   : > { %v2284_v5 = vpop.f32.mrb[10].mxu1 }
 0x879   : > { %v2354_v36 = vadd.f32 %v2353_v3, %v4950_v18  ;;  %v3113_v6 = vpop.f32.mrb[11].mxu1  ;;  %v2382_v18 = vpop.trf.xlu0 (!%p3026_p0) }
 0x87b   : > { %2355 = vst.msk [vmem:[#allocation2] sm:$0xff] %vm1356_vm1, %v2354_v36  ;;  %v2360_v9 = vpack.c.bf16 (!%p3026_p0), %v2354_v36, %v2354_v36 }
 0x87d   : > { %v2396_v13 = vsel %vm2394_vm12, %v2360_v9, 0  ;;  %v2367_v19 = vpop.permute.xlu0 %2366 }
 0x87e   : > { %3123 = vmatpush3.bf16.msra.mxu0 %v2396_v13 }
 0x881   : > { %3125 = vmatmul.mubr.msk.bf16.vlgmr.msra.gmra.mrb[0].mxu0 %vm2390_vm14, %v2382_v18  ;;  %v2448_v31 = vpop.permute.xlu0 %2447 }
 0x954   : > { %v2432_v20 = vpop.f32.mrb[0].mxu0 }
 0x955   : > { %v2433_v23 = vadd.f32 %v2432_v20, %v2367_v19  ;;  %v3126_v24 = vpop.f32.mrb[1].mxu0 }
 0x956   : > { %v2435_v25 = vpop.f32.mrb[2].mxu0 }
 0x957   : > { %v2436_v26 = vadd.f32 %v2435_v25, %v2372_v22  ;;  %v3127_v27 = vpop.f32.mrb[3].mxu0  ;;  %v2439_v1 = vmax.f32 %v2433_v23, 0.0 }
 0x959   : > { %v2440_v28 = vmax.f32 %v2436_v26, 0.0 }
 0x95b   : > { %v2441_v29 = vpack.c.bf16 %v2440_v28, %v2439_v1 }
 0x95d   : > { %3129 = vmatpush3.bf16.msra.mxu1 %v2441_v29 }
 0x960   : > { %3131 = vmatmul.mubr.msk.bf16.vlgmr.msra.gmra.mrb[0].mxu1 %vm2472_vm15, %v2464_v30 }
 0xa33   : > { %v2510_v32 = vpop.f32.mrb[0].mxu1 }
 0xa34   : > { %v2511_v33 = vadd.f32 %v2510_v32, %v2448_v31  ;;  %v3132_v34 = vpop.f32.mrb[1].mxu1 }
 0xa35   : > { %v2513_v35 = vpop.f32.mrb[2].mxu1 }
 0xa36   : > { %2517 = vst.msk [vmem:[%s4807_s29] sm:$0xf] %vm2516_vm0, %v2511_v33  ;;  %v3133_v37 = vpop.f32.mrb[3].mxu1 }
 0xa37 PF: > { %s5267_s8 = sld [smem:[#allocation48_spill]]  ;;  %s5268_s20 = sld [smem:[#allocation58_spill]] }
 0xa38   : > { %s5269_s24 = sld [smem:[#allocation85_spill]]  ;;  %s2532_s1 = sshll.u32 %s4807_s29, 4  ;;  %s2533_s1 = int_to_ptr.vmem [resolvable:$true] %s2532_s1 }
 0xa39   : > { %s2519_s0 = scalar_lea.sflag [#allocation8], %s4710_s12  ;;  %s3775_s25 = scalar_lea.vmem %s2533_s1, 64 }
 0xa3a   : > { %p3776_p2 = scmp.ne.s32.totalorder %s2533_s1, %s3775_s25  ;;  %s3955_s4 = smov [#allocation32]  }
 0xa3b   : > { %s3779_s27 = sshll.u32 %s3955_s4, 4  ;;  %s3780_s27 = int_to_ptr.vmem [resolvable:$false] %s3779_s27 }
 0xa3c   : > { %s3781_s26 = scalar_lea.vmem %s3780_s27, 128  ;;  %p3782_p4 = scmp.lt.s32.totalorder %s2533_s1, %s3780_s27 }
 0xa3d   : > { %s3031_s10 = sshll.u32 %s5267_s8, 6  ;;  %p5270_p12 = scmp.ne.s32.totalorder %s5268_s20, 0 }
 0xa3e   : > { %s5007_s21 = scalar_lea.hbm %s5269_s24, %s3031_s10  ;;  %p3783_p8 = scmp.lt.s32.totalorder %s3781_s26, %s3775_s25 }
 0xa3f   : > { %p3777_p7 = pnand %p3776_p2, %p5270_p12 }
 0xa40   : > { %p3784_p10 = por %p3783_p8, %p3782_p4 }
 0xa41   : > { %p3778_p13 = pneg %p3777_p7 }
 0xa43   : > { %p3785_p5 = pnand %p3784_p10, %p3778_p13 }
 0xa45   : > { %3788 = shalt.err (!%p3785_p5)
}
 0xa46   : > { %s3789_s12 = scalar_lea.hbm %s5007_s21, 64  ;;  %s3793_s13 = scalar_lea.hbm %s5269_s24, 128 }
 0xa47   : > { %p3790_p6 = scmp.ne.s32.totalorder %s5007_s21, %s3789_s12  ;;  %p3794_p9 = scmp.lt.u32.totalorder %s5007_s21, %s5269_s24 }
 0xa48   : > { %p3795_p1 = scmp.lt.u32.totalorder %s3793_s13, %s3789_s12  ;;  %p3797_p2 = scmp.lt.u32.totalorder %s3789_s12, %s5007_s21 }
 0xa49   : > { %p3791_p11 = pnand %p3790_p6, %p5270_p12 }
 0xa4a   : > { %p3796_p0 = por %p3795_p1, %p3794_p9 }
 0xa4b   : > { %p3792_p3 = pneg %p3791_p11 }
 0xa4c   : > { %p3798_p7 = por %p3797_p2, %p3796_p0 }
 0xa4e   : > { %p3799_p13 = pnand %p3798_p7, %p3792_p3 }
 0xa50   : > { %3802 = shalt.err (!%p3799_p13)
}
 0xa51   : > { %3168 = dma.vmem_to_hbm [thread:$0]  (%p5270_p12), %s2533_s1, 64, %s5007_s21, %s2519_s0  }
 0xa52 PF: > { %s5271_s16 = sld [smem:[#allocation50_spill]]  ;;  %s5272_s7 = sld [smem:[#allocation45_spill]] }
 0xa53   : > { %s5273_s5 = sld [smem:[#allocation59_spill]] }
 0xa58   : > { %p3180_p4 = scmp.ge.s32.totalorder %s5271_s16, 2  ;;  %s2544_s28 = sand.u32 1, %s5272_s7  }
 0xa59   : > { %p5274_p8 = scmp.ne.s32.totalorder %s5273_s5, 0  ;;  %s2545_s3 = scalar_lea.sflag [#allocation8], %s2544_s28 }
 0xa5b   : > { %p3175_p10 = pnand %p3180_p4, %p5274_p8 }
 0xa5d   : > { %3884 = dma.done.wait (!%p3175_p10), %s2545_s3, 64  }
 0xa5e   : > { %3886 = vsyncadd (!%p3175_p10), %s2545_s3, 4294967232  ;;  %s62_s3 = sadd.s32 1, %s5271_s16   ;;  %s5275_s5 = sld [smem:[#allocation43_spill]] }
 0xa5f   : > { %p59_p5 = scmp.ge.s32.totalorder %s62_s3, 6   ;;  %s5276_s26 = sld [smem:[#allocation44_spill]] }
 0xa60   : > { %s5277_s27 = sld [smem:[#allocation55_spill]]  ;;  %s5278_s28 = sld [smem:[#allocation46_spill]] }
 0xa61   : > { %s5279_s14 = sld [smem:[#allocation56_spill]]  ;;  %s5280_s29 = sld [smem:[#allocation49_spill]] }
 0xa62   : > { %s5281_s7 = sld [smem:[#allocation52_spill]]  ;;  %s5282_s9 = sld [smem:[#allocation53_spill]] }
 0xa63   : > { %s5283_s6 = smov %s3909_s2  ;;  %s5285_s0 = smov %s3925_s30 }
 0xa64   :  { %61 = sbr.rel (!%p59_p5) target bundleno = 50 (0x32), region = 356 }
 0xa67   : > { %s5284_s2 = smov %s5279_s14 }
 0xa68   : > { %s5286_s30 = smov %s5282_s9 }
 0xa6b   :  { %2550 = vsyncpa [#allocation7], 1 }
 0xa6c   :  { %2552 = vsyncpa [#allocation7 + $0x1], 1 }
 0xa6d   :  { %2553 = vsyncpa [#allocation10], 1 }
 0xa6e   :  { %2555 = vsyncpa [#allocation10 + $0x1], 1 }
 0xa6f   :  { %2556 = vsyncpa [#allocation13], 1 }
 0xa70   :  { %2558 = vsyncpa [#allocation13 + $0x1], 1 }
 0xa71   :  { %2559 = vsyncpa [#allocation16], 1 }
 0xa72   :  { %2561 = vsyncpa [#allocation16 + $0x1], 1 }
 0xa73   :  { %2562 = vsyncpa [#allocation19], 1 }
 0xa74   :  { %2564 = vsyncpa [#allocation19 + $0x1], 1 }
 0xa75   :  { %2565 = vsyncpa [#allocation22], 1 }
 0xa76   :  { %2567 = vsyncpa [#allocation22 + $0x1], 1 }
 0xa77   :  { %2568 = vsyncpa [#allocation25], 1 }
 0xa78   :  { %2570 = vsyncpa [#allocation25 + $0x1], 1 }
 0xa79   :  { %2571 = vsyncpa [#allocation28], 1 }
 0xa7a   :  { %2573 = vsyncpa [#allocation28 + $0x1], 1 }
 0xa7b   :  { %2574 = vsyncpa [#allocation31], 1 }
 0xa7c   :  { %2575 = vsyncpa [#allocation8], 1 }
 0xa7d   :  { %2577 = vsyncpa [#allocation8 + $0x1], 1 }

</bundles_post_ra>
